<compile_context>
chip_gen: v7x
topology: tpu7x:2x2x1
jax: 0.10.0
libtpu: 0.0.40
codegen_flags: <defaults>
</compile_context>

<pallas_src>
import functools

import jax
import jax.numpy as jnp
from jax.experimental import pallas as pl
from jax.experimental.pallas import tpu as pltpu

NUM_YEARS = 90
BEGIN_YEAR = 1922
INPUT_DIM = 12          # mode == 'avg'
BN_EPS = 1e-5
PRED_PAD = 128          # lane-dense padded logit width
PAD_LOGIT_BIAS = -1e9   # padded logit columns -> exp() underflows to 0


def _round_up(n, m):
    return ((n + m - 1) // m) * m


# ---- packed bias layout (each segment padded to a 128-lane boundary) ----
_PACK_LAYOUT = (
    ("b1", 128), ("b2", 128), ("b3", INPUT_DIM), ("b4", 128), ("b5", 128),
    ("b6", 256), ("b7", 256), ("b8", 128), ("b9", PRED_PAD),
)


def _build_pack_offsets():
    offsets, off = {}, 0
    for name, width in _PACK_LAYOUT:
        offsets[name] = (off, width)
        off += _round_up(width, 128)
    return offsets, off


_PACK_OFFSETS, _PACK_WIDTH = _build_pack_offsets()


# --------------------------------- kernel ------------------------------------
def _sy_kernel(nvalid_ref,                      # scalar prefetch: true batch size
               x_ref, yr_ref,
               w1_ref, w2_ref, w3_ref, w4_ref, w5_ref,
               w6_ref, w7_ref, w8_ref, w9_ref,
               bias_ref,
               pred_ref, loss_ref):
    def bseg(name):
        off, width = _PACK_OFFSETS[name]
        return bias_ref[:, off:off + width]          # static, lane-aligned slice

    def lin(h, w_ref, bname):
        y = jnp.dot(h, w_ref[...], preferred_element_type=jnp.float32)
        return y + bseg(bname)                       # bf16 x bf16 -> f32 + f32 bias

    def lin_relu(h, w_ref, bname):
        return jnp.maximum(lin(h, w_ref, bname), 0.0).astype(jnp.bfloat16)

    x32 = x_ref[...].astype(jnp.float32)             # (TB, 12)
    xb = x32.astype(jnp.bfloat16)

    # --- x_encoder: 12 -> 128 -> 128 -> 12 ---
    h = lin_relu(xb, w1_ref, "b1")
    h = lin_relu(h, w2_ref, "b2")
    enc = lin(h, w3_ref, "b3")                       # (TB, 12) f32

    # dropout(enc) + x (eval: identity).  BatchNorm folded into layer-4 w/b.
    v = (enc + x32).astype(jnp.bfloat16)

    # --- x_encoder_layer: 12 -> 128 -> 128 -> 256 ---
    h = lin_relu(v, w4_ref, "b4")
    h = lin_relu(h, w5_ref, "b5")
    feat = lin(h, w6_ref, "b6").astype(jnp.bfloat16)  # (TB, 256)

    # --- classification_layer: 256 -> 256 -> 128 -> (90 padded to 128) ---
    h = lin_relu(feat, w7_ref, "b7")
    h = lin_relu(h, w8_ref, "b8")
    pred = lin(h, w9_ref, "b9")                      # (TB, 128) f32; pad cols = -1e9

    pred_ref[...] = pred.astype(pred_ref.dtype)      # lane-dense bf16 store

    # --- per-row CrossEntropy on the f32 logits, masked per-tile partial sum ---
    m = jnp.max(pred, axis=-1, keepdims=True)                          # (TB, 1)
    lse = jnp.log(jnp.sum(jnp.exp(pred - m), axis=-1, keepdims=True)) + m
    targets = yr_ref[...]                                              # (TB, 1)
    cols = jax.lax.broadcasted_iota(jnp.int32, pred.shape, 1)
    tgt_logit = jnp.sum(jnp.where(cols == targets, pred, 0.0),
                        axis=-1, keepdims=True)                        # (TB, 1)

    tb = x_ref.shape[0]
    rows = pl.program_id(0) * tb + jax.lax.broadcasted_iota(jnp.int32, (tb, 1), 0)
    valid = rows < nvalid_ref[0]                     # mask padded batch rows
    per_row = jnp.where(valid, lse - tgt_logit, 0.0)
    partial = jnp.sum(per_row)                       # scalar partial sum
    loss_ref[...] = jnp.broadcast_to(partial, loss_ref.shape).astype(jnp.float32)


# --------------------------- one-time parameter pack --------------------------
def prepare_params(params):
    """Hoisted out of the per-call path: fold BatchNorm into layer 4, pad the
    final layer to 128 lanes, cast all matmul weights to bf16, and coalesce
    every bias into a single 128-lane-aligned f32 pack (one parameter DMA)."""
    scale = params["bn_gamma"] * jax.lax.rsqrt(params["bn_var"] + BN_EPS)   # (1,12)
    shift = params["bn_beta"] - params["bn_mean"] * scale                   # (1,12)
    w4f = params["w4"] * scale.reshape(INPUT_DIM, 1)                        # (12,128)
    b4f = params["b4"] + shift @ params["w4"]                               # (1,128)

    w9p = jnp.zeros((128, PRED_PAD), jnp.float32).at[:, :NUM_YEARS].set(params["w9"])
    b9p = jnp.full((1, PRED_PAD), PAD_LOGIT_BIAS,
                   jnp.float32).at[:, :NUM_YEARS].set(params["b9"])

    biases = {
        "b1": params["b1"], "b2": params["b2"], "b3": params["b3"],
        "b4": b4f, "b5": params["b5"], "b6": params["b6"],
        "b7": params["b7"], "b8": params["b8"], "b9": b9p,
    }
    segs = []
    for name, width in _PACK_LAYOUT:
        seg = biases[name].astype(jnp.float32).reshape(1, width)
        pad = _round_up(width, 128) - width
        if pad:
            seg = jnp.pad(seg, ((0, 0), (0, pad)))
        segs.append(seg)
    bias_pack = jnp.concatenate(segs, axis=1)        # (1, _PACK_WIDTH)

    weights = tuple(
        w.astype(jnp.bfloat16)
        for w in (params["w1"], params["w2"], params["w3"], w4f, params["w5"],
                  params["w6"], params["w7"], params["w8"], w9p))
    return {"weights": weights, "bias_pack": bias_pack}


# ------------------------------ host wrapper ----------------------------------
def sy_baseline_forward(x, year, packed, *, tile_b=None):
    """x: (B, 12) float, year: (B,) int absolute years, packed: prepare_params()."""
    B = x.shape[0]
    if tile_b is None:
        if B <= 256:
            tile_b = _round_up(max(B, 8), 8)
        else:
            # Large tiles amortize the ~0.35us per-grid-step overhead; keep
            # >=4 tiles for v7x's two TensorCores; round to the 256 MXU M-dim.
            tile_b = min(1024, max(256, _round_up(B // 4, 256)))
    tile_b = max(8, _round_up(tile_b, 8))
    B_pad = _round_up(B, tile_b)
    n_tiles = B_pad // tile_b

    x32 = x.astype(jnp.float32)
    yr = (year.astype(jnp.int32) - BEGIN_YEAR).reshape(B, 1)
    if B_pad != B:
        x32 = jnp.pad(x32, ((0, B_pad - B), (0, 0)))
        yr = jnp.pad(yr, ((0, B_pad - B), (0, 0)))
    nvalid = jnp.full((1,), B, jnp.int32)            # scalar-prefetch: true batch

    weights = packed["weights"]
    bias_pack = packed["bias_pack"]

    in_specs = (
        [pl.BlockSpec((tile_b, INPUT_DIM), lambda i, nv: (i, 0)),   # x: streamed
         pl.BlockSpec((tile_b, 1), lambda i, nv: (i, 0))]           # targets
        + [pl.BlockSpec(w.shape, lambda i, nv: (0, 0)) for w in weights]  # resident
        + [pl.BlockSpec(bias_pack.shape, lambda i, nv: (0, 0))]          # resident
    )
    out_shapes = (
        jax.ShapeDtypeStruct((B_pad, PRED_PAD), jnp.bfloat16),   # padded bf16 logits
        jax.ShapeDtypeStruct((n_tiles, 8, 128), jnp.float32),    # per-tile loss sums
    )
    out_specs = (
        pl.BlockSpec((tile_b, PRED_PAD), lambda i, nv: (i, 0)),
        pl.BlockSpec((1, 8, 128), lambda i, nv: (i, 0, 0)),
    )

    compiler_kwargs = dict(dimension_semantics=("parallel",))
    if tile_b >= 2048:
        # v5e's default scoped-VMEM limit (16 MiB) can trip for very large tiles.
        compiler_kwargs["vmem_limit_bytes"] = 64 * 1024 * 1024

    pred_pad, loss_tiles = pl.pallas_call(
        _sy_kernel,
        out_shape=out_shapes,
        grid_spec=pltpu.PrefetchScalarGridSpec(
            num_scalar_prefetch=1,
            grid=(n_tiles,),
            in_specs=in_specs,
            out_specs=out_specs,
        ),
        compiler_params=pltpu.CompilerParams(**compiler_kwargs),
    )(nvalid, x32, yr, *weights, bias_pack)

    pred = pred_pad[:B, :NUM_YEARS].astype(jnp.float32)
    loss = jnp.sum(loss_tiles[:, 0, 0]) / B
    return pred, loss


# ----------------------------- reference & init -------------------------------
def sy_reference(x, year, params):
    """Pure-JAX reference mirroring the kernel's dtype / BN-folding choices."""
    def lin(h, w, b):
        return jnp.dot(h.astype(jnp.bfloat16), w.astype(jnp.bfloat16),
                       preferred_element_type=jnp.float32) + b

    x32 = x.astype(jnp.float32)
    h = jnp.maximum(lin(x32, params["w1"], params["b1"]), 0.0)
    h = jnp.maximum(lin(h, params["w2"], params["b2"]), 0.0)
    enc = lin(h, params["w3"], params["b3"])
    v = enc + x32
    scale = params["bn_gamma"] * jax.lax.rsqrt(params["bn_var"] + BN_EPS)
    shift = params["bn_beta"] - params["bn_mean"] * scale
    w4f = params["w4"] * scale.reshape(INPUT_DIM, 1)
    b4f = params["b4"] + shift @ params["w4"]
    h = jnp.maximum(lin(v, w4f, b4f), 0.0)
    h = jnp.maximum(lin(h, params["w5"], params["b5"]), 0.0)
    feat = lin(h, params["w6"], params["b6"])
    h = jnp.maximum(lin(feat, params["w7"], params["b7"]), 0.0)
    h = jnp.maximum(lin(h, params["w8"], params["b8"]), 0.0)
    pred = lin(h, params["w9"], params["b9"])
    tgt = (year - BEGIN_YEAR).astype(jnp.int32)
    m = jnp.max(pred, axis=-1, keepdims=True)
    lse = jnp.log(jnp.sum(jnp.exp(pred - m), axis=-1, keepdims=True)) + m
    tgt_logit = jnp.take_along_axis(pred, tgt[:, None], axis=-1)
    loss = jnp.mean(lse - tgt_logit)
    return pred, loss


def init_params(key):
    """Deterministic init. Linear weights stored as (in, out)."""
    dims = [
        ("1", INPUT_DIM, 128), ("2", 128, 128), ("3", 128, INPUT_DIM),   # x_encoder
        ("4", INPUT_DIM, 128), ("5", 128, 128), ("6", 128, 256),         # x_encoder_layer
        ("7", 256, 256), ("8", 256, 128), ("9", 128, NUM_YEARS),         # classification
    ]
    params = {}
    for name, fan_in, fan_out in dims:
        key, kw, kb = jax.random.split(key, 3)
        bound = 1.0 / jnp.sqrt(jnp.float32(fan_in))
        params["w" + name] = jax.random.uniform(
            kw, (fan_in, fan_out), jnp.float32, -bound, bound)
        params["b" + name] = jax.random.uniform(
            kb, (1, fan_out), jnp.float32, -bound, bound)
    # BatchNorm1d(input_dim) params / running stats (fresh-module values).
    params["bn_gamma"] = jnp.ones((1, INPUT_DIM), jnp.float32)
    params["bn_beta"] = jnp.zeros((1, INPUT_DIM), jnp.float32)
    params["bn_mean"] = jnp.zeros((1, INPUT_DIM), jnp.float32)
    params["bn_var"] = jnp.ones((1, INPUT_DIM), jnp.float32)
    return params


if __name__ == "__main__":
    key = jax.random.PRNGKey(0)
    k_params, k_x, k_year = jax.random.split(key, 3)

    B = 600  # with tile_b=256 -> 3 grid tiles incl. a partial (masked) last tile
    params = init_params(k_params)
    timbre_avg = jax.random.normal(k_x, (B, INPUT_DIM), jnp.float32)
    year = jax.random.randint(k_year, (B,), BEGIN_YEAR, BEGIN_YEAR + NUM_YEARS,
                              dtype=jnp.int32)

    packed = prepare_params(params)   # one-time pack, outside the per-call path
    fwd = jax.jit(functools.partial(sy_baseline_forward, tile_b=256))
    pred, loss = fwd(timbre_avg, year, packed)
    pred = jax.block_until_ready(pred)
    loss = jax.block_until_ready(loss)

    assert pred.shape == (B, NUM_YEARS)
    assert pred.dtype == jnp.float32
    assert loss.shape == ()
    assert bool(jnp.isfinite(loss))
    assert bool(jnp.all(jnp.isfinite(pred)))

    pred_ref, loss_ref = sy_reference(timbre_avg, year, params)
    assert bool(jnp.max(jnp.abs(pred - pred_ref)) < 5e-2), "pred mismatch"
    assert bool(jnp.abs(loss - loss_ref) < 1e-2), "loss mismatch"

    print("KERNEL_OK")
</pallas_src>

<mosaic_0001>
module attributes {stable_mosaic.version = 11 : i64} {
  func.func @_sy_kernel(%arg0: i32, %arg1: memref<1xi32, #tpu.memory_space<smem>>, %arg2: memref<256x12xf32, #tpu.memory_space<vmem>>, %arg3: memref<256x1xi32, #tpu.memory_space<vmem>>, %arg4: memref<12x128xbf16, #tpu.memory_space<vmem>>, %arg5: memref<128x128xbf16, #tpu.memory_space<vmem>>, %arg6: memref<128x12xbf16, #tpu.memory_space<vmem>>, %arg7: memref<12x128xbf16, #tpu.memory_space<vmem>>, %arg8: memref<128x128xbf16, #tpu.memory_space<vmem>>, %arg9: memref<128x256xbf16, #tpu.memory_space<vmem>>, %arg10: memref<256x256xbf16, #tpu.memory_space<vmem>>, %arg11: memref<256x128xbf16, #tpu.memory_space<vmem>>, %arg12: memref<128x128xbf16, #tpu.memory_space<vmem>>, %arg13: memref<1x1408xf32, #tpu.memory_space<vmem>>, %arg14: memref<256x128xbf16, #tpu.memory_space<vmem>>, %arg15: memref<1x8x128xf32, #tpu.memory_space<vmem>>) attributes {dimension_semantics = [#tpu.dimension_semantics<parallel>], iteration_bounds = array<i64: 3>, scalar_prefetch = 1 : i64, scratch_operands = 0 : i64, tpu.core_type = #tpu.core_type<tc>, window_params = [{transform_indices = @transform_0, window_bounds = array<i64: 256, 12>}, {transform_indices = @transform_1, window_bounds = array<i64: 256, 1>}, {pipeline_mode = #tpu.pipeline_mode<synchronous>, transform_indices = @transform_2, window_bounds = array<i64: 12, 128>}, {pipeline_mode = #tpu.pipeline_mode<synchronous>, transform_indices = @transform_3, window_bounds = array<i64: 128, 128>}, {pipeline_mode = #tpu.pipeline_mode<synchronous>, transform_indices = @transform_4, window_bounds = array<i64: 128, 12>}, {pipeline_mode = #tpu.pipeline_mode<synchronous>, transform_indices = @transform_5, window_bounds = array<i64: 12, 128>}, {pipeline_mode = #tpu.pipeline_mode<synchronous>, transform_indices = @transform_6, window_bounds = array<i64: 128, 128>}, {pipeline_mode = #tpu.pipeline_mode<synchronous>, transform_indices = @transform_7, window_bounds = array<i64: 128, 256>}, {pipeline_mode = #tpu.pipeline_mode<synchronous>, transform_indices = @transform_8, window_bounds = array<i64: 256, 256>}, {pipeline_mode = #tpu.pipeline_mode<synchronous>, transform_indices = @transform_9, window_bounds = array<i64: 256, 128>}, {pipeline_mode = #tpu.pipeline_mode<synchronous>, transform_indices = @transform_10, window_bounds = array<i64: 128, 128>}, {pipeline_mode = #tpu.pipeline_mode<synchronous>, transform_indices = @transform_11, window_bounds = array<i64: 1, 1408>}, {transform_indices = @transform_12, window_bounds = array<i64: 256, 128>}, {transform_indices = @transform_13, window_bounds = array<i64: 1, 8, 128>}]} {
    %c0 = arith.constant 0 : index
    %c0_0 = arith.constant 0 : index
    %0 = vector.load %arg2[%c0, %c0_0] : memref<256x12xf32, #tpu.memory_space<vmem>>, vector<256x12xf32>
    %1 = arith.truncf %0 : vector<256x12xf32> to vector<256x12xbf16>
    %c0_1 = arith.constant 0 : index
    %c0_2 = arith.constant 0 : index
    %2 = vector.load %arg4[%c0_1, %c0_2] : memref<12x128xbf16, #tpu.memory_space<vmem>>, vector<12x128xbf16>
    %cst = arith.constant dense<0.000000e+00> : vector<256x128xf32>
    %3 = tpu.matmul %1, %2, %cst {dimension_numbers = #tpu.dot_dimension_numbers<[1], [0], [0], [1], [0, 0, 1, 1], [], []>} : vector<256x12xbf16>, vector<12x128xbf16>, vector<256x128xf32> -> vector<256x128xf32>
    %c0_3 = arith.constant 0 : index
    %c0_4 = arith.constant 0 : index
    %4 = vector.load %arg13[%c0_3, %c0_4] : memref<1x1408xf32, #tpu.memory_space<vmem>>, vector<1x128xf32>
    %5 = vector.broadcast %4 : vector<1x128xf32> to vector<256x128xf32>
    %6 = arith.addf %3, %5 : vector<256x128xf32>
    %cst_5 = arith.constant 0.000000e+00 : f32
    %7 = vector.broadcast %cst_5 : f32 to vector<256x128xf32>
    %8 = arith.maximumf %6, %7 : vector<256x128xf32>
    %9 = arith.truncf %8 : vector<256x128xf32> to vector<256x128xbf16>
    %c0_6 = arith.constant 0 : index
    %c0_7 = arith.constant 0 : index
    %10 = vector.load %arg5[%c0_6, %c0_7] : memref<128x128xbf16, #tpu.memory_space<vmem>>, vector<128x128xbf16>
    %cst_8 = arith.constant dense<0.000000e+00> : vector<256x128xf32>
    %11 = tpu.matmul %9, %10, %cst_8 {dimension_numbers = #tpu.dot_dimension_numbers<[1], [0], [0], [1], [0, 0, 1, 1], [], []>} : vector<256x128xbf16>, vector<128x128xbf16>, vector<256x128xf32> -> vector<256x128xf32>
    %c0_9 = arith.constant 0 : index
    %c128 = arith.constant 128 : index
    %12 = vector.load %arg13[%c0_9, %c128] : memref<1x1408xf32, #tpu.memory_space<vmem>>, vector<1x128xf32>
    %13 = vector.broadcast %12 : vector<1x128xf32> to vector<256x128xf32>
    %14 = arith.addf %11, %13 : vector<256x128xf32>
    %cst_10 = arith.constant 0.000000e+00 : f32
    %15 = vector.broadcast %cst_10 : f32 to vector<256x128xf32>
    %16 = arith.maximumf %14, %15 : vector<256x128xf32>
    %17 = arith.truncf %16 : vector<256x128xf32> to vector<256x128xbf16>
    %c0_11 = arith.constant 0 : index
    %c0_12 = arith.constant 0 : index
    %18 = vector.load %arg6[%c0_11, %c0_12] : memref<128x12xbf16, #tpu.memory_space<vmem>>, vector<128x12xbf16>
    %cst_13 = arith.constant dense<0.000000e+00> : vector<256x12xf32>
    %19 = tpu.matmul %17, %18, %cst_13 {dimension_numbers = #tpu.dot_dimension_numbers<[1], [0], [0], [1], [0, 0, 1, 1], [], []>} : vector<256x128xbf16>, vector<128x12xbf16>, vector<256x12xf32> -> vector<256x12xf32>
    %c0_14 = arith.constant 0 : index
    %c256 = arith.constant 256 : index
    %20 = vector.load %arg13[%c0_14, %c256] : memref<1x1408xf32, #tpu.memory_space<vmem>>, vector<1x12xf32>
    %21 = vector.broadcast %20 : vector<1x12xf32> to vector<256x12xf32>
    %22 = arith.addf %19, %21 : vector<256x12xf32>
    %23 = arith.addf %22, %0 : vector<256x12xf32>
    %24 = arith.truncf %23 : vector<256x12xf32> to vector<256x12xbf16>
    %c0_15 = arith.constant 0 : index
    %c0_16 = arith.constant 0 : index
    %25 = vector.load %arg7[%c0_15, %c0_16] : memref<12x128xbf16, #tpu.memory_space<vmem>>, vector<12x128xbf16>
    %cst_17 = arith.constant dense<0.000000e+00> : vector<256x128xf32>
    %26 = tpu.matmul %24, %25, %cst_17 {dimension_numbers = #tpu.dot_dimension_numbers<[1], [0], [0], [1], [0, 0, 1, 1], [], []>} : vector<256x12xbf16>, vector<12x128xbf16>, vector<256x128xf32> -> vector<256x128xf32>
    %c0_18 = arith.constant 0 : index
    %c384 = arith.constant 384 : index
    %27 = vector.load %arg13[%c0_18, %c384] : memref<1x1408xf32, #tpu.memory_space<vmem>>, vector<1x128xf32>
    %28 = vector.broadcast %27 : vector<1x128xf32> to vector<256x128xf32>
    %29 = arith.addf %26, %28 : vector<256x128xf32>
    %cst_19 = arith.constant 0.000000e+00 : f32
    %30 = vector.broadcast %cst_19 : f32 to vector<256x128xf32>
    %31 = arith.maximumf %29, %30 : vector<256x128xf32>
    %32 = arith.truncf %31 : vector<256x128xf32> to vector<256x128xbf16>
    %c0_20 = arith.constant 0 : index
    %c0_21 = arith.constant 0 : index
    %33 = vector.load %arg8[%c0_20, %c0_21] : memref<128x128xbf16, #tpu.memory_space<vmem>>, vector<128x128xbf16>
    %cst_22 = arith.constant dense<0.000000e+00> : vector<256x128xf32>
    %34 = tpu.matmul %32, %33, %cst_22 {dimension_numbers = #tpu.dot_dimension_numbers<[1], [0], [0], [1], [0, 0, 1, 1], [], []>} : vector<256x128xbf16>, vector<128x128xbf16>, vector<256x128xf32> -> vector<256x128xf32>
    %c0_23 = arith.constant 0 : index
    %c512 = arith.constant 512 : index
    %35 = vector.load %arg13[%c0_23, %c512] : memref<1x1408xf32, #tpu.memory_space<vmem>>, vector<1x128xf32>
    %36 = vector.broadcast %35 : vector<1x128xf32> to vector<256x128xf32>
    %37 = arith.addf %34, %36 : vector<256x128xf32>
    %cst_24 = arith.constant 0.000000e+00 : f32
    %38 = vector.broadcast %cst_24 : f32 to vector<256x128xf32>
    %39 = arith.maximumf %37, %38 : vector<256x128xf32>
    %40 = arith.truncf %39 : vector<256x128xf32> to vector<256x128xbf16>
    %c0_25 = arith.constant 0 : index
    %c0_26 = arith.constant 0 : index
    %41 = vector.load %arg9[%c0_25, %c0_26] : memref<128x256xbf16, #tpu.memory_space<vmem>>, vector<128x256xbf16>
    %cst_27 = arith.constant dense<0.000000e+00> : vector<256x256xf32>
    %42 = tpu.matmul %40, %41, %cst_27 {dimension_numbers = #tpu.dot_dimension_numbers<[1], [0], [0], [1], [0, 0, 1, 1], [], []>} : vector<256x128xbf16>, vector<128x256xbf16>, vector<256x256xf32> -> vector<256x256xf32>
    %c0_28 = arith.constant 0 : index
    %c640 = arith.constant 640 : index
    %43 = vector.load %arg13[%c0_28, %c640] : memref<1x1408xf32, #tpu.memory_space<vmem>>, vector<1x256xf32>
    %44 = vector.broadcast %43 : vector<1x256xf32> to vector<256x256xf32>
    %45 = arith.addf %42, %44 : vector<256x256xf32>
    %46 = arith.truncf %45 : vector<256x256xf32> to vector<256x256xbf16>
    %c0_29 = arith.constant 0 : index
    %c0_30 = arith.constant 0 : index
    %47 = vector.load %arg10[%c0_29, %c0_30] : memref<256x256xbf16, #tpu.memory_space<vmem>>, vector<256x256xbf16>
    %cst_31 = arith.constant dense<0.000000e+00> : vector<256x256xf32>
    %48 = tpu.matmul %46, %47, %cst_31 {dimension_numbers = #tpu.dot_dimension_numbers<[1], [0], [0], [1], [0, 0, 1, 1], [], []>} : vector<256x256xbf16>, vector<256x256xbf16>, vector<256x256xf32> -> vector<256x256xf32>
    %c0_32 = arith.constant 0 : index
    %c896 = arith.constant 896 : index
    %49 = vector.load %arg13[%c0_32, %c896] : memref<1x1408xf32, #tpu.memory_space<vmem>>, vector<1x256xf32>
    %50 = vector.broadcast %49 : vector<1x256xf32> to vector<256x256xf32>
    %51 = arith.addf %48, %50 : vector<256x256xf32>
    %cst_33 = arith.constant 0.000000e+00 : f32
    %52 = vector.broadcast %cst_33 : f32 to vector<256x256xf32>
    %53 = arith.maximumf %51, %52 : vector<256x256xf32>
    %54 = arith.truncf %53 : vector<256x256xf32> to vector<256x256xbf16>
    %c0_34 = arith.constant 0 : index
    %c0_35 = arith.constant 0 : index
    %55 = vector.load %arg11[%c0_34, %c0_35] : memref<256x128xbf16, #tpu.memory_space<vmem>>, vector<256x128xbf16>
    %cst_36 = arith.constant dense<0.000000e+00> : vector<256x128xf32>
    %56 = tpu.matmul %54, %55, %cst_36 {dimension_numbers = #tpu.dot_dimension_numbers<[1], [0], [0], [1], [0, 0, 1, 1], [], []>} : vector<256x256xbf16>, vector<256x128xbf16>, vector<256x128xf32> -> vector<256x128xf32>
    %c0_37 = arith.constant 0 : index
    %c1152 = arith.constant 1152 : index
    %57 = vector.load %arg13[%c0_37, %c1152] : memref<1x1408xf32, #tpu.memory_space<vmem>>, vector<1x128xf32>
    %58 = vector.broadcast %57 : vector<1x128xf32> to vector<256x128xf32>
    %59 = arith.addf %56, %58 : vector<256x128xf32>
    %cst_38 = arith.constant 0.000000e+00 : f32
    %60 = vector.broadcast %cst_38 : f32 to vector<256x128xf32>
    %61 = arith.maximumf %59, %60 : vector<256x128xf32>
    %62 = arith.truncf %61 : vector<256x128xf32> to vector<256x128xbf16>
    %c0_39 = arith.constant 0 : index
    %c0_40 = arith.constant 0 : index
    %63 = vector.load %arg12[%c0_39, %c0_40] : memref<128x128xbf16, #tpu.memory_space<vmem>>, vector<128x128xbf16>
    %cst_41 = arith.constant dense<0.000000e+00> : vector<256x128xf32>
    %64 = tpu.matmul %62, %63, %cst_41 {dimension_numbers = #tpu.dot_dimension_numbers<[1], [0], [0], [1], [0, 0, 1, 1], [], []>} : vector<256x128xbf16>, vector<128x128xbf16>, vector<256x128xf32> -> vector<256x128xf32>
    %c0_42 = arith.constant 0 : index
    %c1280 = arith.constant 1280 : index
    %65 = vector.load %arg13[%c0_42, %c1280] : memref<1x1408xf32, #tpu.memory_space<vmem>>, vector<1x128xf32>
    %66 = vector.broadcast %65 : vector<1x128xf32> to vector<256x128xf32>
    %67 = arith.addf %64, %66 : vector<256x128xf32>
    %68 = arith.truncf %67 : vector<256x128xf32> to vector<256x128xbf16>
    %c0_43 = arith.constant 0 : index
    %c0_44 = arith.constant 0 : index
    %69 = vector.load %arg14[%c0_43, %c0_44] : memref<256x128xbf16, #tpu.memory_space<vmem>>, vector<256x128xbf16>
    tpu.vector_store %arg14[%c0_43, %c0_44], %68 {strides = array<i32>} : memref<256x128xbf16, #tpu.memory_space<vmem>>, vector<256x128xbf16>,
    %cst_45 = arith.constant dense<0xFF800000> : vector<256xf32>
    %70 = vector.multi_reduction <maximumf>, %67, %cst_45 [1] : vector<256x128xf32> to vector<256xf32>
    %71 = vector.shape_cast %70 : vector<256xf32> to vector<256x1xf32>
    %72 = vector.broadcast %71 : vector<256x1xf32> to vector<256x128xf32>
    %73 = arith.subf %67, %72 : vector<256x128xf32>
    %74 = math.exp %73 : vector<256x128xf32>
    %cst_46 = arith.constant dense<0.000000e+00> : vector<256xf32>
    %75 = vector.multi_reduction <add>, %74, %cst_46 [1] : vector<256x128xf32> to vector<256xf32>
    %76 = vector.shape_cast %75 : vector<256xf32> to vector<256x1xf32>
    %77 = math.log %76 : vector<256x1xf32>
    %78 = arith.addf %77, %71 : vector<256x1xf32>
    %c0_47 = arith.constant 0 : index
    %c0_48 = arith.constant 0 : index
    %79 = vector.load %arg3[%c0_47, %c0_48] : memref<256x1xi32, #tpu.memory_space<vmem>>, vector<256x1xi32>
    %80 = tpu.iota {dimensions = array<i32: 1>} : vector<256x128xi32>
    %81 = vector.broadcast %79 : vector<256x1xi32> to vector<256x128xi32>
    %82 = arith.cmpi eq, %80, %81 : vector<256x128xi32>
    %cst_49 = arith.constant 0.000000e+00 : f32
    %83 = vector.broadcast %cst_49 : f32 to vector<256x128xf32>
    %84 = arith.select %82, %67, %83 : vector<256x128xi1>, vector<256x128xf32>
    %cst_50 = arith.constant dense<0.000000e+00> : vector<256xf32>
    %85 = vector.multi_reduction <add>, %84, %cst_50 [1] : vector<256x128xf32> to vector<256xf32>
    %86 = vector.shape_cast %85 : vector<256xf32> to vector<256x1xf32>
    %c256_i32 = arith.constant 256 : i32
    %87 = arith.muli %arg0, %c256_i32 : i32
    %88 = tpu.iota {dimensions = array<i32: 0>} : vector<256x1xi32>
    %89 = vector.broadcast %87 : i32 to vector<256x1xi32>
    %90 = arith.addi %89, %88 : vector<256x1xi32>
    %c0_51 = arith.constant 0 : index
    %91 = memref.load %arg1[%c0_51] : memref<1xi32, #tpu.memory_space<smem>>
    %92 = vector.broadcast %91 : i32 to vector<256x1xi32>
    %93 = arith.cmpi slt, %90, %92 : vector<256x1xi32>
    %94 = arith.subf %78, %86 : vector<256x1xf32>
    %cst_52 = arith.constant 0.000000e+00 : f32
    %95 = vector.broadcast %cst_52 : f32 to vector<256x1xf32>
    %96 = arith.select %93, %94, %95 : vector<256x1xi1>, vector<256x1xf32>
    %97 = vector.shape_cast %96 : vector<256x1xf32> to vector<1x256x1xf32>
    %cst_53 = arith.constant dense<0.000000e+00> : vector<1xf32>
    %98 = vector.multi_reduction <add>, %97, %cst_53 [1, 2] : vector<1x256x1xf32> to vector<1xf32>
    %99 = vector.shape_cast %98 : vector<1xf32> to vector<1x1x1xf32>
    %100 = vector.extract %99[0, 0, 0] : f32 from vector<1x1x1xf32>
    %101 = vector.broadcast %100 : f32 to vector<1x8x128xf32>
    %c0_54 = arith.constant 0 : index
    %c0_55 = arith.constant 0 : index
    %c0_56 = arith.constant 0 : index
    %102 = vector.load %arg15[%c0_54, %c0_55, %c0_56] : memref<1x8x128xf32, #tpu.memory_space<vmem>>, vector<1x8x128xf32>
    tpu.vector_store %arg15[%c0_54, %c0_55, %c0_56], %101 {strides = array<i32>} : memref<1x8x128xf32, #tpu.memory_space<vmem>>, vector<1x8x128xf32>,
    return
  }
  func.func @transform_0(%arg0: i32, %arg1: memref<1xi32, #tpu.memory_space<smem>>) -> (i32, i32) {
    %c0_i32 = arith.constant 0 : i32
    %c0_i32_0 = arith.constant 0 : i32
    return %arg0, %c0_i32 : i32, i32
  }
  func.func @transform_1(%arg0: i32, %arg1: memref<1xi32, #tpu.memory_space<smem>>) -> (i32, i32) {
    %c0_i32 = arith.constant 0 : i32
    %c0_i32_0 = arith.constant 0 : i32
    return %arg0, %c0_i32 : i32, i32
  }
  func.func @transform_2(%arg0: i32, %arg1: memref<1xi32, #tpu.memory_space<smem>>) -> (i32, i32) {
    %c0_i32 = arith.constant 0 : i32
    %c0_i32_0 = arith.constant 0 : i32
    %c0_i32_1 = arith.constant 0 : i32
    return %c0_i32, %c0_i32_0 : i32, i32
  }
  func.func @transform_3(%arg0: i32, %arg1: memref<1xi32, #tpu.memory_space<smem>>) -> (i32, i32) {
    %c0_i32 = arith.constant 0 : i32
    %c0_i32_0 = arith.constant 0 : i32
    %c0_i32_1 = arith.constant 0 : i32
    return %c0_i32, %c0_i32_0 : i32, i32
  }
  func.func @transform_4(%arg0: i32, %arg1: memref<1xi32, #tpu.memory_space<smem>>) -> (i32, i32) {
    %c0_i32 = arith.constant 0 : i32
    %c0_i32_0 = arith.constant 0 : i32
    %c0_i32_1 = arith.constant 0 : i32
    return %c0_i32, %c0_i32_0 : i32, i32
  }
  func.func @transform_5(%arg0: i32, %arg1: memref<1xi32, #tpu.memory_space<smem>>) -> (i32, i32) {
    %c0_i32 = arith.constant 0 : i32
    %c0_i32_0 = arith.constant 0 : i32
    %c0_i32_1 = arith.constant 0 : i32
    return %c0_i32, %c0_i32_0 : i32, i32
  }
  func.func @transform_6(%arg0: i32, %arg1: memref<1xi32, #tpu.memory_space<smem>>) -> (i32, i32) {
    %c0_i32 = arith.constant 0 : i32
    %c0_i32_0 = arith.constant 0 : i32
    %c0_i32_1 = arith.constant 0 : i32
    return %c0_i32, %c0_i32_0 : i32, i32
  }
  func.func @transform_7(%arg0: i32, %arg1: memref<1xi32, #tpu.memory_space<smem>>) -> (i32, i32) {
    %c0_i32 = arith.constant 0 : i32
    %c0_i32_0 = arith.constant 0 : i32
    %c0_i32_1 = arith.constant 0 : i32
    return %c0_i32, %c0_i32_0 : i32, i32
  }
  func.func @transform_8(%arg0: i32, %arg1: memref<1xi32, #tpu.memory_space<smem>>) -> (i32, i32) {
    %c0_i32 = arith.constant 0 : i32
    %c0_i32_0 = arith.constant 0 : i32
    %c0_i32_1 = arith.constant 0 : i32
    return %c0_i32, %c0_i32_0 : i32, i32
  }
  func.func @transform_9(%arg0: i32, %arg1: memref<1xi32, #tpu.memory_space<smem>>) -> (i32, i32) {
    %c0_i32 = arith.constant 0 : i32
    %c0_i32_0 = arith.constant 0 : i32
    %c0_i32_1 = arith.constant 0 : i32
    return %c0_i32, %c0_i32_0 : i32, i32
  }
  func.func @transform_10(%arg0: i32, %arg1: memref<1xi32, #tpu.memory_space<smem>>) -> (i32, i32) {
    %c0_i32 = arith.constant 0 : i32
    %c0_i32_0 = arith.constant 0 : i32
    %c0_i32_1 = arith.constant 0 : i32
    return %c0_i32, %c0_i32_0 : i32, i32
  }
  func.func @transform_11(%arg0: i32, %arg1: memref<1xi32, #tpu.memory_space<smem>>) -> (i32, i32) {
    %c0_i32 = arith.constant 0 : i32
    %c0_i32_0 = arith.constant 0 : i32
    %c0_i32_1 = arith.constant 0 : i32
    return %c0_i32, %c0_i32_0 : i32, i32
  }
  func.func @transform_12(%arg0: i32, %arg1: memref<1xi32, #tpu.memory_space<smem>>) -> (i32, i32) {
    %c0_i32 = arith.constant 0 : i32
    %c0_i32_0 = arith.constant 0 : i32
    return %arg0, %c0_i32 : i32, i32
  }
  func.func @transform_13(%arg0: i32, %arg1: memref<1xi32, #tpu.memory_space<smem>>) -> (i32, i32, i32) {
    %c0_i32 = arith.constant 0 : i32
    %c0_i32_0 = arith.constant 0 : i32
    %c0_i32_1 = arith.constant 0 : i32
    return %arg0, %c0_i32, %c0_i32_0 : i32, i32, i32
  }
}

</mosaic_0001>

<bundles_post_ra>
// kernel: sy_baseline_forward.1
= control target key start
LH: loop header
LB: loop body
LE: loop exit
PB: predicated region body
PF: predicated region fallthrough
CT: control target
= control target key end

     0   :  { %s5581_s15 = smov 0   ;;  %s7204_s0 = inlined_call_operand.<no memory space> [shape: s32[1], index: 0, kind: input, shape index: {}]   ;;  %s7205_s1 = inlined_call_operand.vmem [shape: f32[768,12], index: 1, kind: input, shape index: {}]   ;;  %s7206_s2 = inlined_call_operand.vmem [shape: s32[768,1], index: 2, kind: input, shape index: {}]   ;;  %s7207_s3 = inlined_call_operand.vmem [shape: bf16[12,128], index: 3, kind: input, shape index: {}]   ;;  %s7208_s4 = inlined_call_operand.vmem [shape: bf16[128,128], index: 4, kind: input, shape index: {}]   ;;  %s7209_s5 = inlined_call_operand.vmem [shape: bf16[128,12], index: 5, kind: input, shape index: {}]   ;;  %s7210_s6 = inlined_call_operand.vmem [shape: bf16[12,128], index: 6, kind: input, shape index: {}]   ;;  %s7211_s7 = inlined_call_operand.vmem [shape: bf16[128,128], index: 7, kind: input, shape index: {}]   ;;  %s7212_s8 = inlined_call_operand.vmem [shape: bf16[128,256], index: 8, kind: input, shape index: {}]   ;;  %s7213_s9 = inlined_call_operand.vmem [shape: bf16[256,256], index: 9, kind: input, shape index: {}]   ;;  %s7214_s10 = inlined_call_operand.vmem [shape: bf16[256,128], index: 10, kind: input, shape index: {}]   ;;  %s7215_s11 = inlined_call_operand.vmem [shape: bf16[128,128], index: 11, kind: input, shape index: {}]   ;;  %s7216_s12 = inlined_call_operand.vmem [shape: f32[1,1408], index: 12, kind: input, shape index: {}]   ;;  %s7217_s13 = inlined_call_operand.vmem [shape: bf16[768,128], index: 13, kind: output, shape index: {0}]   ;;  %s7218_s14 = inlined_call_operand.vmem [shape: f32[3,8,128], index: 14, kind: output, shape index: {1}]  }
   0x1   :  { %20 = sst [smem:[#allocation3]] %s7204_s0 }
   0x2 LB: > { %s5587_s16 = sadd.s32 4294967295, %s5500_s15   ;;  %p4401_p0 = scmp.ge.s32.totalorder %s5500_s15, 1  ;;  %s5500_s15 = sphi %s5581_s15, %s26_s15  }
   0x3   : > { %p404_p1 = scmp.lt.s32.totalorder %s5500_s15, 4 }
   0x5   : > { %p405_p2 = pnand %p4401_p0, %p404_p1 }
   0x7   : > { %408 = sbr.rel (%p405_p2) target bundleno = 2671 (0xa6f), region = 68 }
   0xe   : > { %v5225_v0 = vld [vmem:[%s7207_s3] sm:$0x3f]   ;;  %vm591_vm0 = vcmask 1045504   ;;  %s4402_s0 = sshll.u32 %s5587_s16, 5  ;;  %v5227_v3 = vld [vmem:[%s7208_s4 + $0x8] sm:$0xff]   ;;  %v5228_v4 = vld [vmem:[%s7208_s4 + $0x10] sm:$0xff]  }
   0xf   : > { %v5226_v1 = vld [vmem:[%s7208_s4] sm:$0xff]   ;;  %5210 = vmatprep.subr.msk.bf16.mxu0 %vm591_vm0, %v5225_v0  ;;  %v593_v2 = vsel %vm591_vm0, %v5225_v0, 0  ;;  %p458_p3 = scmp.lt.s32.totalorder %s4402_s0, 95  ;;  %v5229_v5 = vld [vmem:[%s7208_s4 + $0x18] sm:$0xff]   ;;  %vm542_vm1 = vcmask 97280   ;;  %v5231_v22 = vld [vmem:[%s7208_s4 + $0x28] sm:$0xff]  }
  0x10   : > { %4951 = vmatpush3.bf16.msra.mxu0 %v593_v2  ;;  %4984 = vmatprep.subr.bf16.mxu1 %v5226_v1  ;;  %v5230_v17 = vld [vmem:[%s7208_s4 + $0x20] sm:$0xff]   ;;  %v5232_v56 = vld [vmem:[%s7208_s4 + $0x30] sm:$0xff]   ;;  %v5233_v57 = vld [vmem:[%s7208_s4 + $0x38] sm:$0xff]   ;;  %s4578_s22 = sshll.u32 %s5587_s16, 8  ;;  %p475_p4 = scmp.lt.s32.totalorder %s5587_s16, 2 }
  0x11   : > { %s7249_s0 = smov (!%p458_p3, %s4402_s0), 95  ;;  %4985 = vmatpush3.bf16.msra.mxu1 %v5226_v1  ;;  %v5234_v58 = vld [vmem:[%s7209_s5] sm:$0xff]   ;;  %v5235_v59 = vld [vmem:[%s7209_s5 + $0x8] sm:$0xff]   ;;  %v5236_v60 = vld [vmem:[%s7209_s5 + $0x10] sm:$0xff]  }
  0x12   : > { %4986 = vmatprep.subr.bf16.mxu1 %v5227_v3  ;;  %s4403_s25 = sshll.u32 %s7249_s0, 3  ;;  %5032 = vmatprep.subr.bf16.mxu0 %v5234_v58  ;;  %v5237_v61 = vld [vmem:[%s7209_s5 + $0x18] sm:$0xff]   ;;  %v5238_v62 = vld [vmem:[%s7209_s5 + $0x20] sm:$0xff]   ;;  %v5239_v63 = vld [vmem:[%s7209_s5 + $0x28] sm:$0xff]   ;;  %s4407_s18 = sshll.u32 %s7249_s0, 2 }
  0x13   : > { %s5614_s28 = scalar_lea.vmem %s7205_s1, %s4403_s25  ;;  %v5240_v0 = vld [vmem:[%s7209_s5 + $0x30] sm:$0xff]   ;;  %v5742_v1 = vld [vmem:[%s7216_s12] ss:$0 sm:$0xff]  ;;  %s6507_s21 = scalar_lea.vmem %s7217_s13, %s4407_s18 }
  0x14   : > { %v480_v6 = vld [vmem:[%s5614_s28] sm:$0xff]  ;;  %v481_v7 = vld [vmem:[%s5614_s28 + $0x8] sm:$0xff]  ;;  %v482_v8 = vld [vmem:[%s5614_s28 + $0x10] sm:$0xff]  ;;  %s4125_s0 = sld [smem:[#allocation3]]  ;;  %s7251_s16 = smov (!%p475_p4, %s5587_s16), 2 }
  0x15   : > { %4987 = vmatpush3.bf16.msra.mxu1 %v5227_v3  ;;  %v512_v9 = vpack.c.bf16 %v481_v7, %v480_v6  ;;  %v483_v10 = vld [vmem:[%s5614_s28 + $0x18] sm:$0xff]  ;;  %v484_v11 = vld [vmem:[%s5614_s28 + $0x20] sm:$0xff]  ;;  %v485_v12 = vld [vmem:[%s5614_s28 + $0x28] sm:$0xff]  ;;  %s4408_s23 = sshll.u32 %s7251_s16, 3 }
  0x16   : > { %4988 = vmatprep.subr.bf16.mxu1 %v5228_v4  ;;  %v513_v13 = vpack.c.bf16 %v483_v10, %v482_v8  ;;  %v514_v14 = vpack.c.bf16 %v485_v12, %v484_v11  ;;  %v486_v15 = vld [vmem:[%s5614_s28 + $0x30] sm:$0xff]  ;;  %v487_v16 = vld [vmem:[%s5614_s28 + $0x38] sm:$0xff]  ;;  %v488_v18 = vld [vmem:[%s5614_s28 + $0x40] sm:$0xff]  ;;  %s478_s27 = scalar_lea.vmem %s7218_s14, %s4408_s23 }
  0x17   : > { %4952 = vmatprep.mubr.msk.bf16.mxu0 %vm542_vm1, %v512_v9  ;;  %v489_v19 = vld [vmem:[%s5614_s28 + $0x48] sm:$0xff]  ;;  %v515_v20 = vpack.c.bf16 %v487_v16, %v486_v15  ;;  %v490_v23 = vld [vmem:[%s5614_s28 + $0x50] sm:$0xff]  ;;  %v491_v24 = vld [vmem:[%s5614_s28 + $0x58] sm:$0xff] }
  0x18   : > { %4953 = vmatmul.mubr.msk.bf16.vlgmr.msra.gmra.mrb[0].mxu0 %vm542_vm1, %v513_v13  ;;  %v516_v21 = vpack.c.bf16 %v489_v19, %v488_v18  ;;  %v492_v25 = vld [vmem:[%s5614_s28 + $0x60] sm:$0xff]  ;;  %v493_v26 = vld [vmem:[%s5614_s28 + $0x68] sm:$0xff]  ;;  %v517_v27 = vpack.c.bf16 %v491_v24, %v490_v23  ;;  %v494_v29 = vld [vmem:[%s5614_s28 + $0x70] sm:$0xff] }
  0x19   : > { %4989 = vmatpush3.bf16.msra.mxu1 %v5228_v4  ;;  %4956 = vmatprep.mubr.msk.bf16.mxu0 %vm542_vm1, %v514_v14  ;;  %v518_v28 = vpack.c.bf16 %v493_v26, %v492_v25  ;;  %v495_v30 = vld [vmem:[%s5614_s28 + $0x78] sm:$0xff]  ;;  %v496_v31 = vld [vmem:[%s5614_s28 + $0x80] sm:$0xff]  ;;  %v497_v32 = vld [vmem:[%s5614_s28 + $0x88] sm:$0xff] }
  0x1a   : > { %4990 = vmatprep.subr.bf16.mxu1 %v5229_v5  ;;  %v519_v33 = vpack.c.bf16 %v495_v30, %v494_v29  ;;  %v520_v34 = vpack.c.bf16 %v497_v32, %v496_v31  ;;  %v5651_v35 = vld [vmem:[%s5614_s28 + $0x90] sm:$0xff]  ;;  %v5654_v36 = vld [vmem:[%s5614_s28 + $0x98] sm:$0xff]  ;;  %v5658_v37 = vld [vmem:[%s5614_s28 + $0xa0] sm:$0xff]  ;;  %5033 = vmatpush3.bf16.msra.mxu0 %v5234_v58 }
  0x1b   : > { %v501_v38 = vld [vmem:[%s5614_s28 + $0xa8] sm:$0xff]  ;;  %v521_v39 = vpack.c.bf16 %v5654_v36, %v5651_v35  ;;  %v5666_v41 = vld [vmem:[%s5614_s28 + $0xb0] sm:$0xff]  ;;  %v5669_v42 = vld [vmem:[%s5614_s28 + $0xb8] sm:$0xff]  ;;  %5034 = vmatprep.subr.bf16.mxu0 %v5235_v59 }
  0x1c   : > { %v522_v40 = vpack.c.bf16 %v501_v38, %v5658_v37  ;;  %v5673_v43 = vld [vmem:[%s5614_s28 + $0xc0] sm:$0xff]  ;;  %v5676_v44 = vld [vmem:[%s5614_s28 + $0xc8] sm:$0xff]  ;;  %v523_v45 = vpack.c.bf16 %v5669_v42, %v5666_v41  ;;  %v5684_v47 = vld [vmem:[%s5614_s28 + $0xd0] sm:$0xff] }
  0x1d   : > { %4991 = vmatpush3.bf16.msra.mxu1 %v5229_v5  ;;  %v524_v46 = vpack.c.bf16 %v5676_v44, %v5673_v43  ;;  %v5687_v48 = vld [vmem:[%s5614_s28 + $0xd8] sm:$0xff]  ;;  %v5691_v49 = vld [vmem:[%s5614_s28 + $0xe0] sm:$0xff]  ;;  %v5694_v50 = vld [vmem:[%s5614_s28 + $0xe8] sm:$0xff] }
  0x1e   : > { %4992 = vmatprep.subr.bf16.mxu1 %v5230_v17  ;;  %v525_v51 = vpack.c.bf16 %v5687_v48, %v5684_v47  ;;  %v526_v52 = vpack.c.bf16 %v5694_v50, %v5691_v49  ;;  %v5702_v53 = vld [vmem:[%s5614_s28 + $0xf0] sm:$0xff]  ;;  %v5705_v54 = vld [vmem:[%s5614_s28 + $0xf8] sm:$0xff]  ;;  %5035 = vmatpush3.bf16.msra.mxu0 %v5235_v59 }
  0x1f   : > { %v527_v55 = vpack.c.bf16 %v5705_v54, %v5702_v53  ;;  %5036 = vmatprep.subr.bf16.mxu0 %v5236_v60 }
  0x20   : > { %4957 = vmatmul.mubr.msk.bf16.gmra.mrb[4].mxu0 %vm542_vm1, %v515_v20 }
  0x21   : > { %4993 = vmatpush3.bf16.msra.mxu1 %v5230_v17  ;;  %4960 = vmatprep.mubr.msk.bf16.mxu0 %vm542_vm1, %v516_v21 }
  0x22   : > { %4994 = vmatprep.subr.bf16.mxu1 %v5231_v22  ;;  %5037 = vmatpush3.bf16.msra.mxu0 %v5236_v60 }
  0x23   : > { %5038 = vmatprep.subr.bf16.mxu0 %v5237_v61 }
  0x25   : > { %4995 = vmatpush3.bf16.msra.mxu1 %v5231_v22 }
  0x26   : > { %4996 = vmatprep.subr.bf16.mxu1 %v5232_v56  ;;  %5039 = vmatpush3.bf16.msra.mxu0 %v5237_v61 }
  0x27   : > { %5040 = vmatprep.subr.bf16.mxu0 %v5238_v62 }
  0x28   : > { %4961 = vmatmul.mubr.msk.bf16.gmra.mrb[8].mxu0 %vm542_vm1, %v517_v27 }
  0x29   : > { %4964 = vmatprep.mubr.msk.bf16.mxu0 %vm542_vm1, %v518_v28  ;;  %4997 = vmatpush3.bf16.msra.mxu1 %v5232_v56 }
  0x2a   : > { %4998 = vmatprep.subr.bf16.mxu1 %v5233_v57  ;;  %5041 = vmatpush3.bf16.msra.mxu0 %v5238_v62 }
  0x2b   : > { %5042 = vmatprep.subr.bf16.mxu0 %v5239_v63 }
  0x2d   : > { %4999 = vmatpush3.bf16.msra.mxu1 %v5233_v57 }
  0x2e   : > { %5043 = vmatpush3.bf16.msra.mxu0 %v5239_v63 }
  0x2f   : > { %5044 = vmatprep.subr.bf16.mxu0 %v5240_v0 }
  0x30   : > { %4965 = vmatmul.mubr.msk.bf16.gmra.mrb[12].mxu0 %vm542_vm1, %v519_v33 }
  0x31   : > { %4968 = vmatprep.mubr.msk.bf16.mxu0 %vm542_vm1, %v520_v34 }
  0x32   : > { %5045 = vmatpush3.bf16.msra.mxu0 %v5240_v0 }
  0x38   : > { %4969 = vmatmul.mubr.msk.bf16.gmra.mrb[16].mxu0 %vm542_vm1, %v521_v39 }
  0x39   : > { %4972 = vmatprep.mubr.msk.bf16.mxu0 %vm542_vm1, %v522_v40 }
  0x40   : > { %4973 = vmatmul.mubr.msk.bf16.gmra.mrb[20].mxu0 %vm542_vm1, %v523_v45 }
  0x41   : > { %4976 = vmatprep.mubr.msk.bf16.mxu0 %vm542_vm1, %v524_v46 }
  0x48   : > { %4977 = vmatmul.mubr.msk.bf16.gmra.mrb[24].mxu0 %vm542_vm1, %v525_v51 }
  0x49   : > { %4980 = vmatprep.mubr.msk.bf16.mxu0 %vm542_vm1, %v526_v52 }
  0x50   : > { %4981 = vmatmul.mubr.msk.bf16.gmra.mrb[28].mxu0 %vm542_vm1, %v527_v55 }
  0xeb   : > { %v4954_v2 = vpop.f32.mrb[0].mxu0 }
  0xec   : > { %v638_v3 = vadd.f32 %v4954_v2, %v5742_v1  ;;  %v629_v4 = vpop.f32.mrb[1].mxu0 }
  0xed   : > { %v630_v5 = vadd.f32 %v5742_v1, %v629_v4  ;;  %v4955_v6 = vpop.f32.mrb[2].mxu0 }
  0xee   : > { %v641_v7 = vadd.f32 %v4955_v6, %v5742_v1  ;;  %v632_v8 = vpop.f32.mrb[3].mxu0  ;;  %v758_v10 = vmax.f32 %v638_v3, 0.0 }
  0xef   : > { %v633_v9 = vadd.f32 %v5742_v1, %v632_v8  ;;  %v756_v12 = vmax.f32 %v630_v5, 0.0 }
  0xf0   : > { %v759_v11 = vmax.f32 %v641_v7, 0.0 }
  0xf1   : > { %v757_v13 = vmax.f32 %v633_v9, 0.0 }
  0xf2   : > { %v789_v14 = vpack.c.bf16 %v759_v11, %v758_v10 }
  0xf3   : > { %v4958_v15 = vpop.f32.mrb[4].mxu0  ;;  %v788_v16 = vpack.c.bf16 %v757_v13, %v756_v12 }
  0xf4   : > { %v654_v17 = vadd.f32 %v4958_v15, %v5742_v1  ;;  %v645_v18 = vpop.f32.mrb[5].mxu0 }
  0xf5   : > { %v646_v19 = vadd.f32 %v5742_v1, %v645_v18  ;;  %v4959_v20 = vpop.f32.mrb[6].mxu0  ;;  %5000 = vmatprep.mubr.bf16.mxu1 %v788_v16 }
  0xf6   : > { %v762_v21 = vmax.f32 %v654_v17, 0.0  ;;  %v657_v22 = vadd.f32 %v4959_v20, %v5742_v1  ;;  %v648_v23 = vpop.f32.mrb[7].mxu0  ;;  %5001 = vmatmul.mubr.bf16.vlgmr.msra.gmra.mrb[0].mxu1 %v789_v14 }
  0xf7   : > { %v760_v24 = vmax.f32 %v646_v19, 0.0  ;;  %v649_v25 = vadd.f32 %v5742_v1, %v648_v23 }
  0xf8   : > { %v763_v26 = vmax.f32 %v657_v22, 0.0 }
  0xf9   : > { %v761_v27 = vmax.f32 %v649_v25, 0.0 }
  0xfa   : > { %v791_v28 = vpack.c.bf16 %v763_v26, %v762_v21 }
  0xfb   : > { %v790_v29 = vpack.c.bf16 %v761_v27, %v760_v24  ;;  %v4962_v30 = vpop.f32.mrb[8].mxu0 }
  0xfc   : > { %v670_v31 = vadd.f32 %v4962_v30, %v5742_v1  ;;  %v661_v32 = vpop.f32.mrb[9].mxu0 }
  0xfd   : > { %v662_v33 = vadd.f32 %v5742_v1, %v661_v32  ;;  %v4963_v34 = vpop.f32.mrb[10].mxu0  ;;  %5004 = vmatprep.mubr.bf16.mxu1 %v790_v29 }
  0xfe   : > { %v766_v38 = vmax.f32 %v670_v31, 0.0  ;;  %v673_v39 = vadd.f32 %v4963_v34, %v5742_v1  ;;  %v664_v40 = vpop.f32.mrb[11].mxu0  ;;  %5005 = vmatmul.mubr.bf16.gmra.mrb[4].mxu1 %v791_v28 }
  0xff   : > { %v764_v45 = vmax.f32 %v662_v33, 0.0  ;;  %v665_v46 = vadd.f32 %v5742_v1, %v664_v40 }
 0x100   : > { %v767_v51 = vmax.f32 %v673_v39, 0.0 }
 0x101   : > { %v765_v52 = vmax.f32 %v665_v46, 0.0 }
 0x102   : > { %v793_v55 = vpack.c.bf16 %v767_v51, %v766_v38 }
 0x103   : > { %v792_v56 = vpack.c.bf16 %v765_v52, %v764_v45  ;;  %v4966_v57 = vpop.f32.mrb[12].mxu0 }
 0x104   : > { %v686_v58 = vadd.f32 %v4966_v57, %v5742_v1  ;;  %v677_v59 = vpop.f32.mrb[13].mxu0 }
 0x105   : > { %5008 = vmatprep.mubr.bf16.mxu1 %v792_v56  ;;  %v678_v60 = vadd.f32 %v5742_v1, %v677_v59  ;;  %v4967_v61 = vpop.f32.mrb[14].mxu0 }
 0x106   : > { %5009 = vmatmul.mubr.bf16.gmra.mrb[8].mxu1 %v793_v55  ;;  %v770_v62 = vmax.f32 %v686_v58, 0.0  ;;  %v689_v63 = vadd.f32 %v4967_v61, %v5742_v1  ;;  %v680_v0 = vpop.f32.mrb[15].mxu0 }
 0x107   : > { %v768_v2 = vmax.f32 %v678_v60, 0.0  ;;  %v681_v3 = vadd.f32 %v5742_v1, %v680_v0 }
 0x108   : > { %v771_v4 = vmax.f32 %v689_v63, 0.0 }
 0x109   : > { %v769_v5 = vmax.f32 %v681_v3, 0.0 }
 0x10a   : > { %v795_v6 = vpack.c.bf16 %v771_v4, %v770_v62 }
 0x10b   : > { %v794_v7 = vpack.c.bf16 %v769_v5, %v768_v2  ;;  %v4970_v8 = vpop.f32.mrb[16].mxu0 }
 0x10c   : > { %v702_v9 = vadd.f32 %v4970_v8, %v5742_v1  ;;  %v693_v10 = vpop.f32.mrb[17].mxu0 }
 0x10d   : > { %5012 = vmatprep.mubr.bf16.mxu1 %v794_v7  ;;  %v694_v11 = vadd.f32 %v5742_v1, %v693_v10  ;;  %v4971_v12 = vpop.f32.mrb[18].mxu0 }
 0x10e   : > { %5013 = vmatmul.mubr.bf16.gmra.mrb[12].mxu1 %v795_v6  ;;  %v774_v13 = vmax.f32 %v702_v9, 0.0  ;;  %v705_v14 = vadd.f32 %v4971_v12, %v5742_v1  ;;  %v696_v15 = vpop.f32.mrb[19].mxu0 }
 0x10f   : > { %v772_v16 = vmax.f32 %v694_v11, 0.0  ;;  %v697_v17 = vadd.f32 %v5742_v1, %v696_v15  ;;  %v5242_v15 = vld [vmem:[%s7210_s6] sm:$0x3f]  }
 0x110   : > { %v775_v18 = vmax.f32 %v705_v14, 0.0  ;;  %v5241_v14 = vld [vmem:[%s7209_s5 + $0x38] sm:$0xff]   ;;  %5211 = vmatprep.subr.msk.bf16.mxu1 %vm591_vm0, %v5242_v15 }
 0x111   : > { %v773_v19 = vmax.f32 %v697_v17, 0.0  ;;  %5046 = vmatprep.subr.bf16.mxu0 %v5241_v14 }
 0x112   : > { %v797_v20 = vpack.c.bf16 %v775_v18, %v774_v13  ;;  %5047 = vmatpush3.bf16.msra.mxu0 %v5241_v14 }
 0x113   : > { %v796_v21 = vpack.c.bf16 %v773_v19, %v772_v16  ;;  %v4974_v22 = vpop.f32.mrb[20].mxu0  ;;  %v5787_v16 = vld [vmem:[%s7216_s12 + $0x1] ss:$0 sm:$0xff] }
 0x114   : > { %v718_v23 = vadd.f32 %v4974_v22, %v5742_v1  ;;  %v709_v24 = vpop.f32.mrb[21].mxu0 }
 0x115   : > { %5016 = vmatprep.mubr.bf16.mxu1 %v796_v21  ;;  %v710_v25 = vadd.f32 %v5742_v1, %v709_v24  ;;  %v4975_v26 = vpop.f32.mrb[22].mxu0 }
 0x116   : > { %5017 = vmatmul.mubr.bf16.gmra.mrb[16].mxu1 %v797_v20  ;;  %v778_v27 = vmax.f32 %v718_v23, 0.0  ;;  %v721_v28 = vadd.f32 %v4975_v26, %v5742_v1  ;;  %v712_v29 = vpop.f32.mrb[23].mxu0 }
 0x117   : > { %v776_v30 = vmax.f32 %v710_v25, 0.0  ;;  %v713_v31 = vadd.f32 %v5742_v1, %v712_v29 }
 0x118   : > { %v779_v32 = vmax.f32 %v721_v28, 0.0 }
 0x119   : > { %v777_v33 = vmax.f32 %v713_v31, 0.0 }
 0x11a   : > { %v799_v34 = vpack.c.bf16 %v779_v32, %v778_v27 }
 0x11b   : > { %v798_v38 = vpack.c.bf16 %v777_v33, %v776_v30  ;;  %v4978_v39 = vpop.f32.mrb[24].mxu0 }
 0x11c   : > { %v734_v40 = vadd.f32 %v4978_v39, %v5742_v1  ;;  %v725_v45 = vpop.f32.mrb[25].mxu0 }
 0x11d   : > { %5020 = vmatprep.mubr.bf16.mxu1 %v798_v38  ;;  %v726_v46 = vadd.f32 %v5742_v1, %v725_v45  ;;  %v4979_v51 = vpop.f32.mrb[26].mxu0 }
 0x11e   : > { %5021 = vmatmul.mubr.bf16.gmra.mrb[20].mxu1 %v799_v34  ;;  %v782_v52 = vmax.f32 %v734_v40, 0.0  ;;  %v737_v55 = vadd.f32 %v4979_v51, %v5742_v1  ;;  %v728_v56 = vpop.f32.mrb[27].mxu0 }
 0x11f   : > { %v780_v57 = vmax.f32 %v726_v46, 0.0  ;;  %v729_v58 = vadd.f32 %v5742_v1, %v728_v56 }
 0x120   : > { %v783_v59 = vmax.f32 %v737_v55, 0.0 }
 0x121   : > { %v781_v60 = vmax.f32 %v729_v58, 0.0 }
 0x122   : > { %v801_v61 = vpack.c.bf16 %v783_v59, %v782_v52 }
 0x123   : > { %v800_v62 = vpack.c.bf16 %v781_v60, %v780_v57  ;;  %v4982_v63 = vpop.f32.mrb[28].mxu0 }
 0x124   : > { %v750_v0 = vadd.f32 %v4982_v63, %v5742_v1  ;;  %v741_v2 = vpop.f32.mrb[29].mxu0 }
 0x125   : > { %5024 = vmatprep.mubr.bf16.mxu1 %v800_v62  ;;  %v742_v3 = vadd.f32 %v5742_v1, %v741_v2  ;;  %v4983_v4 = vpop.f32.mrb[30].mxu0 }
 0x126   : > { %5025 = vmatmul.mubr.bf16.gmra.mrb[24].mxu1 %v801_v61  ;;  %v786_v5 = vmax.f32 %v750_v0, 0.0  ;;  %v753_v6 = vadd.f32 %v4983_v4, %v5742_v1  ;;  %v744_v7 = vpop.f32.mrb[31].mxu0 }
 0x127   : > { %v784_v8 = vmax.f32 %v742_v3, 0.0  ;;  %v745_v9 = vadd.f32 %v5742_v1, %v744_v7  ;;  %v1427_v1 = vsel %vm591_vm0, %v5242_v15, 0 }
 0x128   : > { %v787_v10 = vmax.f32 %v753_v6, 0.0  ;;  %5081 = vmatpush3.bf16.msra.mxu1 %v1427_v1 }
 0x129   : > { %v785_v11 = vmax.f32 %v745_v9, 0.0 }
 0x12a   : > { %v803_v12 = vpack.c.bf16 %v787_v10, %v786_v5 }
 0x12b   : > { %v802_v13 = vpack.c.bf16 %v785_v11, %v784_v8 }
 0x12d   : > { %5028 = vmatprep.mubr.bf16.mxu1 %v802_v13 }
 0x12e   : > { %5029 = vmatmul.mubr.bf16.gmra.mrb[28].mxu1 %v803_v12 }
 0x1c9   : > { %v5002_v17 = vpop.f32.mrb[0].mxu1 }
 0x1ca   : > { %v918_v18 = vadd.f32 %v5002_v17, %v5787_v16  ;;  %v909_v19 = vpop.f32.mrb[1].mxu1 }
 0x1cb   : > { %v910_v20 = vadd.f32 %v5787_v16, %v909_v19  ;;  %v5003_v21 = vpop.f32.mrb[2].mxu1 }
 0x1cc   : > { %v921_v22 = vadd.f32 %v5003_v21, %v5787_v16  ;;  %v912_v23 = vpop.f32.mrb[3].mxu1  ;;  %v1038_v25 = vmax.f32 %v918_v18, 0.0 }
 0x1cd   : > { %v913_v24 = vadd.f32 %v5787_v16, %v912_v23  ;;  %v1036_v27 = vmax.f32 %v910_v20, 0.0 }
 0x1ce   : > { %v1039_v26 = vmax.f32 %v921_v22, 0.0 }
 0x1cf   : > { %v1037_v28 = vmax.f32 %v913_v24, 0.0 }
 0x1d0   : > { %v1069_v29 = vpack.c.bf16 %v1039_v26, %v1038_v25 }
 0x1d1   : > { %v1068_v30 = vpack.c.bf16 %v1037_v28, %v1036_v27  ;;  %v5006_v31 = vpop.f32.mrb[4].mxu1 }
 0x1d2   : > { %v934_v32 = vadd.f32 %v5006_v31, %v5787_v16  ;;  %v925_v33 = vpop.f32.mrb[5].mxu1 }
 0x1d3   : > { %v926_v34 = vadd.f32 %v5787_v16, %v925_v33  ;;  %v5007_v38 = vpop.f32.mrb[6].mxu1  ;;  %5048 = vmatprep.mubr.bf16.mxu0 %v1068_v30 }
 0x1d4   : > { %v1042_v39 = vmax.f32 %v934_v32, 0.0  ;;  %v937_v40 = vadd.f32 %v5007_v38, %v5787_v16  ;;  %v928_v45 = vpop.f32.mrb[7].mxu1  ;;  %5049 = vmatmul.mubr.bf16.vlgmr.msra.gmra.mrb[32].mxu0 %v1069_v29 }
 0x1d5   : > { %v1040_v46 = vmax.f32 %v926_v34, 0.0  ;;  %v929_v51 = vadd.f32 %v5787_v16, %v928_v45 }
 0x1d6   : > { %v1043_v52 = vmax.f32 %v937_v40, 0.0 }
 0x1d7   : > { %v1041_v55 = vmax.f32 %v929_v51, 0.0 }
 0x1d8   : > { %v1071_v56 = vpack.c.bf16 %v1043_v52, %v1042_v39 }
 0x1d9   : > { %v1070_v57 = vpack.c.bf16 %v1041_v55, %v1040_v46  ;;  %v5010_v58 = vpop.f32.mrb[8].mxu1 }
 0x1da   : > { %v950_v59 = vadd.f32 %v5010_v58, %v5787_v16  ;;  %v941_v60 = vpop.f32.mrb[9].mxu1 }
 0x1db   : > { %v942_v61 = vadd.f32 %v5787_v16, %v941_v60  ;;  %v5011_v62 = vpop.f32.mrb[10].mxu1  ;;  %5052 = vmatprep.mubr.bf16.mxu0 %v1070_v57 }
 0x1dc   : > { %v1046_v63 = vmax.f32 %v950_v59, 0.0  ;;  %v953_v0 = vadd.f32 %v5011_v62, %v5787_v16  ;;  %v944_v2 = vpop.f32.mrb[11].mxu1  ;;  %5053 = vmatmul.mubr.bf16.gmra.mrb[36].mxu0 %v1071_v56 }
 0x1dd   : > { %v1044_v3 = vmax.f32 %v942_v61, 0.0  ;;  %v945_v4 = vadd.f32 %v5787_v16, %v944_v2 }
 0x1de   : > { %v1047_v5 = vmax.f32 %v953_v0, 0.0 }
 0x1df   : > { %v1045_v6 = vmax.f32 %v945_v4, 0.0 }
 0x1e0   : > { %v1073_v7 = vpack.c.bf16 %v1047_v5, %v1046_v63 }
 0x1e1   : > { %v1072_v8 = vpack.c.bf16 %v1045_v6, %v1044_v3  ;;  %v5014_v9 = vpop.f32.mrb[12].mxu1 }
 0x1e2   : > { %v966_v10 = vadd.f32 %v5014_v9, %v5787_v16  ;;  %v957_v11 = vpop.f32.mrb[13].mxu1 }
 0x1e3   : > { %5056 = vmatprep.mubr.bf16.mxu0 %v1072_v8  ;;  %v958_v12 = vadd.f32 %v5787_v16, %v957_v11  ;;  %v5015_v13 = vpop.f32.mrb[14].mxu1 }
 0x1e4   : > { %5057 = vmatmul.mubr.bf16.gmra.mrb[40].mxu0 %v1073_v7  ;;  %v1050_v14 = vmax.f32 %v966_v10, 0.0  ;;  %v969_v15 = vadd.f32 %v5015_v13, %v5787_v16  ;;  %v960_v1 = vpop.f32.mrb[15].mxu1 }
 0x1e5   : > { %v1048_v17 = vmax.f32 %v958_v12, 0.0  ;;  %v961_v18 = vadd.f32 %v5787_v16, %v960_v1 }
 0x1e6   : > { %v1051_v19 = vmax.f32 %v969_v15, 0.0 }
 0x1e7   : > { %v1049_v20 = vmax.f32 %v961_v18, 0.0 }
 0x1e8   : > { %v1075_v21 = vpack.c.bf16 %v1051_v19, %v1050_v14 }
 0x1e9   : > { %v1074_v22 = vpack.c.bf16 %v1049_v20, %v1048_v17  ;;  %v5018_v23 = vpop.f32.mrb[16].mxu1 }
 0x1ea   : > { %v982_v24 = vadd.f32 %v5018_v23, %v5787_v16  ;;  %v973_v25 = vpop.f32.mrb[17].mxu1 }
 0x1eb   : > { %5060 = vmatprep.mubr.bf16.mxu0 %v1074_v22  ;;  %v974_v26 = vadd.f32 %v5787_v16, %v973_v25  ;;  %v5019_v27 = vpop.f32.mrb[18].mxu1 }
 0x1ec   : > { %5061 = vmatmul.mubr.bf16.gmra.mrb[44].mxu0 %v1075_v21  ;;  %v1054_v28 = vmax.f32 %v982_v24, 0.0  ;;  %v985_v29 = vadd.f32 %v5019_v27, %v5787_v16  ;;  %v976_v30 = vpop.f32.mrb[19].mxu1 }
 0x1ed   : > { %v1052_v31 = vmax.f32 %v974_v26, 0.0  ;;  %v977_v32 = vadd.f32 %v5787_v16, %v976_v30  ;;  %v5244_v30 = vld [vmem:[%s7211_s7 + $0x8] sm:$0xff]  }
 0x1ee   : > { %v1055_v33 = vmax.f32 %v985_v29, 0.0  ;;  %v5243_v29 = vld [vmem:[%s7211_s7] sm:$0xff]  }
 0x1ef   : > { %v1053_v34 = vmax.f32 %v977_v32, 0.0  ;;  %5114 = vmatprep.subr.bf16.mxu0 %v5243_v29  ;;  %v5247_v32 = vld [vmem:[%s7211_s7 + $0x20] sm:$0xff]  }
 0x1f0   : > { %v1077_v38 = vpack.c.bf16 %v1055_v33, %v1054_v28  ;;  %5115 = vmatpush3.bf16.msra.mxu0 %v5243_v29  ;;  %v5248_v33 = vld [vmem:[%s7211_s7 + $0x28] sm:$0xff]  }
 0x1f1   : > { %v1076_v39 = vpack.c.bf16 %v1053_v34, %v1052_v31  ;;  %v5022_v40 = vpop.f32.mrb[20].mxu1  ;;  %5116 = vmatprep.subr.bf16.mxu0 %v5244_v30  ;;  %v5246_v31 = vld [vmem:[%s7211_s7 + $0x18] sm:$0xff]   ;;  %v5249_v34 = vld [vmem:[%s7211_s7 + $0x30] sm:$0xff]  }
 0x1f2   : > { %v998_v45 = vadd.f32 %v5022_v40, %v5787_v16  ;;  %v989_v46 = vpop.f32.mrb[21].mxu1 }
 0x1f3   : > { %5064 = vmatprep.mubr.bf16.mxu0 %v1076_v39  ;;  %v990_v51 = vadd.f32 %v5787_v16, %v989_v46  ;;  %v5023_v52 = vpop.f32.mrb[22].mxu1 }
 0x1f4   : > { %5065 = vmatmul.mubr.bf16.gmra.mrb[48].mxu0 %v1077_v38  ;;  %v1058_v55 = vmax.f32 %v998_v45, 0.0  ;;  %v1001_v56 = vadd.f32 %v5023_v52, %v5787_v16  ;;  %v992_v57 = vpop.f32.mrb[23].mxu1  ;;  %v5845_v38 = vld [vmem:[%s7216_s12 + $0x2] ss:$0 sm:$0xff] }
 0x1f5   : > { %v1056_v58 = vmax.f32 %v990_v51, 0.0  ;;  %v993_v59 = vadd.f32 %v5787_v16, %v992_v57  ;;  %5117 = vmatpush3.bf16.msra.mxu0 %v5244_v30  ;;  %v5475_v57 = vld [vmem:[%s5614_s28 + $0x10] sm:$0xff] }
 0x1f6   : > { %v1059_v60 = vmax.f32 %v1001_v56, 0.0 }
 0x1f7   : > { %v1057_v61 = vmax.f32 %v993_v59, 0.0  ;;  %v5476_v59 = vld [vmem:[%s5614_s28 + $0x18] sm:$0xff] }
 0x1f8   : > { %v1079_v62 = vpack.c.bf16 %v1059_v60, %v1058_v55 }
 0x1f9   : > { %v1078_v63 = vpack.c.bf16 %v1057_v61, %v1056_v58  ;;  %v5026_v0 = vpop.f32.mrb[24].mxu1  ;;  %v5477_v61 = vld [vmem:[%s5614_s28] sm:$0xff] }
 0x1fa   : > { %v1014_v2 = vadd.f32 %v5026_v0, %v5787_v16  ;;  %v1005_v3 = vpop.f32.mrb[25].mxu1 }
 0x1fb   : > { %5068 = vmatprep.mubr.bf16.mxu0 %v1078_v63  ;;  %v1006_v4 = vadd.f32 %v5787_v16, %v1005_v3  ;;  %v5027_v5 = vpop.f32.mrb[26].mxu1  ;;  %v5478_v63 = vld [vmem:[%s5614_s28 + $0x8] sm:$0xff] }
 0x1fc   : > { %5069 = vmatmul.mubr.bf16.gmra.mrb[52].mxu0 %v1079_v62  ;;  %v1062_v6 = vmax.f32 %v1014_v2, 0.0  ;;  %v1017_v7 = vadd.f32 %v5027_v5, %v5787_v16  ;;  %v1008_v8 = vpop.f32.mrb[27].mxu1 }
 0x1fd   : > { %v1060_v9 = vmax.f32 %v1006_v4, 0.0  ;;  %v1009_v10 = vadd.f32 %v5787_v16, %v1008_v8 }
 0x1fe   : > { %v1063_v11 = vmax.f32 %v1017_v7, 0.0 }
 0x1ff   : > { %v1061_v12 = vmax.f32 %v1009_v10, 0.0 }
 0x200   : > { %v1081_v13 = vpack.c.bf16 %v1063_v11, %v1062_v6 }
 0x201   : > { %v1080_v14 = vpack.c.bf16 %v1061_v12, %v1060_v9  ;;  %v5030_v15 = vpop.f32.mrb[28].mxu1  ;;  %v5479_v12 = vld [vmem:[%s5614_s28 + $0x30] sm:$0xff] }
 0x202   : > { %v1030_v1 = vadd.f32 %v5030_v15, %v5787_v16  ;;  %v1021_v17 = vpop.f32.mrb[29].mxu1 }
 0x203   : > { %5072 = vmatprep.mubr.bf16.mxu0 %v1080_v14  ;;  %v1022_v18 = vadd.f32 %v5787_v16, %v1021_v17  ;;  %v5031_v19 = vpop.f32.mrb[30].mxu1  ;;  %v5480_v14 = vld [vmem:[%s5614_s28 + $0x38] sm:$0xff] }
 0x204   : > { %5073 = vmatmul.mubr.bf16.gmra.mrb[56].mxu0 %v1081_v13  ;;  %v1066_v20 = vmax.f32 %v1030_v1, 0.0  ;;  %v1033_v21 = vadd.f32 %v5031_v19, %v5787_v16  ;;  %v1024_v22 = vpop.f32.mrb[31].mxu1  ;;  %v5481_v1 = vld [vmem:[%s5614_s28 + $0x20] sm:$0xff] }
 0x205   : > { %v1064_v23 = vmax.f32 %v1022_v18, 0.0  ;;  %v1025_v24 = vadd.f32 %v5787_v16, %v1024_v22  ;;  %v5245_v16 = vld [vmem:[%s7211_s7 + $0x10] sm:$0xff]   ;;  %v5482_v18 = vld [vmem:[%s5614_s28 + $0x28] sm:$0xff] }
 0x206   : > { %v1067_v25 = vmax.f32 %v1033_v21, 0.0  ;;  %5118 = vmatprep.subr.bf16.mxu0 %v5245_v16 }
 0x207   : > { %v1065_v26 = vmax.f32 %v1025_v24, 0.0  ;;  %5119 = vmatpush3.bf16.msra.mxu0 %v5245_v16  ;;  %v5484_v16 = vld [vmem:[%s5614_s28 + $0x40] sm:$0xff] }
 0x208   : > { %v1083_v27 = vpack.c.bf16 %v1067_v25, %v1066_v20  ;;  %5120 = vmatprep.subr.bf16.mxu0 %v5246_v31 }
 0x209   : > { %v1082_v28 = vpack.c.bf16 %v1065_v26, %v1064_v23 }
 0x20b   : > { %5076 = vmatprep.mubr.bf16.mxu0 %v1082_v28  ;;  %5121 = vmatpush3.bf16.msra.mxu0 %v5246_v31 }
 0x20c   : > { %5077 = vmatmul.mubr.bf16.gmra.mrb[60].mxu0 %v1083_v27  ;;  %5122 = vmatprep.subr.bf16.mxu0 %v5247_v32  ;;  %v5483_v27 = vld [vmem:[%s5614_s28 + $0x50] sm:$0xff] }
 0x20f   : > { %5123 = vmatpush3.bf16.msra.mxu0 %v5247_v32 }
 0x210   : > { %5124 = vmatprep.subr.bf16.mxu0 %v5248_v33 }
 0x213   : > { %5125 = vmatpush3.bf16.msra.mxu0 %v5248_v33  ;;  %v5485_v33 = vld [vmem:[%s5614_s28 + $0x58] sm:$0xff] }
 0x214   : > { %5126 = vmatprep.subr.bf16.mxu0 %v5249_v34 }
 0x217   : > { %5127 = vmatpush3.bf16.msra.mxu0 %v5249_v34 }
 0x2a7   : > { %v5050_v39 = vpop.f32.mrb[32].mxu0 }
 0x2a8   : > { %v1198_v40 = vadd.f32 %v5050_v39, %v5845_v38  ;;  %v1189_v45 = vpop.f32.mrb[33].mxu0  ;;  %v5486_v39 = vld [vmem:[%s5614_s28 + $0x48] sm:$0xff] }
 0x2a9   : > { %v1190_v46 = vadd.f32 %v5845_v38, %v1189_v45  ;;  %v5051_v51 = vpop.f32.mrb[34].mxu0 }
 0x2aa   : > { %v1201_v52 = vadd.f32 %v5051_v51, %v5845_v38  ;;  %v1192_v55 = vpop.f32.mrb[35].mxu0  ;;  %v1318_v58 = vadd.f32 %v5475_v57, %v1198_v40 }
 0x2ab   : > { %v1193_v56 = vadd.f32 %v5845_v38, %v1192_v55  ;;  %v1316_v62 = vadd.f32 %v5477_v61, %v1190_v46 }
 0x2ac   : > { %v1319_v60 = vadd.f32 %v5476_v59, %v1201_v52 }
 0x2ad   : > { %v1317_v0 = vadd.f32 %v5478_v63, %v1193_v56 }
 0x2ae   : > { %v1349_v2 = vpack.c.bf16 %v1319_v60, %v1318_v58  ;;  %v5487_v58 = vld [vmem:[%s5614_s28 + $0x70] sm:$0xff] }
 0x2af   : > { %v1348_v3 = vpack.c.bf16 %v1317_v0, %v1316_v62  ;;  %v5054_v4 = vpop.f32.mrb[36].mxu0  ;;  %v5488_v62 = vld [vmem:[%s5614_s28 + $0x60] sm:$0xff] }
 0x2b0   : > { %v1214_v5 = vadd.f32 %v5054_v4, %v5845_v38  ;;  %v1205_v6 = vpop.f32.mrb[37].mxu0  ;;  %v5490_v4 = vld [vmem:[%s5614_s28 + $0x68] sm:$0xff] }
 0x2b1   : > { %v1206_v7 = vadd.f32 %v5845_v38, %v1205_v6  ;;  %v5055_v8 = vpop.f32.mrb[38].mxu0  ;;  %5082 = vmatprep.mubr.msk.bf16.mxu1 %vm542_vm1, %v1348_v3 }
 0x2b2   : > { %v1217_v9 = vadd.f32 %v5055_v8, %v5845_v38  ;;  %v1208_v10 = vpop.f32.mrb[39].mxu0  ;;  %5083 = vmatmul.mubr.msk.bf16.vlgmr.msra.gmra.mrb[32].mxu1 %vm542_vm1, %v1349_v2  ;;  %v1322_v13 = vadd.f32 %v5479_v12, %v1214_v5  ;;  %v5489_v2 = vld [vmem:[%s5614_s28 + $0x78] sm:$0xff] }
 0x2b3   : > { %v1209_v11 = vadd.f32 %v5845_v38, %v1208_v10  ;;  %v1320_v17 = vadd.f32 %v5481_v1, %v1206_v7  ;;  %v5491_v1 = vld [vmem:[%s5614_s28 + $0x80] sm:$0xff] }
 0x2b4   : > { %v1323_v15 = vadd.f32 %v5480_v14, %v1217_v9 }
 0x2b5   : > { %v1321_v19 = vadd.f32 %v5482_v18, %v1209_v11 }
 0x2b6   : > { %v1351_v20 = vpack.c.bf16 %v1323_v15, %v1322_v13 }
 0x2b7   : > { %v1350_v21 = vpack.c.bf16 %v1321_v19, %v1320_v17  ;;  %v5058_v22 = vpop.f32.mrb[40].mxu0 }
 0x2b8   : > { %v1230_v23 = vadd.f32 %v5058_v22, %v5845_v38  ;;  %v1221_v24 = vpop.f32.mrb[41].mxu0 }
 0x2b9   : > { %v1222_v25 = vadd.f32 %v5845_v38, %v1221_v24  ;;  %v5059_v26 = vpop.f32.mrb[42].mxu0  ;;  %5086 = vmatprep.mubr.msk.bf16.mxu1 %vm542_vm1, %v1350_v21 }
 0x2ba   : > { %v1326_v28 = vadd.f32 %v5483_v27, %v1230_v23  ;;  %v1233_v29 = vadd.f32 %v5059_v26, %v5845_v38  ;;  %v1224_v30 = vpop.f32.mrb[43].mxu0  ;;  %5087 = vmatmul.mubr.msk.bf16.gmra.mrb[36].mxu1 %vm542_vm1, %v1351_v20  ;;  %v5492_v20 = vld [vmem:[%s5614_s28 + $0x88] sm:$0xff] }
 0x2bb   : > { %v1324_v31 = vadd.f32 %v5484_v16, %v1222_v25  ;;  %v1225_v32 = vadd.f32 %v5845_v38, %v1224_v30 }
 0x2bc   : > { %v1327_v34 = vadd.f32 %v5485_v33, %v1233_v29 }
 0x2bd   : > { %v1325_v40 = vadd.f32 %v5486_v39, %v1225_v32  ;;  %v5493_v32 = vld [vmem:[%s5614_s28 + $0xa8] sm:$0xff]  ;;  %s6413_s28 = scalar_lea.vmem %s7206_s2, %s4403_s25 }
 0x2be   : > { %v1353_v45 = vpack.c.bf16 %v1327_v34, %v1326_v28 }
 0x2bf   : > { %v1352_v46 = vpack.c.bf16 %v1325_v40, %v1324_v31  ;;  %v5062_v51 = vpop.f32.mrb[44].mxu0 }
 0x2c0   : > { %v1246_v52 = vadd.f32 %v5062_v51, %v5845_v38  ;;  %v1237_v55 = vpop.f32.mrb[45].mxu0 }
 0x2c1   : > { %5090 = vmatprep.mubr.msk.bf16.mxu1 %vm542_vm1, %v1352_v46  ;;  %v1238_v56 = vadd.f32 %v5845_v38, %v1237_v55  ;;  %v5063_v57 = vpop.f32.mrb[46].mxu0 }
 0x2c2   : > { %5091 = vmatmul.mubr.msk.bf16.gmra.mrb[40].mxu1 %vm542_vm1, %v1353_v45  ;;  %v1330_v59 = vadd.f32 %v5487_v58, %v1246_v52  ;;  %v1249_v60 = vadd.f32 %v5063_v57, %v5845_v38  ;;  %v1240_v61 = vpop.f32.mrb[47].mxu0 }
 0x2c3   : > { %v1328_v63 = vadd.f32 %v5488_v62, %v1238_v56  ;;  %v1241_v0 = vadd.f32 %v5845_v38, %v1240_v61 }
 0x2c4   : > { %v1331_v3 = vadd.f32 %v5489_v2, %v1249_v60 }
 0x2c5   : > { %v1329_v5 = vadd.f32 %v5490_v4, %v1241_v0 }
 0x2c6   : > { %v1355_v6 = vpack.c.bf16 %v1331_v3, %v1330_v59 }
 0x2c7   : > { %v1354_v7 = vpack.c.bf16 %v1329_v5, %v1328_v63  ;;  %v5066_v8 = vpop.f32.mrb[48].mxu0 }
 0x2c8   : > { %v1262_v9 = vadd.f32 %v5066_v8, %v5845_v38  ;;  %v1253_v10 = vpop.f32.mrb[49].mxu0  ;;  %v5259_v8 = vld [vmem:[%s7212_s8 + $0x24] ss:$8 sps:$4 sm:$0xff]  }
 0x2c9   : > { %5094 = vmatprep.mubr.msk.bf16.mxu1 %vm542_vm1, %v1354_v7  ;;  %v1254_v11 = vadd.f32 %v5845_v38, %v1253_v10  ;;  %v5067_v12 = vpop.f32.mrb[50].mxu0  ;;  %v5262_v10 = vld [vmem:[%s7212_s8 + $0x34] ss:$8 sps:$4 sm:$0xff]  }
 0x2ca   : > { %5095 = vmatmul.mubr.msk.bf16.gmra.mrb[44].mxu1 %vm542_vm1, %v1355_v6  ;;  %v1334_v13 = vadd.f32 %v1262_v9, %v5651_v35  ;;  %v1265_v14 = vadd.f32 %v5067_v12, %v5845_v38  ;;  %v1256_v15 = vpop.f32.mrb[51].mxu0  ;;  %v5257_v9 = vld [vmem:[%s7212_s8 + $0x20] ss:$8 sps:$4 sm:$0xff]   ;;  %v5265_v12 = vld [vmem:[%s7212_s8 + $0x44] ss:$8 sps:$4 sm:$0xff]  }
 0x2cb   : > { %v1332_v17 = vadd.f32 %v5491_v1, %v1254_v11  ;;  %v1257_v18 = vadd.f32 %v5845_v38, %v1256_v15  ;;  %v5260_v11 = vld [vmem:[%s7212_s8 + $0x30] ss:$8 sps:$4 sm:$0xff]   ;;  %v5271_v1 = vld [vmem:[%s7212_s8 + $0x64] ss:$8 sps:$4 sm:$0xff]  }
 0x2cc   : > { %v1335_v19 = vadd.f32 %v1265_v14, %v5654_v36  ;;  %v5268_v14 = vld [vmem:[%s7212_s8 + $0x54] ss:$8 sps:$4 sm:$0xff]   ;;  %v5266_v15 = vld [vmem:[%s7212_s8 + $0x50] ss:$8 sps:$4 sm:$0xff]  }
 0x2cd   : > { %v1333_v21 = vadd.f32 %v5492_v20, %v1257_v18  ;;  %v5975_v18 = vld [vmem:[%s7216_s12 + $0x3] ss:$0 sm:$0xff] }
 0x2ce   : > { %v1357_v22 = vpack.c.bf16 %v1335_v19, %v1334_v13  ;;  %v5263_v13 = vld [vmem:[%s7212_s8 + $0x40] ss:$8 sps:$4 sm:$0xff]  }
 0x2cf   : > { %v1356_v23 = vpack.c.bf16 %v1333_v21, %v1332_v17  ;;  %v5070_v24 = vpop.f32.mrb[52].mxu0  ;;  %v5269_v17 = vld [vmem:[%s7212_s8 + $0x60] ss:$8 sps:$4 sm:$0xff]  }
 0x2d0   : > { %v1278_v25 = vadd.f32 %v5070_v24, %v5845_v38  ;;  %v1269_v26 = vpop.f32.mrb[53].mxu0 }
 0x2d1   : > { %5098 = vmatprep.mubr.msk.bf16.mxu1 %vm542_vm1, %v1356_v23  ;;  %v1270_v35 = vadd.f32 %v5845_v38, %v1269_v26  ;;  %v5071_v27 = vpop.f32.mrb[54].mxu0 }
 0x2d2   : > { %5099 = vmatmul.mubr.msk.bf16.gmra.mrb[48].mxu1 %vm542_vm1, %v1357_v22  ;;  %v1338_v28 = vadd.f32 %v1278_v25, %v5666_v41  ;;  %v1281_v36 = vadd.f32 %v5071_v27, %v5845_v38  ;;  %v1272_v29 = vpop.f32.mrb[55].mxu0 }
 0x2d3   : > { %v1336_v30 = vadd.f32 %v1270_v35, %v5658_v37  ;;  %v1273_v16 = vadd.f32 %v5845_v38, %v1272_v29 }
 0x2d4   : > { %v1339_v31 = vadd.f32 %v1281_v36, %v5669_v42 }
 0x2d5   : > { %v1337_v33 = vadd.f32 %v5493_v32, %v1273_v16 }
 0x2d6   : > { %v1359_v34 = vpack.c.bf16 %v1339_v31, %v1338_v28 }
 0x2d7   : > { %v1358_v39 = vpack.c.bf16 %v1337_v33, %v1336_v30  ;;  %v5074_v40 = vpop.f32.mrb[56].mxu0 }
 0x2d8   : > { %v1294_v45 = vadd.f32 %v5074_v40, %v5845_v38  ;;  %v1285_v46 = vpop.f32.mrb[57].mxu0 }
 0x2d9   : > { %5102 = vmatprep.mubr.msk.bf16.mxu1 %vm542_vm1, %v1358_v39  ;;  %v1286_v41 = vadd.f32 %v5845_v38, %v1285_v46  ;;  %v5075_v51 = vpop.f32.mrb[58].mxu0 }
 0x2da   : > { %5103 = vmatmul.mubr.msk.bf16.gmra.mrb[52].mxu1 %vm542_vm1, %v1359_v34  ;;  %v1342_v37 = vadd.f32 %v1294_v45, %v5684_v47  ;;  %v1297_v52 = vadd.f32 %v5075_v51, %v5845_v38  ;;  %v1288_v42 = vpop.f32.mrb[59].mxu0 }
 0x2db   : > { %v1340_v55 = vadd.f32 %v1286_v41, %v5673_v43  ;;  %v1289_v56 = vadd.f32 %v5845_v38, %v1288_v42 }
 0x2dc   : > { %v1343_v57 = vadd.f32 %v1297_v52, %v5687_v48 }
 0x2dd   : > { %v1341_v58 = vadd.f32 %v1289_v56, %v5676_v44 }
 0x2de   : > { %v1361_v59 = vpack.c.bf16 %v1343_v57, %v1342_v37 }
 0x2df   : > { %v1360_v60 = vpack.c.bf16 %v1341_v58, %v1340_v55  ;;  %v5078_v61 = vpop.f32.mrb[60].mxu0 }
 0x2e0   : > { %v1310_v62 = vadd.f32 %v5078_v61, %v5845_v38  ;;  %v1301_v63 = vpop.f32.mrb[61].mxu0 }
 0x2e1   : > { %5106 = vmatprep.mubr.msk.bf16.mxu1 %vm542_vm1, %v1360_v60  ;;  %v1302_v47 = vadd.f32 %v5845_v38, %v1301_v63  ;;  %v5079_v0 = vpop.f32.mrb[62].mxu0 }
 0x2e2   : > { %5107 = vmatmul.mubr.msk.bf16.gmra.mrb[56].mxu1 %vm542_vm1, %v1361_v59  ;;  %v1346_v43 = vadd.f32 %v1310_v62, %v5702_v53  ;;  %v1313_v2 = vadd.f32 %v5079_v0, %v5845_v38  ;;  %v1304_v48 = vpop.f32.mrb[63].mxu0  ;;  %v5250_v53 = vld [vmem:[%s7211_s7 + $0x38] sm:$0xff]  }
 0x2e3   : > { %v1344_v44 = vadd.f32 %v1302_v47, %v5691_v49  ;;  %v1305_v3 = vadd.f32 %v5845_v38, %v1304_v48  ;;  %5128 = vmatprep.subr.bf16.mxu0 %v5250_v53  ;;  %v5251_v49 = vld [vmem:[%s7212_s8] ss:$8 sps:$4 sm:$0xff]   ;;  %v5254_v38 = vld [vmem:[%s7212_s8 + $0x10] ss:$8 sps:$4 sm:$0xff]  }
 0x2e4   : > { %v1347_v4 = vadd.f32 %v1313_v2, %v5705_v54  ;;  %5129 = vmatpush3.bf16.msra.mxu0 %v5250_v53  ;;  %v5256_v54 = vld [vmem:[%s7212_s8 + $0x14] ss:$8 sps:$4 sm:$0xff]  }
 0x2e5   : > { %v1345_v5 = vadd.f32 %v1305_v3, %v5694_v50  ;;  %v5253_v50 = vld [vmem:[%s7212_s8 + $0x4] ss:$8 sps:$4 sm:$0xff]  }
 0x2e6   : > { %v1363_v6 = vpack.c.bf16 %v1347_v4, %v1346_v43  ;;  %2026 = vmatprep.subr.bf16.mxu1 %v5253_v50 }
 0x2e7   : > { %v1362_v7 = vpack.c.bf16 %v1345_v5, %v1344_v44  ;;  %2027 = vmatpush1.bf16.msra.mxu1 %v5251_v49 }
 0x2e8   : > { %2028 = vmatprep.subr.bf16.mxu1 %v5256_v54 }
 0x2e9   : > { %5110 = vmatprep.mubr.msk.bf16.mxu1 %vm542_vm1, %v1362_v7 }
 0x2ea   : > { %5111 = vmatmul.mubr.msk.bf16.gmra.mrb[60].mxu1 %vm542_vm1, %v1363_v6 }
 0x2eb   : > { %2029 = vmatpush1.bf16.msra.mxu1 %v5254_v38 }
 0x2ec   : > { %2030 = vmatprep.subr.bf16.mxu1 %v5259_v8 }
 0x2ef   : > { %2031 = vmatpush1.bf16.msra.mxu1 %v5257_v9 }
 0x2f0   : > { %2032 = vmatprep.subr.bf16.mxu1 %v5262_v10 }
 0x2f3   : > { %2033 = vmatpush1.bf16.msra.mxu1 %v5260_v11 }
 0x2f4   : > { %2034 = vmatprep.subr.bf16.mxu1 %v5265_v12 }
 0x2f7   : > { %2035 = vmatpush1.bf16.msra.mxu1 %v5263_v13 }
 0x2f8   : > { %2036 = vmatprep.subr.bf16.mxu1 %v5268_v14 }
 0x2fb   : > { %2037 = vmatpush1.bf16.msra.mxu1 %v5266_v15 }
 0x2fc   : > { %2038 = vmatprep.subr.bf16.mxu1 %v5271_v1 }
 0x2ff   : > { %2039 = vmatpush1.bf16.msra.mxu1 %v5269_v17 }
 0x385   : > { %v5084_v19 = vpop.f32.mrb[32].mxu1 }
 0x386   : > { %v1472_v20 = vadd.f32 %v5084_v19, %v5975_v18  ;;  %v1463_v21 = vpop.f32.mrb[33].mxu1 }
 0x387   : > { %v1464_v22 = vadd.f32 %v5975_v18, %v1463_v21  ;;  %v5085_v23 = vpop.f32.mrb[34].mxu1 }
 0x388   : > { %v1475_v24 = vadd.f32 %v5085_v23, %v5975_v18  ;;  %v1466_v25 = vpop.f32.mrb[35].mxu1  ;;  %v1592_v35 = vmax.f32 %v1472_v20, 0.0 }
 0x389   : > { %v1467_v26 = vadd.f32 %v5975_v18, %v1466_v25  ;;  %v1590_v28 = vmax.f32 %v1464_v22, 0.0 }
 0x38a   : > { %v1593_v27 = vmax.f32 %v1475_v24, 0.0 }
 0x38b   : > { %v1591_v36 = vmax.f32 %v1467_v26, 0.0 }
 0x38c   : > { %v1623_v29 = vpack.c.bf16 %v1593_v27, %v1592_v35 }
 0x38d   : > { %v1622_v30 = vpack.c.bf16 %v1591_v36, %v1590_v28  ;;  %v5088_v16 = vpop.f32.mrb[36].mxu1 }
 0x38e   : > { %v1488_v31 = vadd.f32 %v5088_v16, %v5975_v18  ;;  %v1479_v32 = vpop.f32.mrb[37].mxu1 }
 0x38f   : > { %v1480_v33 = vadd.f32 %v5975_v18, %v1479_v32  ;;  %v5089_v34 = vpop.f32.mrb[38].mxu1  ;;  %5130 = vmatprep.mubr.bf16.mxu0 %v1622_v30 }
 0x390   : > { %v1491_v39 = vadd.f32 %v5089_v34, %v5975_v18  ;;  %v1482_v40 = vpop.f32.mrb[39].mxu1  ;;  %5131 = vmatmul.mubr.bf16.vlgmr.msra.gmra.mrb[64].mxu0 %v1623_v29  ;;  %v1596_v46 = vmax.f32 %v1488_v31, 0.0 }
 0x391   : > { %v1483_v45 = vadd.f32 %v5975_v18, %v1482_v40  ;;  %v1594_v51 = vmax.f32 %v1480_v33, 0.0 }
 0x392   : > { %v1597_v41 = vmax.f32 %v1491_v39, 0.0 }
 0x393   : > { %v1595_v37 = vmax.f32 %v1483_v45, 0.0 }
 0x394   : > { %v1625_v52 = vpack.c.bf16 %v1597_v41, %v1596_v46 }
 0x395   : > { %v1624_v42 = vpack.c.bf16 %v1595_v37, %v1594_v51  ;;  %v5092_v55 = vpop.f32.mrb[40].mxu1 }
 0x396   : > { %v1504_v56 = vadd.f32 %v5092_v55, %v5975_v18  ;;  %v1495_v57 = vpop.f32.mrb[41].mxu1 }
 0x397   : > { %v1496_v58 = vadd.f32 %v5975_v18, %v1495_v57  ;;  %v5093_v59 = vpop.f32.mrb[42].mxu1  ;;  %5134 = vmatprep.mubr.bf16.mxu0 %v1624_v42 }
 0x398   : > { %v1600_v60 = vmax.f32 %v1504_v56, 0.0  ;;  %v1507_v61 = vadd.f32 %v5093_v59, %v5975_v18  ;;  %v1498_v62 = vpop.f32.mrb[43].mxu1  ;;  %5135 = vmatmul.mubr.bf16.gmra.mrb[68].mxu0 %v1625_v52 }
 0x399   : > { %v1598_v63 = vmax.f32 %v1496_v58, 0.0  ;;  %v1499_v47 = vadd.f32 %v5975_v18, %v1498_v62 }
 0x39a   : > { %v1601_v0 = vmax.f32 %v1507_v61, 0.0 }
 0x39b   : > { %v1599_v43 = vmax.f32 %v1499_v47, 0.0 }
 0x39c   : > { %v1627_v2 = vpack.c.bf16 %v1601_v0, %v1600_v60 }
 0x39d   : > { %v1626_v48 = vpack.c.bf16 %v1599_v43, %v1598_v63  ;;  %v5096_v44 = vpop.f32.mrb[44].mxu1 }
 0x39e   : > { %v1520_v3 = vadd.f32 %v5096_v44, %v5975_v18  ;;  %v1511_v4 = vpop.f32.mrb[45].mxu1 }
 0x39f   : > { %5138 = vmatprep.mubr.bf16.mxu0 %v1626_v48  ;;  %v1512_v5 = vadd.f32 %v5975_v18, %v1511_v4  ;;  %v5097_v6 = vpop.f32.mrb[46].mxu1 }
 0x3a0   : > { %5139 = vmatmul.mubr.bf16.gmra.mrb[72].mxu0 %v1627_v2  ;;  %v1604_v7 = vmax.f32 %v1520_v3, 0.0  ;;  %v1523_v53 = vadd.f32 %v5097_v6, %v5975_v18  ;;  %v1514_v49 = vpop.f32.mrb[47].mxu1 }
 0x3a1   : > { %v1602_v50 = vmax.f32 %v1512_v5, 0.0  ;;  %v1515_v54 = vadd.f32 %v5975_v18, %v1514_v49  ;;  %v5272_v49 = vld [vmem:[%s7212_s8 + $0x70] ss:$8 sps:$4 sm:$0xff]  }
 0x3a2   : > { %v1605_v38 = vmax.f32 %v1523_v53, 0.0 }
 0x3a3   : > { %v1603_v8 = vmax.f32 %v1515_v54, 0.0  ;;  %v5502_v54 = vmov 0  }
 0x3a4   : > { %v1629_v9 = vpack.c.bf16 %v1605_v38, %v1604_v7  ;;  %2058 = vmatprep.mubr.bf16.mxu1 %v5502_v54  ;;  %5224 = vset.pattern.permute.xlu0 %v5502_v54 }
 0x3a5   : > { %v1628_v10 = vpack.c.bf16 %v1603_v8, %v1602_v50  ;;  %v5100_v11 = vpop.f32.mrb[48].mxu1  ;;  %v5274_v50 = vld [vmem:[%s7212_s8 + $0x74] ss:$8 sps:$4 sm:$0xff]   ;;  %5223 = vset.pattern.permute.xlu1 %v5502_v54 }
 0x3a6   : > { %v1536_v12 = vadd.f32 %v5100_v11, %v5975_v18  ;;  %v1527_v13 = vpop.f32.mrb[49].mxu1  ;;  %2040 = vmatprep.subr.bf16.mxu1 %v5274_v50  ;;  %v5298_v50 = vld [vmem:[%s7213_s9 + $0x74] ss:$8 sps:$4 sm:$0xff]  }
 0x3a7   : > { %5142 = vmatprep.mubr.bf16.mxu0 %v1628_v10  ;;  %v1528_v14 = vadd.f32 %v5975_v18, %v1527_v13  ;;  %v5101_v15 = vpop.f32.mrb[50].mxu1  ;;  %2041 = vmatpush1.bf16.msra.mxu1 %v5272_v49  ;;  %v5277_v13 = vld [vmem:[%s7213_s9 + $0x4] ss:$8 sps:$4 sm:$0xff]  }
 0x3a8   : > { %5143 = vmatmul.mubr.bf16.gmra.mrb[76].mxu0 %v1629_v9  ;;  %v1608_v1 = vmax.f32 %v1536_v12, 0.0  ;;  %v1539_v17 = vadd.f32 %v5101_v15, %v5975_v18  ;;  %v1530_v19 = vpop.f32.mrb[51].mxu1  ;;  %v5275_v12 = vld [vmem:[%s7213_s9] ss:$8 sps:$4 sm:$0xff]   ;;  %2455 = vmatprep.subr.bf16.mxu0 %v5277_v13  ;;  %v5296_v13 = vld [vmem:[%s7213_s9 + $0x70] ss:$8 sps:$4 sm:$0xff]  }
 0x3a9   : > { %v1606_v20 = vmax.f32 %v1528_v14, 0.0  ;;  %v1531_v21 = vadd.f32 %v5975_v18, %v1530_v19  ;;  %2456 = vmatpush1.bf16.msra.mxu0 %v5275_v12 }
 0x3aa   : > { %v1609_v22 = vmax.f32 %v1539_v17, 0.0 }
 0x3ab   : > { %v1607_v23 = vmax.f32 %v1531_v21, 0.0  ;;  %v5278_v21 = vld [vmem:[%s7213_s9 + $0x10] ss:$8 sps:$4 sm:$0xff]  }
 0x3ac   : > { %v1631_v24 = vpack.c.bf16 %v1609_v22, %v1608_v1  ;;  %v5280_v1 = vld [vmem:[%s7213_s9 + $0x14] ss:$8 sps:$4 sm:$0xff]  }
 0x3ad   : > { %v1630_v25 = vpack.c.bf16 %v1607_v23, %v1606_v20  ;;  %v5104_v26 = vpop.f32.mrb[52].mxu1  ;;  %2457 = vmatprep.subr.bf16.mxu0 %v5280_v1 }
 0x3ae   : > { %v1552_v35 = vadd.f32 %v5104_v26, %v5975_v18  ;;  %v1543_v27 = vpop.f32.mrb[53].mxu1  ;;  %2458 = vmatpush1.bf16.msra.mxu0 %v5278_v21 }
 0x3af   : > { %5146 = vmatprep.mubr.bf16.mxu0 %v1630_v25  ;;  %v1544_v28 = vadd.f32 %v5975_v18, %v1543_v27  ;;  %v5105_v36 = vpop.f32.mrb[54].mxu1 }
 0x3b0   : > { %5147 = vmatmul.mubr.bf16.gmra.mrb[80].mxu0 %v1631_v24  ;;  %v1612_v29 = vmax.f32 %v1552_v35, 0.0  ;;  %v1555_v30 = vadd.f32 %v5105_v36, %v5975_v18  ;;  %v1546_v16 = vpop.f32.mrb[55].mxu1  ;;  %v5283_v24 = vld [vmem:[%s7213_s9 + $0x24] ss:$8 sps:$4 sm:$0xff]   ;;  %v5281_v36 = vld [vmem:[%s7213_s9 + $0x20] ss:$8 sps:$4 sm:$0xff]  }
 0x3b1   : > { %v1610_v31 = vmax.f32 %v1544_v28, 0.0  ;;  %v1547_v32 = vadd.f32 %v5975_v18, %v1546_v16  ;;  %2459 = vmatprep.subr.bf16.mxu0 %v5283_v24  ;;  %v5286_v16 = vld [vmem:[%s7213_s9 + $0x34] ss:$8 sps:$4 sm:$0xff]  }
 0x3b2   : > { %v1613_v33 = vmax.f32 %v1555_v30, 0.0  ;;  %2460 = vmatpush1.bf16.msra.mxu0 %v5281_v36 }
 0x3b3   : > { %v1611_v34 = vmax.f32 %v1547_v32, 0.0  ;;  %2461 = vmatprep.subr.bf16.mxu0 %v5286_v16 }
 0x3b4   : > { %v1633_v39 = vpack.c.bf16 %v1613_v33, %v1612_v29 }
 0x3b5   : > { %v1632_v40 = vpack.c.bf16 %v1611_v34, %v1610_v31  ;;  %v5108_v45 = vpop.f32.mrb[56].mxu1 }
 0x3b6   : > { %v1568_v46 = vadd.f32 %v5108_v45, %v5975_v18  ;;  %v1559_v41 = vpop.f32.mrb[57].mxu1 }
 0x3b7   : > { %5150 = vmatprep.mubr.bf16.mxu0 %v1632_v40  ;;  %v1560_v51 = vadd.f32 %v5975_v18, %v1559_v41  ;;  %v5109_v37 = vpop.f32.mrb[58].mxu1  ;;  %v5284_v40 = vld [vmem:[%s7213_s9 + $0x30] ss:$8 sps:$4 sm:$0xff]   ;;  %v5289_v41 = vld [vmem:[%s7213_s9 + $0x44] ss:$8 sps:$4 sm:$0xff]  }
 0x3b8   : > { %5151 = vmatmul.mubr.bf16.gmra.mrb[84].mxu0 %v1633_v39  ;;  %v1616_v52 = vmax.f32 %v1568_v46, 0.0  ;;  %v1571_v42 = vadd.f32 %v5109_v37, %v5975_v18  ;;  %v1562_v55 = vpop.f32.mrb[59].mxu1 }
 0x3b9   : > { %v1614_v56 = vmax.f32 %v1560_v51, 0.0  ;;  %v1563_v57 = vadd.f32 %v5975_v18, %v1562_v55  ;;  %2462 = vmatpush1.bf16.msra.mxu0 %v5284_v40 }
 0x3ba   : > { %v1617_v58 = vmax.f32 %v1571_v42, 0.0  ;;  %2463 = vmatprep.subr.bf16.mxu0 %v5289_v41 }
 0x3bb   : > { %v1615_v59 = vmax.f32 %v1563_v57, 0.0 }
 0x3bc   : > { %v1635_v60 = vpack.c.bf16 %v1617_v58, %v1616_v52 }
 0x3bd   : > { %v1634_v61 = vpack.c.bf16 %v1615_v59, %v1614_v56  ;;  %v5112_v62 = vpop.f32.mrb[60].mxu1  ;;  %v5287_v56 = vld [vmem:[%s7213_s9 + $0x40] ss:$8 sps:$4 sm:$0xff]   ;;  %v5292_v59 = vld [vmem:[%s7213_s9 + $0x54] ss:$8 sps:$4 sm:$0xff]  }
 0x3be   : > { %v1584_v63 = vadd.f32 %v5112_v62, %v5975_v18  ;;  %v1575_v47 = vpop.f32.mrb[61].mxu1  ;;  %2464 = vmatpush1.bf16.msra.mxu0 %v5287_v56 }
 0x3bf   : > { %5154 = vmatprep.mubr.bf16.mxu0 %v1634_v61  ;;  %v1576_v0 = vadd.f32 %v5975_v18, %v1575_v47  ;;  %v5113_v43 = vpop.f32.mrb[62].mxu1  ;;  %2465 = vmatprep.subr.bf16.mxu0 %v5292_v59 }
 0x3c0   : > { %5155 = vmatmul.mubr.bf16.gmra.mrb[88].mxu0 %v1635_v60  ;;  %v1620_v2 = vmax.f32 %v1584_v63, 0.0  ;;  %v1587_v48 = vadd.f32 %v5113_v43, %v5975_v18  ;;  %v1578_v44 = vpop.f32.mrb[63].mxu1 }
 0x3c1   : > { %v1618_v3 = vmax.f32 %v1576_v0, 0.0  ;;  %v1579_v4 = vadd.f32 %v5975_v18, %v1578_v44  ;;  %v6021_v18 = vld [vmem:[%s7216_s12 + $0x4] ss:$0 sm:$0xff]  ;;  %v5290_v0 = vld [vmem:[%s7213_s9 + $0x50] ss:$8 sps:$4 sm:$0xff]  }
 0x3c2   : > { %v1621_v5 = vmax.f32 %v1587_v48, 0.0  ;;  %v5295_v48 = vld [vmem:[%s7213_s9 + $0x64] ss:$8 sps:$4 sm:$0xff]   ;;  %2466 = vmatpush1.bf16.msra.mxu0 %v5290_v0 }
 0x3c3   : > { %v1619_v6 = vmax.f32 %v1579_v4, 0.0  ;;  %2467 = vmatprep.subr.bf16.mxu0 %v5295_v48 }
 0x3c4   : > { %v1637_v7 = vpack.c.bf16 %v1621_v5, %v1620_v2 }
 0x3c5   : > { %v1636_v53 = vpack.c.bf16 %v1619_v6, %v1618_v3 }
 0x3c7   : > { %5158 = vmatprep.mubr.bf16.mxu0 %v1636_v53 }
 0x3c8   : > { %5159 = vmatmul.mubr.bf16.gmra.mrb[92].mxu0 %v1637_v7  ;;  %v5293_v7 = vld [vmem:[%s7213_s9 + $0x60] ss:$8 sps:$4 sm:$0xff]  }
 0x3c9   : > { %2468 = vmatpush1.bf16.msra.mxu0 %v5293_v7 }
 0x3ca   : > { %2469 = vmatprep.subr.bf16.mxu0 %v5298_v50 }
 0x3cd   : > { %2470 = vmatpush1.bf16.msra.mxu0 %v5296_v13 }
 0x463   : > { %v5132_v38 = vpop.f32.mrb[64].mxu0 }
 0x464   : > { %v1752_v8 = vadd.f32 %v5132_v38, %v6021_v18  ;;  %v1743_v9 = vpop.f32.mrb[65].mxu0 }
 0x465   : > { %v1744_v10 = vadd.f32 %v6021_v18, %v1743_v9  ;;  %v5133_v11 = vpop.f32.mrb[66].mxu0 }
 0x466   : > { %v1755_v14 = vadd.f32 %v5133_v11, %v6021_v18  ;;  %v1746_v15 = vpop.f32.mrb[67].mxu0  ;;  %v1872_v19 = vmax.f32 %v1752_v8, 0.0 }
 0x467   : > { %v1747_v17 = vadd.f32 %v6021_v18, %v1746_v15  ;;  %v1870_v22 = vmax.f32 %v1744_v10, 0.0  ;;  %v5301_v15 = vld [vmem:[%s7213_s9 + $0x84] ss:$8 sps:$4 sm:$0xff]  }
 0x468   : > { %v1873_v20 = vmax.f32 %v1755_v14, 0.0  ;;  %2471 = vmatprep.subr.bf16.mxu0 %v5301_v15 }
 0x469   : > { %v1871_v23 = vmax.f32 %v1747_v17, 0.0 }
 0x46a   : > { %v1903_v25 = vpack.c.bf16 %v1873_v20, %v1872_v19 }
 0x46b   : > { %v1902_v26 = vpack.c.bf16 %v1871_v23, %v1870_v22  ;;  %v5136_v35 = vpop.f32.mrb[68].mxu0  ;;  %v5299_v22 = vld [vmem:[%s7213_s9 + $0x80] ss:$8 sps:$4 sm:$0xff]  }
 0x46c   : > { %v1768_v27 = vadd.f32 %v5136_v35, %v6021_v18  ;;  %v1759_v28 = vpop.f32.mrb[69].mxu0  ;;  %2472 = vmatpush1.bf16.msra.mxu0 %v5299_v22 }
 0x46d   : > { %v1760_v29 = vadd.f32 %v6021_v18, %v1759_v28  ;;  %v5137_v30 = vpop.f32.mrb[70].mxu0  ;;  %2059 = vmatmul.mubr.bf16.vlgmr.msra.gmra.mrb[64].mxu1 %v1902_v26 }
 0x46e   : > { %v1771_v31 = vadd.f32 %v5137_v30, %v6021_v18  ;;  %v1762_v32 = vpop.f32.mrb[71].mxu0  ;;  %2068 = vmatprep.mubr.bf16.mxu1 %v5502_v54  ;;  %v1876_v34 = vmax.f32 %v1768_v27, 0.0  ;;  %v5302_v30 = vld [vmem:[%s7213_s9 + $0x90] ss:$8 sps:$4 sm:$0xff]  }
 0x46f   : > { %v1763_v33 = vadd.f32 %v6021_v18, %v1762_v32  ;;  %v1874_v45 = vmax.f32 %v1760_v29, 0.0 }
 0x470   : > { %v1877_v39 = vmax.f32 %v1771_v31, 0.0  ;;  %v5307_v31 = vld [vmem:[%s7213_s9 + $0xa4] ss:$8 sps:$4 sm:$0xff]  }
 0x471   : > { %v1875_v46 = vmax.f32 %v1763_v33, 0.0 }
 0x472   : > { %v1905_v51 = vpack.c.bf16 %v1877_v39, %v1876_v34 }
 0x473   : > { %v1904_v37 = vpack.c.bf16 %v1875_v46, %v1874_v45  ;;  %v5140_v52 = vpop.f32.mrb[72].mxu0  ;;  %v5305_v45 = vld [vmem:[%s7213_s9 + $0xa0] ss:$8 sps:$4 sm:$0xff]  }
 0x474   : > { %v1784_v42 = vadd.f32 %v5140_v52, %v6021_v18  ;;  %v1775_v55 = vpop.f32.mrb[73].mxu0 }
 0x475   : > { %v1776_v57 = vadd.f32 %v6021_v18, %v1775_v55  ;;  %v5141_v58 = vpop.f32.mrb[74].mxu0  ;;  %2069 = vmatmul.mubr.bf16.gmra.mrb[68].mxu1 %v1903_v25  ;;  %v5304_v25 = vld [vmem:[%s7213_s9 + $0x94] ss:$8 sps:$4 sm:$0xff]  }
 0x476   : > { %v1787_v60 = vadd.f32 %v5141_v58, %v6021_v18  ;;  %v1778_v61 = vpop.f32.mrb[75].mxu0  ;;  %2078 = vmatprep.mubr.bf16.mxu1 %v5502_v54  ;;  %v1880_v63 = vmax.f32 %v1784_v42, 0.0  ;;  %2473 = vmatprep.subr.bf16.mxu0 %v5304_v25  ;;  %v5308_v58 = vld [vmem:[%s7213_s9 + $0xb0] ss:$8 sps:$4 sm:$0xff]  }
 0x477   : > { %v1779_v62 = vadd.f32 %v6021_v18, %v1778_v61  ;;  %v1878_v43 = vmax.f32 %v1776_v57, 0.0  ;;  %2474 = vmatpush1.bf16.msra.mxu0 %v5302_v30 }
 0x478   : > { %v1881_v47 = vmax.f32 %v1787_v60, 0.0  ;;  %2475 = vmatprep.subr.bf16.mxu0 %v5307_v31  ;;  %v5313_v60 = vld [vmem:[%s7213_s9 + $0xc4] ss:$8 sps:$4 sm:$0xff]  }
 0x479   : > { %v1879_v2 = vmax.f32 %v1779_v62, 0.0 }
 0x47a   : > { %v6076_v44 = vpack.c.bf16 %v1881_v47, %v1880_v63 }
 0x47b   : > { %v1906_v3 = vpack.c.bf16 %v1879_v2, %v1878_v43  ;;  %v5144_v4 = vpop.f32.mrb[76].mxu0  ;;  %2476 = vmatpush1.bf16.msra.mxu0 %v5305_v45  ;;  %v5311_v43 = vld [vmem:[%s7213_s9 + $0xc0] ss:$8 sps:$4 sm:$0xff]   ;;  %v5328_v45 = vld [vmem:[%s7214_s10 + $0x10] sm:$0xff]  }
 0x47c   : > { %v1800_v5 = vadd.f32 %v5144_v4, %v6021_v18  ;;  %v1791_v6 = vpop.f32.mrb[77].mxu0 }
 0x47d   : > { %2079 = vmatmul.mubr.bf16.gmra.mrb[72].mxu1 %v1904_v37  ;;  %v1792_v53 = vadd.f32 %v6021_v18, %v1791_v6  ;;  %v5145_v49 = vpop.f32.mrb[78].mxu0 }
 0x47e   : > { %v1884_v38 = vmax.f32 %v1800_v5, 0.0  ;;  %v1803_v8 = vadd.f32 %v5145_v49, %v6021_v18  ;;  %v1794_v9 = vpop.f32.mrb[79].mxu0  ;;  %2088 = vmatprep.mubr.bf16.mxu1 %v5502_v54 }
 0x47f   : > { %v1882_v10 = vmax.f32 %v1792_v53, 0.0  ;;  %v1795_v11 = vadd.f32 %v6021_v18, %v1794_v9 }
 0x480   : > { %v1885_v12 = vmax.f32 %v1803_v8, 0.0 }
 0x481   : > { %v1883_v14 = vmax.f32 %v1795_v11, 0.0 }
 0x482   : > { %v6095_v1 = vpack.c.bf16 %v1885_v12, %v1884_v38 }
 0x483   : > { %v6097_v17 = vpack.c.bf16 %v1883_v14, %v1882_v10  ;;  %v5148_v19 = vpop.f32.mrb[80].mxu0 }
 0x484   : > { %v1816_v20 = vadd.f32 %v5148_v19, %v6021_v18  ;;  %v1807_v21 = vpop.f32.mrb[81].mxu0 }
 0x485   : > { %2089 = vmatmul.mubr.bf16.gmra.mrb[76].mxu1 %v1905_v51  ;;  %v1808_v23 = vadd.f32 %v6021_v18, %v1807_v21  ;;  %v5149_v24 = vpop.f32.mrb[82].mxu0  ;;  %v5310_v51 = vld [vmem:[%s7213_s9 + $0xb4] ss:$8 sps:$4 sm:$0xff]  }
 0x486   : > { %2098 = vmatprep.mubr.bf16.mxu1 %v5502_v54  ;;  %v1888_v26 = vmax.f32 %v1816_v20, 0.0  ;;  %v1819_v35 = vadd.f32 %v5149_v24, %v6021_v18  ;;  %v1810_v27 = vpop.f32.mrb[83].mxu0  ;;  %2477 = vmatprep.subr.bf16.mxu0 %v5310_v51 }
 0x487   : > { %v1886_v28 = vmax.f32 %v1808_v23, 0.0  ;;  %v1811_v36 = vadd.f32 %v6021_v18, %v1810_v27  ;;  %2478 = vmatpush1.bf16.msra.mxu0 %v5308_v58  ;;  %v5324_v27 = vld [vmem:[%s7214_s10] sm:$0xff]  }
 0x488   : > { %v1889_v29 = vmax.f32 %v1819_v35, 0.0  ;;  %2479 = vmatprep.subr.bf16.mxu0 %v5313_v60  ;;  %v5323_v35 = vld [vmem:[%s7214_s10 + $0x40] sm:$0xff]  }
 0x489   : > { %v1887_v16 = vmax.f32 %v1811_v36, 0.0  ;;  %4814 = vmatprep.subr.bf16.mxu1 %v5323_v35  ;;  %v5325_v36 = vld [vmem:[%s7214_s10 + $0x48] sm:$0xff]   ;;  %v5331_v58 = vld [vmem:[%s7214_s10 + $0x60] sm:$0xff]  }
 0x48a   : > { %v6116_v32 = vpack.c.bf16 %v1889_v29, %v1888_v26  ;;  %v5320_v26 = vld [vmem:[%s7213_s9 + $0xf0] ss:$8 sps:$4 sm:$0xff]   ;;  %4815 = vmatpush3.bf16.msra.mxu1 %v5324_v27 }
 0x48b   : > { %v6118_v33 = vpack.c.bf16 %v1887_v16, %v1886_v28  ;;  %v5152_v34 = vpop.f32.mrb[84].mxu0  ;;  %2480 = vmatpush1.bf16.msra.mxu0 %v5311_v43  ;;  %v1936_v28 = vlaneseq  ;;  %4816 = vmatprep.subr.bf16.mxu1 %v5325_v36  ;;  %v1934_v16 = vld [vmem:[%s7216_s12 + $0x5] sm:$0x3] }
 0x48c   : > { %v1832_v39 = vadd.f32 %v5152_v34, %v6021_v18  ;;  %v1823_v40 = vpop.f32.mrb[85].mxu0 }
 0x48d   : > { %2099 = vmatmul.mubr.bf16.gmra.mrb[80].mxu1 %v1906_v3  ;;  %v1824_v46 = vadd.f32 %v6021_v18, %v1823_v40  ;;  %v5153_v41 = vpop.f32.mrb[86].mxu0  ;;  %v5316_v3 = vld [vmem:[%s7213_s9 + $0xd4] ss:$8 sps:$4 sm:$0xff]   ;;  %v6194_v29 = vshrl.u32 %v1936_v28, 7 }
 0x48e   : > { %2108 = vmatprep.mubr.bf16.mxu1 %v5502_v54  ;;  %v1892_v37 = vmax.f32 %v1832_v39, 0.0  ;;  %v1835_v52 = vadd.f32 %v5153_v41, %v6021_v18  ;;  %v1826_v42 = vpop.f32.mrb[87].mxu0  ;;  %2481 = vmatprep.subr.bf16.mxu0 %v5316_v3  ;;  %v5327_v40 = vld [vmem:[%s7214_s10 + $0x50] sm:$0xff]  }
 0x48f   : > { %v1890_v55 = vmax.f32 %v1824_v46, 0.0  ;;  %v1827_v56 = vadd.f32 %v6021_v18, %v1826_v42  ;;  %7226 = vst [vmem:[#allocation4_spill] sm:$0xff] %v6194_v29  ;;  %v1938_v30 = vsub.s32 0, %v6194_v29  ;;  %v1942_v31 = vsub.s32 1, %v6194_v29  ;;  %v5329_v46 = vld [vmem:[%s7214_s10 + $0x58] sm:$0xff]  }
 0x490   : > { %v1893_v57 = vmax.f32 %v1835_v52, 0.0 }
 0x491   : > { %v1891_v59 = vmax.f32 %v1827_v56, 0.0  ;;  %v6207_v34 = vrot.slane %v1934_v16, %v1942_v31  ;;  %v5330_v56 = vld [vmem:[%s7214_s10 + $0x18] sm:$0xff]  }
 0x492   : > { %v1913_v61 = vpack.c.bf16 %v1893_v57, %v1892_v37 }
 0x493   : > { %v1912_v62 = vpack.c.bf16 %v1891_v59, %v1890_v55  ;;  %v5156_v63 = vpop.f32.mrb[88].mxu0 }
 0x494   : > { %v1848_v47 = vadd.f32 %v5156_v63, %v6021_v18  ;;  %v1839_v0 = vpop.f32.mrb[89].mxu0  ;;  %v5333_v63 = vld [vmem:[%s7214_s10 + $0x68] sm:$0xff]  }
 0x495   : > { %2109 = vmatmul.mubr.bf16.gmra.mrb[84].mxu1 %v6076_v44  ;;  %v1840_v2 = vadd.f32 %v6021_v18, %v1839_v0  ;;  %v5157_v48 = vpop.f32.mrb[90].mxu0  ;;  %v5314_v44 = vld [vmem:[%s7213_s9 + $0xd0] ss:$8 sps:$4 sm:$0xff]  }
 0x496   : > { %2118 = vmatprep.mubr.bf16.mxu1 %v5502_v54  ;;  %v1896_v4 = vmax.f32 %v1848_v47, 0.0  ;;  %v1851_v5 = vadd.f32 %v5157_v48, %v6021_v18  ;;  %v1842_v6 = vpop.f32.mrb[91].mxu0  ;;  %2482 = vmatpush1.bf16.msra.mxu0 %v5314_v44 }
 0x497   : > { %v1894_v7 = vmax.f32 %v1840_v2, 0.0  ;;  %v1843_v53 = vadd.f32 %v6021_v18, %v1842_v6  ;;  %v5335_v6 = vld [vmem:[%s7214_s10 + $0x70] sm:$0xff]  }
 0x498   : > { %v1897_v49 = vmax.f32 %v1851_v5, 0.0 }
 0x499   : > { %v1895_v50 = vmax.f32 %v1843_v53, 0.0 }
 0x49a   : > { %v1915_v38 = vpack.c.bf16 %v1897_v49, %v1896_v4  ;;  %v5334_v4 = vld [vmem:[%s7214_s10 + $0x28] sm:$0xff]   ;;  %v5336_v49 = vld [vmem:[%s7214_s10 + $0x30] sm:$0xff]  }
 0x49b   : > { %v1914_v8 = vpack.c.bf16 %v1895_v50, %v1894_v7  ;;  %v5160_v9 = vpop.f32.mrb[92].mxu0  ;;  %v5337_v50 = vld [vmem:[%s7214_s10 + $0x78] sm:$0xff]  }
 0x49c   : > { %v1864_v10 = vadd.f32 %v5160_v9, %v6021_v18  ;;  %v1855_v11 = vpop.f32.mrb[93].mxu0 }
 0x49d   : > { %2119 = vmatmul.mubr.bf16.gmra.mrb[88].mxu1 %v6097_v17  ;;  %v1856_v12 = vadd.f32 %v6021_v18, %v1855_v11  ;;  %v5161_v13 = vpop.f32.mrb[94].mxu0  ;;  %v5322_v17 = vld [vmem:[%s7213_s9 + $0xf4] ss:$8 sps:$4 sm:$0xff]  }
 0x49e   : > { %2128 = vmatprep.mubr.bf16.mxu1 %v5502_v54  ;;  %v1900_v14 = vmax.f32 %v1864_v10, 0.0  ;;  %v1867_v15 = vadd.f32 %v5161_v13, %v6021_v18  ;;  %v1858_v19 = vpop.f32.mrb[95].mxu0  ;;  %v5338_v13 = vld [vmem:[%s7214_s10 + $0x38] sm:$0xff]  }
 0x49f   : > { %v1898_v20 = vmax.f32 %v1856_v12, 0.0  ;;  %v1859_v21 = vadd.f32 %v6021_v18, %v1858_v19  ;;  %v5319_v18 = vld [vmem:[%s7213_s9 + $0xe4] ss:$8 sps:$4 sm:$0xff]  }
 0x4a0   : > { %v1901_v22 = vmax.f32 %v1867_v15, 0.0  ;;  %2483 = vmatprep.subr.bf16.mxu0 %v5319_v18 }
 0x4a1   : > { %v1899_v23 = vmax.f32 %v1859_v21, 0.0 }
 0x4a2   : > { %v1917_v24 = vpack.c.bf16 %v1901_v22, %v1900_v14 }
 0x4a3   : > { %v1916_v25 = vpack.c.bf16 %v1899_v23, %v1898_v20 }
 0x4a5   : > { %2129 = vmatmul.mubr.bf16.gmra.mrb[92].mxu1 %v6095_v1  ;;  %v5317_v1 = vld [vmem:[%s7213_s9 + $0xe0] ss:$8 sps:$4 sm:$0xff]  }
 0x4a6   : > { %2138 = vmatprep.mubr.bf16.mxu1 %v5502_v54  ;;  %2484 = vmatpush1.bf16.msra.mxu0 %v5317_v1 }
 0x4a7   : > { %2485 = vmatprep.subr.bf16.mxu0 %v5322_v17 }
 0x4aa   : > { %2486 = vmatpush1.bf16.msra.mxu0 %v5320_v26 }
 0x4ad   : > { %2139 = vmatmul.mubr.bf16.gmra.mrb[96].mxu1 %v6118_v33 }
 0x4ae   : > { %2148 = vmatprep.mubr.bf16.mxu1 %v5502_v54 }
 0x4b5   : > { %2149 = vmatmul.mubr.bf16.gmra.mrb[100].mxu1 %v6116_v32  ;;  %v6203_v32 = vrot.slane %v1934_v16, %v1938_v30 }
 0x4b6   : > { %2158 = vmatprep.mubr.bf16.mxu1 %v5502_v54 }
 0x4bd   : > { %2159 = vmatmul.mubr.bf16.gmra.mrb[104].mxu1 %v1912_v62 }
 0x4be   : > { %2168 = vmatprep.mubr.bf16.mxu1 %v5502_v54 }
 0x4c5   : > { %2169 = vmatmul.mubr.bf16.gmra.mrb[108].mxu1 %v1913_v61  ;;  %v5332_v61 = vld [vmem:[%s7214_s10 + $0x20] sm:$0xff]  }
 0x4c6   : > { %2178 = vmatprep.mubr.bf16.mxu1 %v5502_v54 }
 0x4cd   : > { %2179 = vmatmul.mubr.bf16.gmra.mrb[112].mxu1 %v1914_v8 }
 0x4ce   : > { %2188 = vmatprep.mubr.bf16.mxu1 %v5502_v54 }
 0x4d5   : > { %2189 = vmatmul.mubr.bf16.gmra.mrb[116].mxu1 %v1915_v38 }
 0x4d6   : > { %2198 = vmatprep.mubr.bf16.mxu1 %v5502_v54 }
 0x4dd   : > { %2199 = vmatmul.mubr.bf16.gmra.mrb[120].mxu1 %v1916_v25 }
 0x4de   : > { %2208 = vmatprep.mubr.bf16.mxu1 %v5502_v54  ;;  %v5326_v54 = vld [vmem:[%s7214_s10 + $0x8] sm:$0xff]  }
 0x4df   : > { %4817 = vmatpush3.bf16.msra.mxu1 %v5326_v54 }
 0x4e0   : > { %4818 = vmatprep.subr.bf16.mxu1 %v5327_v40 }
 0x4e3   : > { %4819 = vmatpush3.bf16.msra.mxu1 %v5328_v45 }
 0x4e4   : > { %4820 = vmatprep.subr.bf16.mxu1 %v5329_v46 }
 0x4e5   : > { %2209 = vmatmul.mubr.bf16.gmra.mrb[124].mxu1 %v1917_v24 }
 0x4e7   : > { %4821 = vmatpush3.bf16.msra.mxu1 %v5330_v56 }
 0x4e8   : > { %4822 = vmatprep.subr.bf16.mxu1 %v5331_v58 }
 0x4eb   : > { %4823 = vmatpush3.bf16.msra.mxu1 %v5332_v61 }
 0x4ec   : > { %4824 = vmatprep.subr.bf16.mxu1 %v5333_v63 }
 0x4ef   : > { %4825 = vmatpush3.bf16.msra.mxu1 %v5334_v4 }
 0x4f0   : > { %4826 = vmatprep.subr.bf16.mxu1 %v5335_v6 }
 0x4f3   : > { %4827 = vmatpush3.bf16.msra.mxu1 %v5336_v49 }
 0x4f4   : > { %4828 = vmatprep.subr.bf16.mxu1 %v5337_v50 }
 0x4f7   : > { %4829 = vmatpush3.bf16.msra.mxu1 %v5338_v13 }
 0x540   : > { %v2060_v33 = vpop.f32.mrb[64].mxu1 }
 0x541   : > { %v2062_v39 = vpop.f32.mrb[65].mxu1  ;;  %v2061_v51 = vadd.f32 %v2060_v33, %v6203_v32 }
 0x542   : > { %v2064_v41 = vpop.f32.mrb[66].mxu1  ;;  %v2063_v42 = vadd.f32 %v2062_v39, %v6207_v34 }
 0x543   : > { %v2065_v37 = vadd.f32 %v2064_v41, %v6203_v32  ;;  %v2066_v52 = vpop.f32.mrb[67].mxu1 }
 0x544   : > { %v2067_v55 = vadd.f32 %v2066_v52, %v6207_v34 }
 0x545   : > { %v2219_v57 = vpack.c.bf16 %v2065_v37, %v2061_v51 }
 0x546   : > { %v2220_v59 = vpack.c.bf16 %v2067_v55, %v2063_v42 }
 0x548   : > { %v2070_v60 = vpop.f32.mrb[68].mxu1  ;;  %2487 = vmatprep.mubr.bf16.mxu0 %v2220_v59 }
 0x549   : > { %v2072_v62 = vpop.f32.mrb[69].mxu1  ;;  %2488 = vmatmul.mubr.bf16.vlgmr.msra.gmra.mrb[96].mxu0 %v2219_v57  ;;  %v2071_v0 = vadd.f32 %v2070_v60, %v6203_v32 }
 0x54a   : > { %v2074_v47 = vpop.f32.mrb[70].mxu1  ;;  %v2073_v48 = vadd.f32 %v2072_v62, %v6207_v34 }
 0x54b   : > { %v2075_v43 = vadd.f32 %v2074_v47, %v6203_v32  ;;  %v2076_v2 = vpop.f32.mrb[71].mxu1 }
 0x54c   : > { %v2077_v3 = vadd.f32 %v2076_v2, %v6207_v34 }
 0x54d   : > { %v2221_v5 = vpack.c.bf16 %v2075_v43, %v2071_v0 }
 0x54e   : > { %v2222_v7 = vpack.c.bf16 %v2077_v3, %v2073_v48 }
 0x550   : > { %v2080_v53 = vpop.f32.mrb[72].mxu1  ;;  %2497 = vmatprep.mubr.bf16.mxu0 %v2222_v7 }
 0x551   : > { %v2082_v44 = vpop.f32.mrb[73].mxu1  ;;  %2498 = vmatmul.mubr.bf16.gmra.mrb[100].mxu0 %v2221_v5  ;;  %v2081_v8 = vadd.f32 %v2080_v53, %v6203_v32 }
 0x552   : > { %v2084_v38 = vpop.f32.mrb[74].mxu1  ;;  %v2083_v11 = vadd.f32 %v2082_v44, %v6207_v34 }
 0x553   : > { %v2085_v9 = vadd.f32 %v2084_v38, %v6203_v32  ;;  %v2086_v10 = vpop.f32.mrb[75].mxu1 }
 0x554   : > { %v2087_v12 = vadd.f32 %v2086_v10, %v6207_v34 }
 0x555   : > { %v2223_v14 = vpack.c.bf16 %v2085_v9, %v2081_v8 }
 0x556   : > { %v2224_v15 = vpack.c.bf16 %v2087_v12, %v2083_v11 }
 0x558   : > { %v2090_v19 = vpop.f32.mrb[76].mxu1  ;;  %2507 = vmatprep.mubr.bf16.mxu0 %v2224_v15 }
 0x559   : > { %v2092_v20 = vpop.f32.mrb[77].mxu1  ;;  %2508 = vmatmul.mubr.bf16.gmra.mrb[104].mxu0 %v2223_v14  ;;  %v2091_v22 = vadd.f32 %v2090_v19, %v6203_v32 }
 0x55a   : > { %v2094_v21 = vpop.f32.mrb[78].mxu1  ;;  %v2093_v25 = vadd.f32 %v2092_v20, %v6207_v34 }
 0x55b   : > { %v2095_v23 = vadd.f32 %v2094_v21, %v6203_v32  ;;  %v2096_v24 = vpop.f32.mrb[79].mxu1 }
 0x55c   : > { %v2097_v18 = vadd.f32 %v2096_v24, %v6207_v34 }
 0x55d   : > { %v2225_v1 = vpack.c.bf16 %v2095_v23, %v2091_v22 }
 0x55e   : > { %v2226_v17 = vpack.c.bf16 %v2097_v18, %v2093_v25 }
 0x560   : > { %v2100_v26 = vpop.f32.mrb[80].mxu1  ;;  %2517 = vmatprep.mubr.bf16.mxu0 %v2226_v17 }
 0x561   : > { %v2102_v35 = vpop.f32.mrb[81].mxu1  ;;  %2518 = vmatmul.mubr.bf16.gmra.mrb[108].mxu0 %v2225_v1  ;;  %v2101_v36 = vadd.f32 %v2100_v26, %v6203_v32 }
 0x562   : > { %v2104_v27 = vpop.f32.mrb[82].mxu1  ;;  %v2103_v33 = vadd.f32 %v2102_v35, %v6207_v34 }
 0x563   : > { %v2105_v54 = vadd.f32 %v2104_v27, %v6203_v32  ;;  %v2106_v16 = vpop.f32.mrb[83].mxu1 }
 0x564   : > { %v2107_v39 = vadd.f32 %v2106_v16, %v6207_v34 }
 0x565   : > { %v2227_v40 = vpack.c.bf16 %v2105_v54, %v2101_v36 }
 0x566   : > { %v2228_v45 = vpack.c.bf16 %v2107_v39, %v2103_v33 }
 0x568   : > { %v2110_v46 = vpop.f32.mrb[84].mxu1  ;;  %2527 = vmatprep.mubr.bf16.mxu0 %v2228_v45 }
 0x569   : > { %v2112_v41 = vpop.f32.mrb[85].mxu1  ;;  %2528 = vmatmul.mubr.bf16.gmra.mrb[112].mxu0 %v2227_v40  ;;  %v2111_v37 = vadd.f32 %v2110_v46, %v6203_v32 }
 0x56a   : > { %v2114_v51 = vpop.f32.mrb[86].mxu1  ;;  %v2113_v55 = vadd.f32 %v2112_v41, %v6207_v34 }
 0x56b   : > { %v2115_v52 = vadd.f32 %v2114_v51, %v6203_v32  ;;  %v2116_v42 = vpop.f32.mrb[87].mxu1 }
 0x56c   : > { %v2117_v56 = vadd.f32 %v2116_v42, %v6207_v34 }
 0x56d   : > { %v2229_v57 = vpack.c.bf16 %v2115_v52, %v2111_v37 }
 0x56e   : > { %v2230_v58 = vpack.c.bf16 %v2117_v56, %v2113_v55 }
 0x570   : > { %v2120_v59 = vpop.f32.mrb[88].mxu1  ;;  %2537 = vmatprep.mubr.bf16.mxu0 %v2230_v58 }
 0x571   : > { %v2122_v60 = vpop.f32.mrb[89].mxu1  ;;  %2538 = vmatmul.mubr.bf16.gmra.mrb[116].mxu0 %v2229_v57  ;;  %v2121_v62 = vadd.f32 %v2120_v59, %v6203_v32 }
 0x572   : > { %v2124_v61 = vpop.f32.mrb[90].mxu1  ;;  %v2123_v0 = vadd.f32 %v2122_v60, %v6207_v34 }
 0x573   : > { %v2125_v63 = vadd.f32 %v2124_v61, %v6203_v32  ;;  %v2126_v47 = vpop.f32.mrb[91].mxu1 }
 0x574   : > { %v2127_v43 = vadd.f32 %v2126_v47, %v6207_v34 }
 0x575   : > { %v2231_v2 = vpack.c.bf16 %v2125_v63, %v2121_v62 }
 0x576   : > { %v2232_v48 = vpack.c.bf16 %v2127_v43, %v2123_v0 }
 0x578   : > { %v2130_v3 = vpop.f32.mrb[92].mxu1  ;;  %2547 = vmatprep.mubr.bf16.mxu0 %v2232_v48 }
 0x579   : > { %v2132_v4 = vpop.f32.mrb[93].mxu1  ;;  %2548 = vmatmul.mubr.bf16.gmra.mrb[120].mxu0 %v2231_v2  ;;  %v2131_v6 = vadd.f32 %v2130_v3, %v6203_v32 }
 0x57a   : > { %v2134_v5 = vpop.f32.mrb[94].mxu1  ;;  %v2133_v49 = vadd.f32 %v2132_v4, %v6207_v34 }
 0x57b   : > { %v2135_v7 = vadd.f32 %v2134_v5, %v6203_v32  ;;  %v2136_v53 = vpop.f32.mrb[95].mxu1 }
 0x57c   : > { %v2137_v44 = vadd.f32 %v2136_v53, %v6207_v34 }
 0x57d   : > { %v2233_v50 = vpack.c.bf16 %v2135_v7, %v2131_v6 }
 0x57e   : > { %v2234_v38 = vpack.c.bf16 %v2137_v44, %v2133_v49 }
 0x580   : > { %v2140_v8 = vpop.f32.mrb[96].mxu1  ;;  %2557 = vmatprep.mubr.bf16.mxu0 %v2234_v38 }
 0x581   : > { %v2142_v9 = vpop.f32.mrb[97].mxu1  ;;  %2558 = vmatmul.mubr.bf16.gmra.mrb[124].mxu0 %v2233_v50  ;;  %v2141_v11 = vadd.f32 %v2140_v8, %v6203_v32 }
 0x582   : > { %v2144_v10 = vpop.f32.mrb[98].mxu1  ;;  %v2143_v14 = vadd.f32 %v2142_v9, %v6207_v34 }
 0x583   : > { %v2145_v12 = vadd.f32 %v2144_v10, %v6203_v32  ;;  %v2146_v13 = vpop.f32.mrb[99].mxu1 }
 0x584   : > { %v2147_v15 = vadd.f32 %v2146_v13, %v6207_v34 }
 0x585   : > { %v2235_v19 = vpack.c.bf16 %v2145_v12, %v2141_v11 }
 0x586   : > { %v2236_v20 = vpack.c.bf16 %v2147_v15, %v2143_v14 }
 0x588   : > { %v2150_v21 = vpop.f32.mrb[100].mxu1  ;;  %2567 = vmatprep.mubr.bf16.mxu0 %v2236_v20 }
 0x589   : > { %v2152_v22 = vpop.f32.mrb[101].mxu1  ;;  %2568 = vmatmul.mubr.bf16.gmra.mrb[128].mxu0 %v2235_v19  ;;  %v2151_v24 = vadd.f32 %v2150_v21, %v6203_v32 }
 0x58a   : > { %v2154_v23 = vpop.f32.mrb[102].mxu1  ;;  %v2153_v1 = vadd.f32 %v2152_v22, %v6207_v34 }
 0x58b   : > { %v2155_v25 = vadd.f32 %v2154_v23, %v6203_v32  ;;  %v2156_v18 = vpop.f32.mrb[103].mxu1 }
 0x58c   : > { %v2157_v17 = vadd.f32 %v2156_v18, %v6207_v34 }
 0x58d   : > { %v2237_v26 = vpack.c.bf16 %v2155_v25, %v2151_v24 }
 0x58e   : > { %v2238_v35 = vpack.c.bf16 %v2157_v17, %v2153_v1 }
 0x590   : > { %v2160_v27 = vpop.f32.mrb[104].mxu1  ;;  %2577 = vmatprep.mubr.bf16.mxu0 %v2238_v35 }
 0x591   : > { %v2162_v36 = vpop.f32.mrb[105].mxu1  ;;  %2578 = vmatmul.mubr.bf16.gmra.mrb[132].mxu0 %v2237_v26  ;;  %v2161_v16 = vadd.f32 %v2160_v27, %v6203_v32 }
 0x592   : > { %v2164_v54 = vpop.f32.mrb[106].mxu1  ;;  %v2163_v40 = vadd.f32 %v2162_v36, %v6207_v34 }
 0x593   : > { %v2165_v33 = vadd.f32 %v2164_v54, %v6203_v32  ;;  %v2166_v39 = vpop.f32.mrb[107].mxu1  ;;  %v5339_v54 = vld [vmem:[%s7215_s11] sm:$0xff]  }
 0x594   : > { %v2167_v45 = vadd.f32 %v2166_v39, %v6207_v34  ;;  %5162 = vmatprep.subr.bf16.mxu0 %v5339_v54 }
 0x595   : > { %v2239_v46 = vpack.c.bf16 %v2165_v33, %v2161_v16  ;;  %v2283_v16 = vld [vmem:[%s7216_s12 + $0x7] sm:$0x3]  ;;  %5163 = vmatpush3.bf16.msra.mxu0 %v5339_v54 }
 0x596   : > { %v2240_v41 = vpack.c.bf16 %v2167_v45, %v2163_v40 }
 0x598   : > { %v2170_v51 = vpop.f32.mrb[108].mxu1  ;;  %2587 = vmatprep.mubr.bf16.mxu0 %v2240_v41 }
 0x599   : > { %v2172_v37 = vpop.f32.mrb[109].mxu1  ;;  %2588 = vmatmul.mubr.bf16.gmra.mrb[136].mxu0 %v2239_v46  ;;  %v2171_v42 = vadd.f32 %v2170_v51, %v6203_v32 }
 0x59a   : > { %v2174_v52 = vpop.f32.mrb[110].mxu1  ;;  %v2173_v57 = vadd.f32 %v2172_v37, %v6207_v34  ;;  %v5340_v37 = vld [vmem:[%s7215_s11 + $0x8] sm:$0xff]  }
 0x59b   : > { %v2175_v55 = vadd.f32 %v2174_v52, %v6203_v32  ;;  %v2176_v56 = vpop.f32.mrb[111].mxu1  ;;  %5164 = vmatprep.subr.bf16.mxu0 %v5340_v37 }
 0x59c   : > { %v2177_v58 = vadd.f32 %v2176_v56, %v6207_v34  ;;  %5165 = vmatpush3.bf16.msra.mxu0 %v5340_v37 }
 0x59d   : > { %v2241_v59 = vpack.c.bf16 %v2175_v55, %v2171_v42 }
 0x59e   : > { %v2242_v60 = vpack.c.bf16 %v2177_v58, %v2173_v57  ;;  %v5342_v58 = vld [vmem:[%s7215_s11 + $0x18] sm:$0xff]  }
 0x5a0   : > { %v2180_v61 = vpop.f32.mrb[112].mxu1  ;;  %2597 = vmatprep.mubr.bf16.mxu0 %v2242_v60 }
 0x5a1   : > { %v2182_v62 = vpop.f32.mrb[113].mxu1  ;;  %2598 = vmatmul.mubr.bf16.gmra.mrb[140].mxu0 %v2241_v59  ;;  %v2181_v47 = vadd.f32 %v2180_v61, %v6203_v32 }
 0x5a2   : > { %v2184_v63 = vpop.f32.mrb[114].mxu1  ;;  %v2183_v2 = vadd.f32 %v2182_v62, %v6207_v34 }
 0x5a3   : > { %v2185_v0 = vadd.f32 %v2184_v63, %v6203_v32  ;;  %v2186_v43 = vpop.f32.mrb[115].mxu1 }
 0x5a4   : > { %v2187_v48 = vadd.f32 %v2186_v43, %v6207_v34 }
 0x5a5   : > { %v2243_v3 = vpack.c.bf16 %v2185_v0, %v2181_v47 }
 0x5a6   : > { %v2244_v4 = vpack.c.bf16 %v2187_v48, %v2183_v2  ;;  %v5343_v2 = vld [vmem:[%s7215_s11 + $0x20] sm:$0xff]  }
 0x5a8   : > { %v2190_v5 = vpop.f32.mrb[116].mxu1  ;;  %2607 = vmatprep.mubr.bf16.mxu0 %v2244_v4 }
 0x5a9   : > { %v2192_v6 = vpop.f32.mrb[117].mxu1  ;;  %2608 = vmatmul.mubr.bf16.gmra.mrb[144].mxu0 %v2243_v3  ;;  %v2191_v53 = vadd.f32 %v2190_v5, %v6203_v32 }
 0x5aa   : > { %v2194_v7 = vpop.f32.mrb[118].mxu1  ;;  %v2193_v50 = vadd.f32 %v2192_v6, %v6207_v34 }
 0x5ab   : > { %v2195_v49 = vadd.f32 %v2194_v7, %v6203_v32  ;;  %v2196_v44 = vpop.f32.mrb[119].mxu1 }
 0x5ac   : > { %v2197_v38 = vadd.f32 %v2196_v44, %v6207_v34 }
 0x5ad   : > { %v2245_v8 = vpack.c.bf16 %v2195_v49, %v2191_v53  ;;  %v5344_v53 = vld [vmem:[%s7215_s11 + $0x28] sm:$0xff]  }
 0x5ae   : > { %v2246_v9 = vpack.c.bf16 %v2197_v38, %v2193_v50 }
 0x5b0   : > { %v2200_v10 = vpop.f32.mrb[120].mxu1  ;;  %2617 = vmatprep.mubr.bf16.mxu0 %v2246_v9 }
 0x5b1   : > { %v2202_v11 = vpop.f32.mrb[121].mxu1  ;;  %2618 = vmatmul.mubr.bf16.gmra.mrb[148].mxu0 %v2245_v8  ;;  %v2201_v13 = vadd.f32 %v2200_v10, %v6203_v32 }
 0x5b2   : > { %v2204_v12 = vpop.f32.mrb[122].mxu1  ;;  %v2203_v19 = vadd.f32 %v2202_v11, %v6207_v34 }
 0x5b3   : > { %v2205_v14 = vadd.f32 %v2204_v12, %v6203_v32  ;;  %v2206_v15 = vpop.f32.mrb[123].mxu1  ;;  %v5345_v12 = vld [vmem:[%s7215_s11 + $0x30] sm:$0xff]  }
 0x5b4   : > { %v2207_v20 = vadd.f32 %v2206_v15, %v6207_v34 }
 0x5b5   : > { %v2247_v21 = vpack.c.bf16 %v2205_v14, %v2201_v13 }
 0x5b6   : > { %v2248_v22 = vpack.c.bf16 %v2207_v20, %v2203_v19 }
 0x5b8   : > { %v2210_v23 = vpop.f32.mrb[124].mxu1  ;;  %2627 = vmatprep.mubr.bf16.mxu0 %v2248_v22 }
 0x5b9   : > { %v2212_v24 = vpop.f32.mrb[125].mxu1  ;;  %2628 = vmatmul.mubr.bf16.gmra.mrb[152].mxu0 %v2247_v21  ;;  %v2211_v18 = vadd.f32 %v2210_v23, %v6203_v32 }
 0x5ba   : > { %v2214_v25 = vpop.f32.mrb[126].mxu1  ;;  %v2213_v26 = vadd.f32 %v2212_v24, %v6207_v34 }
 0x5bb   : > { %v2215_v1 = vadd.f32 %v2214_v25, %v6203_v32  ;;  %v2216_v17 = vpop.f32.mrb[127].mxu1  ;;  %v6317_v32 = vrot.slane %v2283_v16, %v1938_v30  ;;  %v5341_v30 = vld [vmem:[%s7215_s11 + $0x10] sm:$0xff]  }
 0x5bc   : > { %v2217_v35 = vadd.f32 %v2216_v17, %v6207_v34  ;;  %v6321_v34 = vrot.slane %v2283_v16, %v1942_v31  ;;  %5166 = vmatprep.subr.bf16.mxu0 %v5341_v30 }
 0x5bd   : > { %v2249_v27 = vpack.c.bf16 %v2215_v1, %v2211_v18  ;;  %5167 = vmatpush3.bf16.msra.mxu0 %v5341_v30 }
 0x5be   : > { %v2250_v36 = vpack.c.bf16 %v2217_v35, %v2213_v26  ;;  %5168 = vmatprep.subr.bf16.mxu0 %v5342_v58 }
 0x5c0   : > { %2637 = vmatprep.mubr.bf16.mxu0 %v2250_v36 }
 0x5c1   : > { %2638 = vmatmul.mubr.bf16.gmra.mrb[156].mxu0 %v2249_v27 }
 0x5c2   : > { %5169 = vmatpush3.bf16.msra.mxu0 %v5342_v58 }
 0x5c3   : > { %5170 = vmatprep.subr.bf16.mxu0 %v5343_v2 }
 0x5c6   : > { %5171 = vmatpush3.bf16.msra.mxu0 %v5343_v2 }
 0x5c7   : > { %5172 = vmatprep.subr.bf16.mxu0 %v5344_v53 }
 0x5ca   : > { %5173 = vmatpush3.bf16.msra.mxu0 %v5344_v53 }
 0x5cb   : > { %5174 = vmatprep.subr.bf16.mxu0 %v5345_v12 }
 0x5ce   : > { %5175 = vmatpush3.bf16.msra.mxu0 %v5345_v12 }
 0x61c   : > { %v2489_v33 = vpop.f32.mrb[96].mxu0 }
 0x61d   : > { %v2490_v39 = vadd.f32 %v2489_v33, %v6317_v32  ;;  %v2491_v40 = vpop.f32.mrb[97].mxu0 }
 0x61e   : > { %v2492_v45 = vadd.f32 %v2491_v40, %v6321_v34  ;;  %v2493_v46 = vpop.f32.mrb[98].mxu0 }
 0x61f   : > { %v2494_v41 = vadd.f32 %v2493_v46, %v6317_v32  ;;  %v2495_v51 = vpop.f32.mrb[99].mxu0  ;;  %v2648_v52 = vmax.f32 %v2490_v39, 0.0 }
 0x620   : > { %v2496_v31 = vadd.f32 %v2495_v51, %v6321_v34  ;;  %v2649_v55 = vmax.f32 %v2492_v45, 0.0 }
 0x621   : > { %v2650_v42 = vmax.f32 %v2494_v41, 0.0 }
 0x622   : > { %v2651_v56 = vmax.f32 %v2496_v31, 0.0 }
 0x623   : > { %v2712_v57 = vpack.c.bf16 %v2650_v42, %v2648_v52 }
 0x624   : > { %v2713_v59 = vpack.c.bf16 %v2651_v56, %v2649_v55  ;;  %v2499_v60 = vpop.f32.mrb[100].mxu0 }
 0x625   : > { %v2500_v61 = vadd.f32 %v2499_v60, %v6317_v32  ;;  %v2501_v62 = vpop.f32.mrb[101].mxu0 }
 0x626   : > { %v2502_v63 = vadd.f32 %v2501_v62, %v6321_v34  ;;  %v2503_v47 = vpop.f32.mrb[102].mxu0  ;;  %2911 = vmatprep.mubr.bf16.mxu1 %v2713_v59 }
 0x627   : > { %v2504_v0 = vadd.f32 %v2503_v47, %v6317_v32  ;;  %v2505_v43 = vpop.f32.mrb[103].mxu0  ;;  %2912 = vmatmul.mubr.bf16.vlgmr.msra.gmra.mrb[128].mxu1 %v2712_v57  ;;  %v2652_v3 = vmax.f32 %v2500_v61, 0.0 }
 0x628   : > { %v2506_v48 = vadd.f32 %v2505_v43, %v6321_v34  ;;  %v2653_v5 = vmax.f32 %v2502_v63, 0.0 }
 0x629   : > { %v2654_v4 = vmax.f32 %v2504_v0, 0.0 }
 0x62a   : > { %v2655_v6 = vmax.f32 %v2506_v48, 0.0 }
 0x62b   : > { %v2714_v7 = vpack.c.bf16 %v2654_v4, %v2652_v3 }
 0x62c   : > { %v2715_v49 = vpack.c.bf16 %v2655_v6, %v2653_v5  ;;  %v2509_v44 = vpop.f32.mrb[104].mxu0 }
 0x62d   : > { %v2510_v50 = vadd.f32 %v2509_v44, %v6317_v32  ;;  %v2511_v38 = vpop.f32.mrb[105].mxu0 }
 0x62e   : > { %v2512_v8 = vadd.f32 %v2511_v38, %v6321_v34  ;;  %v2513_v9 = vpop.f32.mrb[106].mxu0  ;;  %2919 = vmatprep.mubr.bf16.mxu1 %v2715_v49 }
 0x62f   : > { %v2514_v10 = vadd.f32 %v2513_v9, %v6317_v32  ;;  %v2515_v11 = vpop.f32.mrb[107].mxu0  ;;  %2920 = vmatmul.mubr.bf16.gmra.mrb[132].mxu1 %v2714_v7  ;;  %v2656_v14 = vmax.f32 %v2510_v50, 0.0 }
 0x630   : > { %v2516_v13 = vadd.f32 %v2515_v11, %v6321_v34  ;;  %v2657_v19 = vmax.f32 %v2512_v8, 0.0 }
 0x631   : > { %v2658_v15 = vmax.f32 %v2514_v10, 0.0 }
 0x632   : > { %v2659_v20 = vmax.f32 %v2516_v13, 0.0 }
 0x633   : > { %v2716_v21 = vpack.c.bf16 %v2658_v15, %v2656_v14 }
 0x634   : > { %v2717_v22 = vpack.c.bf16 %v2659_v20, %v2657_v19  ;;  %v2519_v23 = vpop.f32.mrb[108].mxu0 }
 0x635   : > { %v2520_v24 = vadd.f32 %v2519_v23, %v6317_v32  ;;  %v2521_v25 = vpop.f32.mrb[109].mxu0 }
 0x636   : > { %v2522_v18 = vadd.f32 %v2521_v25, %v6321_v34  ;;  %v2523_v1 = vpop.f32.mrb[110].mxu0  ;;  %2927 = vmatprep.mubr.bf16.mxu1 %v2717_v22 }
 0x637   : > { %v2524_v17 = vadd.f32 %v2523_v1, %v6317_v32  ;;  %v2525_v26 = vpop.f32.mrb[111].mxu0  ;;  %2928 = vmatmul.mubr.bf16.gmra.mrb[136].mxu1 %v2716_v21  ;;  %v2660_v27 = vmax.f32 %v2520_v24, 0.0 }
 0x638   : > { %v2526_v35 = vadd.f32 %v2525_v26, %v6321_v34  ;;  %v2661_v54 = vmax.f32 %v2522_v18, 0.0 }
 0x639   : > { %v2662_v36 = vmax.f32 %v2524_v17, 0.0 }
 0x63a   : > { %v2663_v16 = vmax.f32 %v2526_v35, 0.0 }
 0x63b   : > { %v2718_v33 = vpack.c.bf16 %v2662_v36, %v2660_v27 }
 0x63c   : > { %v2719_v39 = vpack.c.bf16 %v2663_v16, %v2661_v54  ;;  %v2529_v40 = vpop.f32.mrb[112].mxu0 }
 0x63d   : > { %v2530_v45 = vadd.f32 %v2529_v40, %v6317_v32  ;;  %v2531_v46 = vpop.f32.mrb[113].mxu0 }
 0x63e   : > { %v2532_v41 = vadd.f32 %v2531_v46, %v6321_v34  ;;  %v2533_v51 = vpop.f32.mrb[114].mxu0  ;;  %2935 = vmatprep.mubr.bf16.mxu1 %v2719_v39 }
 0x63f   : > { %v2534_v37 = vadd.f32 %v2533_v51, %v6317_v32  ;;  %v2535_v30 = vpop.f32.mrb[115].mxu0  ;;  %2936 = vmatmul.mubr.bf16.gmra.mrb[140].mxu1 %v2718_v33  ;;  %v2664_v52 = vmax.f32 %v2530_v45, 0.0 }
 0x640   : > { %v2536_v31 = vadd.f32 %v2535_v30, %v6321_v34  ;;  %v2665_v55 = vmax.f32 %v2532_v41, 0.0 }
 0x641   : > { %v2666_v42 = vmax.f32 %v2534_v37, 0.0 }
 0x642   : > { %v2667_v56 = vmax.f32 %v2536_v31, 0.0 }
 0x643   : > { %v2720_v57 = vpack.c.bf16 %v2666_v42, %v2664_v52 }
 0x644   : > { %v2721_v58 = vpack.c.bf16 %v2667_v56, %v2665_v55  ;;  %v2539_v59 = vpop.f32.mrb[116].mxu0 }
 0x645   : > { %v2540_v60 = vadd.f32 %v2539_v59, %v6317_v32  ;;  %v2541_v61 = vpop.f32.mrb[117].mxu0 }
 0x646   : > { %v2542_v62 = vadd.f32 %v2541_v61, %v6321_v34  ;;  %v2543_v63 = vpop.f32.mrb[118].mxu0  ;;  %2943 = vmatprep.mubr.bf16.mxu1 %v2721_v58 }
 0x647   : > { %v2544_v47 = vadd.f32 %v2543_v63, %v6317_v32  ;;  %v2545_v0 = vpop.f32.mrb[119].mxu0  ;;  %2944 = vmatmul.mubr.bf16.gmra.mrb[144].mxu1 %v2720_v57  ;;  %v2668_v2 = vmax.f32 %v2540_v60, 0.0 }
 0x648   : > { %v2546_v43 = vadd.f32 %v2545_v0, %v6321_v34  ;;  %v2669_v3 = vmax.f32 %v2542_v62, 0.0 }
 0x649   : > { %v2670_v48 = vmax.f32 %v2544_v47, 0.0 }
 0x64a   : > { %v2671_v4 = vmax.f32 %v2546_v43, 0.0 }
 0x64b   : > { %v2722_v5 = vpack.c.bf16 %v2670_v48, %v2668_v2 }
 0x64c   : > { %v2723_v6 = vpack.c.bf16 %v2671_v4, %v2669_v3  ;;  %v2549_v7 = vpop.f32.mrb[120].mxu0 }
 0x64d   : > { %v2550_v53 = vadd.f32 %v2549_v7, %v6317_v32  ;;  %v2551_v49 = vpop.f32.mrb[121].mxu0 }
 0x64e   : > { %v2552_v44 = vadd.f32 %v2551_v49, %v6321_v34  ;;  %v2553_v50 = vpop.f32.mrb[122].mxu0  ;;  %2951 = vmatprep.mubr.bf16.mxu1 %v2723_v6 }
 0x64f   : > { %v2554_v38 = vadd.f32 %v2553_v50, %v6317_v32  ;;  %v2555_v8 = vpop.f32.mrb[123].mxu0  ;;  %2952 = vmatmul.mubr.bf16.gmra.mrb[148].mxu1 %v2722_v5  ;;  %v2672_v10 = vmax.f32 %v2550_v53, 0.0 }
 0x650   : > { %v2556_v9 = vadd.f32 %v2555_v8, %v6321_v34  ;;  %v2673_v12 = vmax.f32 %v2552_v44, 0.0 }
 0x651   : > { %v2674_v11 = vmax.f32 %v2554_v38, 0.0 }
 0x652   : > { %v2675_v13 = vmax.f32 %v2556_v9, 0.0 }
 0x653   : > { %v2724_v14 = vpack.c.bf16 %v2674_v11, %v2672_v10 }
 0x654   : > { %v2725_v15 = vpack.c.bf16 %v2675_v13, %v2673_v12  ;;  %v2559_v19 = vpop.f32.mrb[124].mxu0 }
 0x655   : > { %v2560_v20 = vadd.f32 %v2559_v19, %v6317_v32  ;;  %v2561_v21 = vpop.f32.mrb[125].mxu0 }
 0x656   : > { %v2562_v22 = vadd.f32 %v2561_v21, %v6321_v34  ;;  %v2563_v23 = vpop.f32.mrb[126].mxu0  ;;  %2959 = vmatprep.mubr.bf16.mxu1 %v2725_v15 }
 0x657   : > { %v2564_v24 = vadd.f32 %v2563_v23, %v6317_v32  ;;  %v2565_v25 = vpop.f32.mrb[127].mxu0  ;;  %2960 = vmatmul.mubr.bf16.gmra.mrb[152].mxu1 %v2724_v14  ;;  %v2676_v1 = vmax.f32 %v2560_v20, 0.0 }
 0x658   : > { %v2566_v18 = vadd.f32 %v2565_v25, %v6321_v34  ;;  %v2677_v26 = vmax.f32 %v2562_v22, 0.0 }
 0x659   : > { %v2678_v17 = vmax.f32 %v2564_v24, 0.0 }
 0x65a   : > { %v2679_v35 = vmax.f32 %v2566_v18, 0.0 }
 0x65b   : > { %v2726_v27 = vpack.c.bf16 %v2678_v17, %v2676_v1 }
 0x65c   : > { %v2727_v36 = vpack.c.bf16 %v2679_v35, %v2677_v26  ;;  %v2569_v54 = vpop.f32.mrb[128].mxu0 }
 0x65d   : > { %v2570_v16 = vadd.f32 %v2569_v54, %v6317_v32  ;;  %v2571_v33 = vpop.f32.mrb[129].mxu0 }
 0x65e   : > { %v2572_v39 = vadd.f32 %v2571_v33, %v6321_v34  ;;  %v2573_v40 = vpop.f32.mrb[130].mxu0  ;;  %2967 = vmatprep.mubr.bf16.mxu1 %v2727_v36 }
 0x65f   : > { %v2574_v45 = vadd.f32 %v2573_v40, %v6317_v32  ;;  %v2575_v46 = vpop.f32.mrb[131].mxu0  ;;  %2968 = vmatmul.mubr.bf16.gmra.mrb[156].mxu1 %v2726_v27  ;;  %v2680_v51 = vmax.f32 %v2570_v16, 0.0 }
 0x660   : > { %v2576_v41 = vadd.f32 %v2575_v46, %v6321_v34  ;;  %v2681_v30 = vmax.f32 %v2572_v39, 0.0 }
 0x661   : > { %v2682_v37 = vmax.f32 %v2574_v45, 0.0 }
 0x662   : > { %v2683_v31 = vmax.f32 %v2576_v41, 0.0 }
 0x663   : > { %v2728_v52 = vpack.c.bf16 %v2682_v37, %v2680_v51  ;;  %v5346_v51 = vld [vmem:[%s7215_s11 + $0x38] sm:$0xff]  }
 0x664   : > { %v2729_v42 = vpack.c.bf16 %v2683_v31, %v2681_v30  ;;  %v2579_v55 = vpop.f32.mrb[132].mxu0  ;;  %5176 = vmatprep.subr.bf16.mxu0 %v5346_v51 }
 0x665   : > { %v2580_v56 = vadd.f32 %v2579_v55, %v6317_v32  ;;  %v2581_v57 = vpop.f32.mrb[133].mxu0  ;;  %5177 = vmatpush3.bf16.msra.mxu0 %v5346_v51  ;;  %v3811_v51 = vld [vmem:[%s6413_s28 + $0x58] sm:$0xff] }
 0x666   : > { %v2582_v58 = vadd.f32 %v2581_v57, %v6321_v34  ;;  %v2583_v59 = vpop.f32.mrb[134].mxu0  ;;  %2975 = vmatprep.mubr.bf16.mxu1 %v2729_v42 }
 0x667   : > { %v2584_v60 = vadd.f32 %v2583_v59, %v6317_v32  ;;  %v2585_v61 = vpop.f32.mrb[135].mxu0  ;;  %2976 = vmatmul.mubr.bf16.gmra.mrb[160].mxu1 %v2728_v52  ;;  %v2684_v63 = vmax.f32 %v2580_v56, 0.0 }
 0x668   : > { %v2586_v62 = vadd.f32 %v2585_v61, %v6321_v34  ;;  %v2685_v0 = vmax.f32 %v2582_v58, 0.0 }
 0x669   : > { %v2686_v47 = vmax.f32 %v2584_v60, 0.0 }
 0x66a   : > { %v2687_v43 = vmax.f32 %v2586_v62, 0.0 }
 0x66b   : > { %v2730_v2 = vpack.c.bf16 %v2686_v47, %v2684_v63 }
 0x66c   : > { %v2731_v48 = vpack.c.bf16 %v2687_v43, %v2685_v0  ;;  %v2589_v3 = vpop.f32.mrb[136].mxu0 }
 0x66d   : > { %v2590_v4 = vadd.f32 %v2589_v3, %v6317_v32  ;;  %v2591_v5 = vpop.f32.mrb[137].mxu0 }
 0x66e   : > { %v2592_v6 = vadd.f32 %v2591_v5, %v6321_v34  ;;  %v2593_v7 = vpop.f32.mrb[138].mxu0  ;;  %2983 = vmatprep.mubr.bf16.mxu1 %v2731_v48 }
 0x66f   : > { %v2594_v53 = vadd.f32 %v2593_v7, %v6317_v32  ;;  %v2595_v49 = vpop.f32.mrb[139].mxu0  ;;  %2984 = vmatmul.mubr.bf16.gmra.mrb[164].mxu1 %v2730_v2  ;;  %v2688_v50 = vmax.f32 %v2590_v4, 0.0 }
 0x670   : > { %v2596_v44 = vadd.f32 %v2595_v49, %v6321_v34  ;;  %v2689_v8 = vmax.f32 %v2592_v6, 0.0 }
 0x671   : > { %v2690_v38 = vmax.f32 %v2594_v53, 0.0 }
 0x672   : > { %v2691_v9 = vmax.f32 %v2596_v44, 0.0 }
 0x673   : > { %v2732_v10 = vpack.c.bf16 %v2690_v38, %v2688_v50 }
 0x674   : > { %v2733_v11 = vpack.c.bf16 %v2691_v9, %v2689_v8  ;;  %v2599_v12 = vpop.f32.mrb[140].mxu0 }
 0x675   : > { %v2600_v13 = vadd.f32 %v2599_v12, %v6317_v32  ;;  %v2601_v14 = vpop.f32.mrb[141].mxu0 }
 0x676   : > { %v2602_v15 = vadd.f32 %v2601_v14, %v6321_v34  ;;  %v2603_v19 = vpop.f32.mrb[142].mxu0  ;;  %2991 = vmatprep.mubr.bf16.mxu1 %v2733_v11 }
 0x677   : > { %v2604_v20 = vadd.f32 %v2603_v19, %v6317_v32  ;;  %v2605_v21 = vpop.f32.mrb[143].mxu0  ;;  %2992 = vmatmul.mubr.bf16.gmra.mrb[168].mxu1 %v2732_v10  ;;  %v2692_v23 = vmax.f32 %v2600_v13, 0.0 }
 0x678   : > { %v2606_v22 = vadd.f32 %v2605_v21, %v6321_v34  ;;  %v2693_v25 = vmax.f32 %v2602_v15, 0.0 }
 0x679   : > { %v2694_v24 = vmax.f32 %v2604_v20, 0.0 }
 0x67a   : > { %v2695_v18 = vmax.f32 %v2606_v22, 0.0 }
 0x67b   : > { %v2734_v1 = vpack.c.bf16 %v2694_v24, %v2692_v23 }
 0x67c   : > { %v2735_v17 = vpack.c.bf16 %v2695_v18, %v2693_v25  ;;  %v2609_v26 = vpop.f32.mrb[144].mxu0  ;;  %v3804_v18 = vld [vmem:[%s6413_s28 + $0x20] sm:$0xff] }
 0x67d   : > { %v2610_v35 = vadd.f32 %v2609_v26, %v6317_v32  ;;  %v2611_v27 = vpop.f32.mrb[145].mxu0  ;;  %v3810_v26 = vld [vmem:[%s6413_s28 + $0x50] sm:$0xff] }
 0x67e   : > { %v2612_v36 = vadd.f32 %v2611_v27, %v6321_v34  ;;  %v2613_v54 = vpop.f32.mrb[146].mxu0  ;;  %2999 = vmatprep.mubr.bf16.mxu1 %v2735_v17  ;;  %v3808_v17 = vld [vmem:[%s6413_s28 + $0x40] sm:$0xff] }
 0x67f   : > { %v2614_v16 = vadd.f32 %v2613_v54, %v6317_v32  ;;  %v2615_v33 = vpop.f32.mrb[147].mxu0  ;;  %3000 = vmatmul.mubr.bf16.gmra.mrb[172].mxu1 %v2734_v1  ;;  %v2696_v40 = vmax.f32 %v2610_v35, 0.0  ;;  %v3806_v1 = vld [vmem:[%s6413_s28 + $0x30] sm:$0xff]  ;;  %v3812_v35 = vld [vmem:[%s6413_s28 + $0x60] sm:$0xff]  ;;  %v3803_v54 = vld [vmem:[%s6413_s28 + $0x18] sm:$0xff] }
 0x680   : > { %v2616_v39 = vadd.f32 %v2615_v33, %v6321_v34  ;;  %v2697_v46 = vmax.f32 %v2612_v36, 0.0  ;;  %v3800_v27 = vld [vmem:[%s6413_s28] sm:$0xff]  ;;  %v3814_v36 = vld [vmem:[%s6413_s28 + $0x70] sm:$0xff]  ;;  %v3805_v33 = vld [vmem:[%s6413_s28 + $0x28] sm:$0xff] }
 0x681   : > { %v2698_v45 = vmax.f32 %v2614_v16, 0.0  ;;  %3835 = vperm.xlu1 %5223, %v3800_v27   ;;  %v3815_v16 = vld [vmem:[%s6413_s28 + $0x78] sm:$0xff] }
 0x682   : > { %v2699_v41 = vmax.f32 %v2616_v39, 0.0  ;;  %v3817_v39 = vld [vmem:[%s6413_s28 + $0x88] sm:$0xff] }
 0x683   : > { %v2736_v37 = vpack.c.bf16 %v2698_v45, %v2696_v40  ;;  %v3807_v40 = vld [vmem:[%s6413_s28 + $0x38] sm:$0xff]  ;;  %v3818_v45 = vld [vmem:[%s6413_s28 + $0x90] sm:$0xff] }
 0x684   : > { %v2737_v30 = vpack.c.bf16 %v2699_v41, %v2697_v46  ;;  %v2619_v31 = vpop.f32.mrb[148].mxu0  ;;  %v3809_v46 = vld [vmem:[%s6413_s28 + $0x48] sm:$0xff]  ;;  %v3819_v41 = vld [vmem:[%s6413_s28 + $0x98] sm:$0xff] }
 0x685   : > { %v2620_v52 = vadd.f32 %v2619_v31, %v6317_v32  ;;  %v2621_v42 = vpop.f32.mrb[149].mxu0  ;;  %3844 = vperm.xlu1 %5223, %v3803_v54   ;;  %v3822_v31 = vld [vmem:[%s6413_s28 + $0xb0] sm:$0xff] }
 0x686   : > { %v2622_v55 = vadd.f32 %v2621_v42, %v6321_v34  ;;  %v2623_v56 = vpop.f32.mrb[150].mxu0  ;;  %3007 = vmatprep.mubr.bf16.mxu1 %v2737_v30  ;;  %v3813_v30 = vld [vmem:[%s6413_s28 + $0x68] sm:$0xff]  ;;  %v3824_v42 = vld [vmem:[%s6413_s28 + $0xc0] sm:$0xff] }
 0x687   : > { %v2624_v57 = vadd.f32 %v2623_v56, %v6317_v32  ;;  %v2625_v58 = vpop.f32.mrb[151].mxu0  ;;  %3008 = vmatmul.mubr.bf16.gmra.mrb[176].mxu1 %v2736_v37  ;;  %v2700_v60 = vmax.f32 %v2620_v52, 0.0  ;;  %v3820_v37 = vld [vmem:[%s6413_s28 + $0xa0] sm:$0xff]  ;;  %v3826_v56 = vld [vmem:[%s6413_s28 + $0xd0] sm:$0xff] }
 0x688   : > { %v2626_v59 = vadd.f32 %v2625_v58, %v6321_v34  ;;  %v2701_v62 = vmax.f32 %v2622_v55, 0.0  ;;  %v3816_v52 = vld [vmem:[%s6413_s28 + $0x80] sm:$0xff]  ;;  %v3821_v55 = vld [vmem:[%s6413_s28 + $0xa8] sm:$0xff]  ;;  %v3827_v58 = vld [vmem:[%s6413_s28 + $0xd8] sm:$0xff] }
 0x689   : > { %v2702_v61 = vmax.f32 %v2624_v57, 0.0  ;;  %3850 = vperm.xlu1 %5223, %v3805_v33   ;;  %v3823_v57 = vld [vmem:[%s6413_s28 + $0xb8] sm:$0xff] }
 0x68a   : > { %v2703_v63 = vmax.f32 %v2626_v59, 0.0  ;;  %v3825_v59 = vld [vmem:[%s6413_s28 + $0xc8] sm:$0xff] }
 0x68b   : > { %v2738_v47 = vpack.c.bf16 %v2702_v61, %v2700_v60  ;;  %v3830_v60 = vld [vmem:[%s6413_s28 + $0xf0] sm:$0xff]  ;;  %v3828_v61 = vld [vmem:[%s6413_s28 + $0xe0] sm:$0xff] }
 0x68c   : > { %v2739_v0 = vpack.c.bf16 %v2703_v63, %v2701_v62  ;;  %v2629_v43 = vpop.f32.mrb[152].mxu0  ;;  %v3829_v62 = vld [vmem:[%s6413_s28 + $0xe8] sm:$0xff]  ;;  %v3831_v63 = vld [vmem:[%s6413_s28 + $0xf8] sm:$0xff] }
 0x68d   : > { %v2630_v2 = vadd.f32 %v2629_v43, %v6317_v32  ;;  %v2631_v48 = vpop.f32.mrb[153].mxu0  ;;  %3856 = vperm.xlu1 %5223, %v3807_v40  }
 0x68e   : > { %v2632_v3 = vadd.f32 %v2631_v48, %v6321_v34  ;;  %v2633_v4 = vpop.f32.mrb[154].mxu0  ;;  %3015 = vmatprep.mubr.bf16.mxu1 %v2739_v0  ;;  %v6450_v0 = vld [vmem:[%s7216_s12 + $0x9] ss:$0 sm:$0xff] }
 0x68f   : > { %v2634_v5 = vadd.f32 %v2633_v4, %v6317_v32  ;;  %v2635_v6 = vpop.f32.mrb[155].mxu0  ;;  %3016 = vmatmul.mubr.bf16.gmra.mrb[180].mxu1 %v2738_v47  ;;  %v2704_v53 = vmax.f32 %v2630_v2, 0.0 }
 0x690   : > { %v2636_v7 = vadd.f32 %v2635_v6, %v6321_v34  ;;  %v2705_v44 = vmax.f32 %v2632_v3, 0.0 }
 0x691   : > { %v2706_v49 = vmax.f32 %v2634_v5, 0.0  ;;  %3862 = vperm.xlu1 %5223, %v3809_v46  }
 0x692   : > { %v2707_v50 = vmax.f32 %v2636_v7, 0.0 }
 0x693   : > { %v2740_v38 = vpack.c.bf16 %v2706_v49, %v2704_v53 }
 0x694   : > { %v2741_v8 = vpack.c.bf16 %v2707_v50, %v2705_v44  ;;  %v2639_v9 = vpop.f32.mrb[156].mxu0 }
 0x695   : > { %v2640_v10 = vadd.f32 %v2639_v9, %v6317_v32  ;;  %v2641_v11 = vpop.f32.mrb[157].mxu0  ;;  %3868 = vperm.xlu1 %5223, %v3811_v51  }
 0x696   : > { %v2642_v12 = vadd.f32 %v2641_v11, %v6321_v34  ;;  %v2643_v13 = vpop.f32.mrb[158].mxu0  ;;  %3023 = vmatprep.mubr.bf16.mxu1 %v2741_v8 }
 0x697   : > { %v2644_v14 = vadd.f32 %v2643_v13, %v6317_v32  ;;  %v2645_v15 = vpop.f32.mrb[159].mxu0  ;;  %3024 = vmatmul.mubr.bf16.gmra.mrb[184].mxu1 %v2740_v38  ;;  %v2708_v20 = vmax.f32 %v2640_v10, 0.0  ;;  %v3801_v32 = vld [vmem:[%s6413_s28 + $0x8] sm:$0xff] }
 0x698   : > { %v2646_v19 = vadd.f32 %v2645_v15, %v6321_v34  ;;  %v2709_v22 = vmax.f32 %v2642_v12, 0.0  ;;  %3838 = vperm.xlu0 %5224, %v3801_v32   ;;  %v3802_v34 = vld [vmem:[%s6413_s28 + $0x10] sm:$0xff] }
 0x699   : > { %v2710_v21 = vmax.f32 %v2644_v14, 0.0  ;;  %3874 = vperm.xlu1 %5223, %v3813_v30  }
 0x69a   : > { %v2711_v23 = vmax.f32 %v2646_v19, 0.0 }
 0x69b   : > { %v2742_v24 = vpack.c.bf16 %v2710_v21, %v2708_v20 }
 0x69c   : > { %v2743_v25 = vpack.c.bf16 %v2711_v23, %v2709_v22  ;;  %3841 = vperm.xlu0 %5224, %v3802_v34  }
 0x69d   : > { %3883 = vperm.xlu1 %5223, %v3816_v52  }
 0x69e   : > { %3031 = vmatprep.mubr.bf16.mxu1 %v2743_v25 }
 0x69f   : > { %3032 = vmatmul.mubr.bf16.gmra.mrb[188].mxu1 %v2742_v24 }
 0x6a0   : > { %3847 = vperm.xlu0 %5224, %v3804_v18  }
 0x6a1   : > { %3898 = vperm.xlu1 %5223, %v3821_v55  }
 0x6a4   : > { %3853 = vperm.xlu0 %5224, %v3806_v1  }
 0x6a5   : > { %3904 = vperm.xlu1 %5223, %v3823_v57  }
 0x6a8   : > { %3859 = vperm.xlu0 %5224, %v3808_v17  }
 0x6a9   : > { %3910 = vperm.xlu1 %5223, %v3825_v59  }
 0x6ac   : > { %3865 = vperm.xlu0 %5224, %v3810_v26  }
 0x6ad   : > { %3919 = vperm.xlu1 %5223, %v3828_v61  }
 0x6b0   : > { %3871 = vperm.xlu0 %5224, %v3812_v35  }
 0x6b1   : > { %3922 = vperm.xlu1 %5223, %v3829_v62  }
 0x6b4   : > { %3877 = vperm.xlu0 %5224, %v3814_v36  }
 0x6b5   : > { %3928 = vperm.xlu1 %5223, %v3831_v63  }
 0x6b8   : > { %3880 = vperm.xlu0 %5224, %v3815_v16  }
 0x6bc   : > { %3886 = vperm.xlu0 %5224, %v3817_v39  }
 0x6c0   : > { %3889 = vperm.xlu0 %5224, %v3818_v45  }
 0x6c4   : > { %3892 = vperm.xlu0 %5224, %v3819_v41  }
 0x6c8   : > { %3895 = vperm.xlu0 %5224, %v3820_v37  }
 0x6cc   : > { %3901 = vperm.xlu0 %5224, %v3822_v31  }
 0x6d0   : > { %3907 = vperm.xlu0 %5224, %v3824_v42  }
 0x6d4   : > { %3913 = vperm.xlu0 %5224, %v3826_v56  }
 0x6d8   : > { %3916 = vperm.xlu0 %5224, %v3827_v58  }
 0x6dc   : > { %3925 = vperm.xlu0 %5224, %v3830_v60  }
 0x6fa   : > { %v4830_v47 = vpop.f32.mrb[128].mxu1 }
 0x6fb   : > { %v4831_v43 = vpop.f32.mrb[129].mxu1 }
 0x6fc   : > { %v4832_v2 = vadd.f32 %v4831_v43, %v4830_v47  ;;  %v4833_v48 = vpop.f32.mrb[130].mxu1 }
 0x6fd   : > { %v4834_v3 = vpop.f32.mrb[131].mxu1 }
 0x6fe   : > { %v2914_v4 = vadd.f32 %v4832_v2, %v6450_v0  ;;  %v4835_v5 = vadd.f32 %v4834_v3, %v4833_v48 }
 0x700   : > { %v2917_v6 = vadd.f32 %v4835_v5, %v6450_v0  ;;  %v3040_v7 = vmax.f32 %v2914_v4, 0.0 }
 0x702   : > { %v3041_v53 = vmax.f32 %v2917_v6, 0.0  ;;  %v4836_v49 = vpop.f32.mrb[132].mxu1 }
 0x703   : > { %v4837_v44 = vpop.f32.mrb[133].mxu1 }
 0x704   : > { %v4838_v50 = vadd.f32 %v4837_v44, %v4836_v49  ;;  %v4839_v38 = vpop.f32.mrb[134].mxu1  ;;  %v3072_v8 = vpack.c.bf16 %v3041_v53, %v3040_v7 }
 0x705   : > { %v4840_v9 = vpop.f32.mrb[135].mxu1 }
 0x706   : > { %v2922_v10 = vadd.f32 %v4838_v50, %v6450_v0  ;;  %v4841_v11 = vadd.f32 %v4840_v9, %v4839_v38  ;;  %5178 = vmatprep.mubr.bf16.mxu0 %v3072_v8 }
 0x708   : > { %v2925_v12 = vadd.f32 %v4841_v11, %v6450_v0  ;;  %v3042_v13 = vmax.f32 %v2922_v10, 0.0 }
 0x70a   : > { %v3043_v14 = vmax.f32 %v2925_v12, 0.0  ;;  %v4842_v15 = vpop.f32.mrb[136].mxu1 }
 0x70b   : > { %v4843_v19 = vpop.f32.mrb[137].mxu1 }
 0x70c   : > { %v3073_v20 = vpack.c.bf16 %v3043_v14, %v3042_v13  ;;  %v4844_v21 = vadd.f32 %v4843_v19, %v4842_v15  ;;  %v4845_v22 = vpop.f32.mrb[138].mxu1 }
 0x70d   : > { %v4846_v23 = vpop.f32.mrb[139].mxu1 }
 0x70e   : > { %v2930_v24 = vadd.f32 %v4844_v21, %v6450_v0  ;;  %v4847_v25 = vadd.f32 %v4846_v23, %v4845_v22  ;;  %5179 = vmatmul.mubr.bf16.vlgmr.msra.gmra.mrb[160].mxu0 %v3073_v20 }
 0x710   : > { %v2933_v32 = vadd.f32 %v4847_v25, %v6450_v0  ;;  %v3044_v34 = vmax.f32 %v2930_v24, 0.0 }
 0x712   : > { %v3045_v18 = vmax.f32 %v2933_v32, 0.0  ;;  %v4848_v1 = vpop.f32.mrb[140].mxu1 }
 0x713   : > { %v4849_v17 = vpop.f32.mrb[141].mxu1 }
 0x714   : > { %v4850_v26 = vadd.f32 %v4849_v17, %v4848_v1  ;;  %v4851_v35 = vpop.f32.mrb[142].mxu1  ;;  %v3074_v27 = vpack.c.bf16 %v3045_v18, %v3044_v34 }
 0x715   : > { %v4852_v36 = vpop.f32.mrb[143].mxu1 }
 0x716   : > { %v2938_v54 = vadd.f32 %v4850_v26, %v6450_v0  ;;  %v4853_v16 = vadd.f32 %v4852_v36, %v4851_v35  ;;  %5182 = vmatprep.mubr.bf16.mxu0 %v3074_v27 }
 0x718   : > { %v2941_v33 = vadd.f32 %v4853_v16, %v6450_v0  ;;  %v3046_v39 = vmax.f32 %v2938_v54, 0.0 }
 0x71a   : > { %v3047_v40 = vmax.f32 %v2941_v33, 0.0  ;;  %v4854_v45 = vpop.f32.mrb[144].mxu1 }
 0x71b   : > { %v4855_v46 = vpop.f32.mrb[145].mxu1 }
 0x71c   : > { %v4856_v41 = vadd.f32 %v4855_v46, %v4854_v45  ;;  %v4857_v51 = vpop.f32.mrb[146].mxu1  ;;  %v3075_v37 = vpack.c.bf16 %v3047_v40, %v3046_v39 }
 0x71d   : > { %v4858_v30 = vpop.f32.mrb[147].mxu1 }
 0x71e   : > { %v2946_v31 = vadd.f32 %v4856_v41, %v6450_v0  ;;  %v4859_v52 = vadd.f32 %v4858_v30, %v4857_v51  ;;  %5183 = vmatmul.mubr.bf16.gmra.mrb[164].mxu0 %v3075_v37 }
 0x720   : > { %v2949_v42 = vadd.f32 %v4859_v52, %v6450_v0  ;;  %v3048_v55 = vmax.f32 %v2946_v31, 0.0 }
 0x722   : > { %v3049_v56 = vmax.f32 %v2949_v42, 0.0  ;;  %v4860_v57 = vpop.f32.mrb[148].mxu1 }
 0x723   : > { %v4861_v58 = vpop.f32.mrb[149].mxu1 }
 0x724   : > { %v4862_v59 = vadd.f32 %v4861_v58, %v4860_v57  ;;  %v4863_v60 = vpop.f32.mrb[150].mxu1  ;;  %v3076_v61 = vpack.c.bf16 %v3049_v56, %v3048_v55 }
 0x725   : > { %v4864_v62 = vpop.f32.mrb[151].mxu1 }
 0x726   : > { %v2954_v63 = vadd.f32 %v4862_v59, %v6450_v0  ;;  %v4865_v47 = vadd.f32 %v4864_v62, %v4863_v60  ;;  %5186 = vmatprep.mubr.bf16.mxu0 %v3076_v61 }
 0x728   : > { %v2957_v43 = vadd.f32 %v4865_v47, %v6450_v0  ;;  %v3050_v2 = vmax.f32 %v2954_v63, 0.0 }
 0x72a   : > { %v3051_v48 = vmax.f32 %v2957_v43, 0.0  ;;  %v4866_v3 = vpop.f32.mrb[152].mxu1 }
 0x72b   : > { %v4867_v4 = vpop.f32.mrb[153].mxu1 }
 0x72c   : > { %v4868_v5 = vadd.f32 %v4867_v4, %v4866_v3  ;;  %v4869_v6 = vpop.f32.mrb[154].mxu1  ;;  %v3077_v7 = vpack.c.bf16 %v3051_v48, %v3050_v2 }
 0x72d   : > { %v4870_v53 = vpop.f32.mrb[155].mxu1 }
 0x72e   : > { %v2962_v49 = vadd.f32 %v4868_v5, %v6450_v0  ;;  %v4871_v44 = vadd.f32 %v4870_v53, %v4869_v6  ;;  %5187 = vmatmul.mubr.bf16.gmra.mrb[168].mxu0 %v3077_v7 }
 0x730   : > { %v2965_v50 = vadd.f32 %v4871_v44, %v6450_v0  ;;  %v3052_v38 = vmax.f32 %v2962_v49, 0.0 }
 0x732   : > { %v3053_v8 = vmax.f32 %v2965_v50, 0.0  ;;  %v4872_v9 = vpop.f32.mrb[156].mxu1 }
 0x733   : > { %v4873_v10 = vpop.f32.mrb[157].mxu1 }
 0x734   : > { %v4874_v11 = vadd.f32 %v4873_v10, %v4872_v9  ;;  %v4875_v12 = vpop.f32.mrb[158].mxu1  ;;  %v3078_v13 = vpack.c.bf16 %v3053_v8, %v3052_v38 }
 0x735   : > { %v4876_v14 = vpop.f32.mrb[159].mxu1 }
 0x736   : > { %v2970_v15 = vadd.f32 %v4874_v11, %v6450_v0  ;;  %v4877_v19 = vadd.f32 %v4876_v14, %v4875_v12  ;;  %5190 = vmatprep.mubr.bf16.mxu0 %v3078_v13 }
 0x738   : > { %v2973_v20 = vadd.f32 %v4877_v19, %v6450_v0  ;;  %v3054_v21 = vmax.f32 %v2970_v15, 0.0 }
 0x73a   : > { %v3055_v22 = vmax.f32 %v2973_v20, 0.0  ;;  %v4878_v23 = vpop.f32.mrb[160].mxu1 }
 0x73b   : > { %v4879_v24 = vpop.f32.mrb[161].mxu1 }
 0x73c   : > { %v4880_v25 = vadd.f32 %v4879_v24, %v4878_v23  ;;  %v4881_v32 = vpop.f32.mrb[162].mxu1  ;;  %v3079_v34 = vpack.c.bf16 %v3055_v22, %v3054_v21 }
 0x73d   : > { %v4882_v18 = vpop.f32.mrb[163].mxu1 }
 0x73e   : > { %v2978_v1 = vadd.f32 %v4880_v25, %v6450_v0  ;;  %v4883_v17 = vadd.f32 %v4882_v18, %v4881_v32  ;;  %5191 = vmatmul.mubr.bf16.gmra.mrb[172].mxu0 %v3079_v34 }
 0x740   : > { %v2981_v26 = vadd.f32 %v4883_v17, %v6450_v0  ;;  %v3056_v35 = vmax.f32 %v2978_v1, 0.0 }
 0x742   : > { %v3057_v27 = vmax.f32 %v2981_v26, 0.0  ;;  %v4884_v36 = vpop.f32.mrb[164].mxu1 }
 0x743   : > { %v4885_v54 = vpop.f32.mrb[165].mxu1 }
 0x744   : > { %v4886_v16 = vadd.f32 %v4885_v54, %v4884_v36  ;;  %v4887_v33 = vpop.f32.mrb[166].mxu1  ;;  %v3080_v39 = vpack.c.bf16 %v3057_v27, %v3056_v35 }
 0x745   : > { %v4888_v40 = vpop.f32.mrb[167].mxu1 }
 0x746   : > { %v2986_v45 = vadd.f32 %v4886_v16, %v6450_v0  ;;  %v4889_v46 = vadd.f32 %v4888_v40, %v4887_v33  ;;  %5194 = vmatprep.mubr.bf16.mxu0 %v3080_v39 }
 0x748   : > { %v2989_v41 = vadd.f32 %v4889_v46, %v6450_v0  ;;  %v3058_v51 = vmax.f32 %v2986_v45, 0.0 }
 0x74a   : > { %v3059_v37 = vmax.f32 %v2989_v41, 0.0  ;;  %v4890_v30 = vpop.f32.mrb[168].mxu1 }
 0x74b   : > { %v4891_v31 = vpop.f32.mrb[169].mxu1 }
 0x74c   : > { %v4892_v52 = vadd.f32 %v4891_v31, %v4890_v30  ;;  %v4893_v42 = vpop.f32.mrb[170].mxu1  ;;  %v3081_v55 = vpack.c.bf16 %v3059_v37, %v3058_v51 }
 0x74d   : > { %v4894_v56 = vpop.f32.mrb[171].mxu1 }
 0x74e   : > { %v2994_v57 = vadd.f32 %v4892_v52, %v6450_v0  ;;  %v4895_v58 = vadd.f32 %v4894_v56, %v4893_v42  ;;  %5195 = vmatmul.mubr.bf16.gmra.mrb[176].mxu0 %v3081_v55 }
 0x750   : > { %v2997_v59 = vadd.f32 %v4895_v58, %v6450_v0  ;;  %v3060_v60 = vmax.f32 %v2994_v57, 0.0  ;;  %v3839_v57 = vpop.permute.xlu0 %3838  ;;  %v6487_v58 = vld [vmem:[%s7216_s12 + $0xa] ss:$0 sm:$0xff] }
 0x752   : > { %v3061_v61 = vmax.f32 %v2997_v59, 0.0  ;;  %v4896_v62 = vpop.f32.mrb[172].mxu1  ;;  %v6490_v59 = vand.u32 127, %v1936_v28 }
 0x753   : > { %v4897_v63 = vpop.f32.mrb[173].mxu1 }
 0x754   : > { %v4898_v47 = vadd.f32 %v4897_v63, %v4896_v62  ;;  %v4899_v43 = vpop.f32.mrb[174].mxu1  ;;  %v3082_v2 = vpack.c.bf16 %v3061_v61, %v3060_v60  ;;  %vm3931_vm5 = vcmp.eq.s32.totalorder %v6490_v59, %v3839_v57 }
 0x755   : > { %v4900_v48 = vpop.f32.mrb[175].mxu1 }
 0x756   : > { %v3002_v3 = vadd.f32 %v4898_v47, %v6450_v0  ;;  %v4901_v4 = vadd.f32 %v4900_v48, %v4899_v43  ;;  %5198 = vmatprep.mubr.bf16.mxu0 %v3082_v2  ;;  %v3836_v43 = vpop.permute.xlu1 %3835 }
 0x757   : > { %vm3930_vm3 = vcmp.eq.s32.totalorder %v6490_v59, %v3836_v43 }
 0x758   : > { %v3005_v5 = vadd.f32 %v4901_v4, %v6450_v0  ;;  %v3062_v6 = vmax.f32 %v3002_v3, 0.0 }
 0x75a   : > { %v3063_v7 = vmax.f32 %v3005_v5, 0.0  ;;  %v4902_v53 = vpop.f32.mrb[176].mxu1 }
 0x75b   : > { %v4903_v49 = vpop.f32.mrb[177].mxu1 }
 0x75c   : > { %v4904_v44 = vadd.f32 %v4903_v49, %v4902_v53  ;;  %v4905_v50 = vpop.f32.mrb[178].mxu1  ;;  %v3083_v38 = vpack.c.bf16 %v3063_v7, %v3062_v6  ;;  %v3845_v7 = vpop.permute.xlu1 %3844 }
 0x75d   : > { %v4906_v8 = vpop.f32.mrb[179].mxu1  ;;  %vm3933_vm4 = vcmp.eq.s32.totalorder %v6490_v59, %v3845_v7 }
 0x75e   : > { %v3010_v9 = vadd.f32 %v4904_v44, %v6450_v0  ;;  %v4907_v10 = vadd.f32 %v4906_v8, %v4905_v50  ;;  %5199 = vmatmul.mubr.bf16.gmra.mrb[180].mxu0 %v3083_v38 }
 0x760   : > { %v3013_v11 = vadd.f32 %v4907_v10, %v6450_v0  ;;  %v3064_v12 = vmax.f32 %v3010_v9, 0.0 }
 0x762   : > { %v3065_v13 = vmax.f32 %v3013_v11, 0.0  ;;  %v4908_v14 = vpop.f32.mrb[180].mxu1 }
 0x763   : > { %v4909_v15 = vpop.f32.mrb[181].mxu1 }
 0x764   : > { %v4910_v19 = vadd.f32 %v4909_v15, %v4908_v14  ;;  %v4911_v20 = vpop.f32.mrb[182].mxu1  ;;  %v3084_v21 = vpack.c.bf16 %v3065_v13, %v3064_v12 }
 0x765   : > { %v4912_v22 = vpop.f32.mrb[183].mxu1 }
 0x766   : > { %v3018_v23 = vadd.f32 %v4910_v19, %v6450_v0  ;;  %v4913_v24 = vadd.f32 %v4912_v22, %v4911_v20  ;;  %5202 = vmatprep.mubr.bf16.mxu0 %v3084_v21 }
 0x768   : > { %v3021_v25 = vadd.f32 %v4913_v24, %v6450_v0  ;;  %v3066_v32 = vmax.f32 %v3018_v23, 0.0  ;;  %v3851_v23 = vpop.permute.xlu1 %3850 }
 0x769   : > { %vm3935_vm8 = vcmp.eq.s32.totalorder %v6490_v59, %v3851_v23 }
 0x76a   : > { %v3067_v34 = vmax.f32 %v3021_v25, 0.0  ;;  %v4914_v18 = vpop.f32.mrb[184].mxu1 }
 0x76b   : > { %v4915_v1 = vpop.f32.mrb[185].mxu1 }
 0x76c   : > { %v4916_v17 = vadd.f32 %v4915_v1, %v4914_v18  ;;  %v4917_v26 = vpop.f32.mrb[186].mxu1  ;;  %v3085_v35 = vpack.c.bf16 %v3067_v34, %v3066_v32 }
 0x76d   : > { %v4918_v27 = vpop.f32.mrb[187].mxu1 }
 0x76e   : > { %v3026_v36 = vadd.f32 %v4916_v17, %v6450_v0  ;;  %v4919_v54 = vadd.f32 %v4918_v27, %v4917_v26  ;;  %5203 = vmatmul.mubr.bf16.gmra.mrb[184].mxu0 %v3085_v35 }
 0x770   : > { %v3029_v16 = vadd.f32 %v4919_v54, %v6450_v0  ;;  %v3068_v33 = vmax.f32 %v3026_v36, 0.0 }
 0x772   : > { %v3069_v39 = vmax.f32 %v3029_v16, 0.0  ;;  %v4920_v40 = vpop.f32.mrb[188].mxu1 }
 0x773   : > { %v4921_v45 = vpop.f32.mrb[189].mxu1 }
 0x774   : > { %v4922_v46 = vadd.f32 %v4921_v45, %v4920_v40  ;;  %v4923_v41 = vpop.f32.mrb[190].mxu1  ;;  %v3086_v51 = vpack.c.bf16 %v3069_v39, %v3068_v33 }
 0x775   : > { %v4924_v37 = vpop.f32.mrb[191].mxu1 }
 0x776   : > { %v3034_v30 = vadd.f32 %v4922_v46, %v6450_v0  ;;  %v4925_v31 = vadd.f32 %v4924_v37, %v4923_v41  ;;  %5206 = vmatprep.mubr.bf16.mxu0 %v3086_v51 }
 0x778   : > { %v3037_v52 = vadd.f32 %v4925_v31, %v6450_v0  ;;  %v3070_v42 = vmax.f32 %v3034_v30, 0.0  ;;  %v3842_v0 = vpop.permute.xlu0 %3841 }
 0x779   : > { %vm3932_vm2 = vcmp.eq.s32.totalorder %v6490_v59, %v3842_v0 }
 0x77a   : > { %v3071_v55 = vmax.f32 %v3037_v52, 0.0 }
 0x77c   : > { %v3087_v56 = vpack.c.bf16 %v3071_v55, %v3070_v42  ;;  %v3848_v53 = vpop.permute.xlu0 %3847 }
 0x77d   : > { %vm3934_vm7 = vcmp.eq.s32.totalorder %v6490_v59, %v3848_v53 }
 0x77e   : > { %5207 = vmatmul.mubr.bf16.gmra.mrb[188].mxu0 %v3087_v56 }
 0x780   : > { %v3854_v38 = vpop.permute.xlu0 %3853 }
 0x781   : > { %vm3936_vm6 = vcmp.eq.s32.totalorder %v6490_v59, %v3854_v38 }
 0x784   : > { %v6600_v37 = vpop.permute.xlu0 %3859 }
 0x785   : > { %vm3938_vm10 = vcmp.eq.s32.totalorder %v6490_v59, %v6600_v37 }
 0x7e1   : > { %v5180_v60 = vpop.f32.mrb[160].mxu0 }
 0x7e2   : > { %v6493_v61 = vadd.f32 %v5180_v60, %v6487_v58  ;;  %v3193_v62 = vpop.f32.mrb[161].mxu0 }
 0x7e3   : > { %v6497_v63 = vadd.f32 %v6487_v58, %v3193_v62  ;;  %v5181_v47 = vpop.f32.mrb[162].mxu0  ;;  %v6615_v62 = vpop.permute.xlu0 %3865 }
 0x7e4   : > { %v6500_v2 = vadd.f32 %v5181_v47, %v6487_v58  ;;  %3484 = vmax.xlane.f32.xlu1 %v6493_v61  ;;  %v3196_v48 = vpop.f32.mrb[163].mxu0  ;;  %v3964_v5 = vsel %vm3932_vm2, %v6493_v61, 0.0  ;;  %vm3940_vm12 = vcmp.eq.s32.totalorder %v6490_v59, %v6615_v62 }
 0x7e5   : > { %v6510_v28 = vadd.f32 %v6487_v58, %v3196_v48  ;;  %3480 = vmax.xlane.f32.xlu0 %v6497_v63  ;;  %v3962_v6 = vsel %vm3930_vm3, %v6497_v63, 0.0  ;;  %v6628_v48 = vpop.permute.xlu1 %3856 }
 0x7e6   : > { %v4621_v3 = vpack.c.bf16 %v6500_v2, %v6493_v61  ;;  %v3965_v49 = vsel %vm3933_vm4, %v6500_v2, 0.0  ;;  %vm3937_vm9 = vcmp.eq.s32.totalorder %v6490_v59, %v6628_v48 }
 0x7e7   : > { %v4616_v4 = vpack.c.bf16 %v6510_v28, %v6497_v63  ;;  %v3963_v44 = vsel %vm3931_vm5, %v6510_v28, 0.0  ;;  %v6626_v43 = vpop.permute.xlu0 %3871 }
 0x7e8   : > { %4693 = vst [vmem:[%s6507_s21 + $0x8] sm:$0xff] %v4621_v3   ;;  %3998 = vadd.xlane.f32.xlu1 %v3964_v5  ;;  %vm3942_vm14 = vcmp.eq.s32.totalorder %v6490_v59, %v6626_v43 }
 0x7e9   : > { %4617 = vst [vmem:[%s6507_s21] sm:$0xff] %v4616_v4   ;;  %3994 = vadd.xlane.f32.xlu0 %v3962_v6 }
 0x7eb   : > { %v6630_v4 = vpop.permute.xlu0 %3877 }
 0x7ec   : > { %3486 = vmax.xlane.f32.xlu1 %v6500_v2  ;;  %vm3944_vm0 = vcmp.eq.s32.totalorder %v6490_v59, %v6630_v4 }
 0x7ed   : > { %3482 = vmax.xlane.f32.xlu0 %v6510_v28 }
 0x7f0   : > { %4000 = vadd.xlane.f32.xlu1 %v3965_v49 }
 0x7f1   : > { %v5184_v50 = vpop.f32.mrb[164].mxu0  ;;  %3996 = vadd.xlane.f32.xlu0 %v3963_v44 }
 0x7f2   : > { %v6529_v8 = vadd.f32 %v5184_v50, %v6487_v58  ;;  %v3209_v9 = vpop.f32.mrb[165].mxu0 }
 0x7f3   : > { %v5185_v10 = vpop.f32.mrb[166].mxu0  ;;  %v6537_v14 = vadd.f32 %v6487_v58, %v3209_v9  ;;  %v3863_v9 = vpop.permute.xlu1 %3862 }
 0x7f4   : > { %v6533_v11 = vadd.f32 %v5185_v10, %v6487_v58  ;;  %v3212_v12 = vpop.f32.mrb[167].mxu0  ;;  %v3968_v13 = vsel %vm3936_vm6, %v6529_v8, 0.0  ;;  %vm3939_vm11 = vcmp.eq.s32.totalorder %v6490_v59, %v3863_v9 }
 0x7f5   : > { %v6540_v15 = vadd.f32 %v6487_v58, %v3212_v12  ;;  %4006 = vadd.xlane.f32.xlu1 %v3968_v13  ;;  %3492 = vmax.xlane.f32.xlu0 %v6529_v8  ;;  %v3966_v21 = vsel %vm3934_vm7, %v6537_v14, 0.0  ;;  %v6650_v12 = vpop.permute.xlu0 %3880 }
 0x7f6   : > { %v4631_v19 = vpack.c.bf16 %v6533_v11, %v6529_v8  ;;  %vm3945_vm1 = vcmp.eq.s32.totalorder %v6490_v59, %v6650_v12 }
 0x7f7   : > { %v4626_v20 = vpack.c.bf16 %v6540_v15, %v6537_v14  ;;  %v3967_v1 = vsel %vm3935_vm8, %v6540_v15, 0.0  ;;  %v6656_v13 = vpop.permute.xlu1 %3868 }
 0x7f8   : > { %4695 = vst [vmem:[%s6507_s21 + $0x18] sm:$0xff] %v4631_v19   ;;  %vm3941_vm13 = vcmp.eq.s32.totalorder %v6490_v59, %v6656_v13 }
 0x7f9   : > { %4694 = vst [vmem:[%s6507_s21 + $0x10] sm:$0xff] %v4626_v20   ;;  %3494 = vmax.xlane.f32.xlu1 %v6533_v11  ;;  %3488 = vmax.xlane.f32.xlu0 %v6537_v14  ;;  %v6658_v19 = vpop.permute.xlu0 %3886 }
 0x7fa   : > { %vm3947_vm3 = vcmp.eq.s32.totalorder %v6490_v59, %v6658_v19 }
 0x7fb   : > { %v6663_v23 = vpop.permute.xlu1 %3874 }
 0x7fc   : > { %vm3943_vm15 = vcmp.eq.s32.totalorder %v6490_v59, %v6663_v23 }
 0x7fd   : > { %4002 = vadd.xlane.f32.xlu1 %v3966_v21 }
 0x801   : > { %v5188_v22 = vpop.f32.mrb[168].mxu0  ;;  %3490 = vmax.xlane.f32.xlu1 %v6540_v15 }
 0x802   : > { %v6555_v24 = vadd.f32 %v5188_v22, %v6487_v58  ;;  %v3225_v25 = vpop.f32.mrb[169].mxu0 }
 0x803   : > { %v5189_v32 = vpop.f32.mrb[170].mxu0  ;;  %v6564_v17 = vadd.f32 %v6487_v58, %v3225_v25 }
 0x804   : > { %v6559_v34 = vadd.f32 %v5189_v32, %v6487_v58  ;;  %v3228_v18 = vpop.f32.mrb[171].mxu0  ;;  %3500 = vmax.xlane.f32.xlu0 %v6555_v24  ;;  %v6665_v32 = vpop.permute.xlu0 %3889  ;;  %v3972_v37 = vsel %vm3940_vm12, %v6555_v24, 0.0 }
 0x805   : > { %v6567_v26 = vadd.f32 %v6487_v58, %v3228_v18  ;;  %4004 = vadd.xlane.f32.xlu1 %v3967_v1  ;;  %vm3948_vm4 = vcmp.eq.s32.totalorder %v6490_v59, %v6665_v32 }
 0x806   : > { %v4641_v35 = vpack.c.bf16 %v6559_v34, %v6555_v24 }
 0x807   : > { %v4636_v27 = vpack.c.bf16 %v6567_v26, %v6564_v17 }
 0x808   : > { %4697 = vst [vmem:[%s6507_s21 + $0x28] sm:$0xff] %v4641_v35   ;;  %3496 = vmax.xlane.f32.xlu0 %v6564_v17 }
 0x809   : > { %4696 = vst [vmem:[%s6507_s21 + $0x20] sm:$0xff] %v4636_v27   ;;  %3502 = vmax.xlane.f32.xlu1 %v6559_v34 }
 0x80d   : > { %3498 = vmax.xlane.f32.xlu1 %v6567_v26 }
 0x811   : > { %v5192_v36 = vpop.f32.mrb[172].mxu0 }
 0x812   : > { %v6579_v54 = vadd.f32 %v5192_v36, %v6487_v58  ;;  %v3241_v16 = vpop.f32.mrb[173].mxu0 }
 0x813   : > { %v5193_v33 = vpop.f32.mrb[174].mxu0  ;;  %v6586_v45 = vadd.f32 %v6487_v58, %v3241_v16 }
 0x814   : > { %v6582_v39 = vadd.f32 %v5193_v33, %v6487_v58  ;;  %v3244_v40 = vpop.f32.mrb[175].mxu0  ;;  %3508 = vmax.xlane.f32.xlu0 %v6579_v54  ;;  %v6684_v33 = vpop.permute.xlu1 %3883 }
 0x815   : > { %v6589_v46 = vadd.f32 %v6487_v58, %v3244_v40  ;;  %v6687_v40 = vpop.permute.xlu0 %3892  ;;  %vm3946_vm2 = vcmp.eq.s32.totalorder %v6490_v59, %v6684_v33 }
 0x816   : > { %v4651_v41 = vpack.c.bf16 %v6582_v39, %v6579_v54  ;;  %3510 = vmax.xlane.f32.xlu1 %v6582_v39  ;;  %vm3949_vm5 = vcmp.eq.s32.totalorder %v6490_v59, %v6687_v40 }
 0x817   : > { %v4646_v51 = vpack.c.bf16 %v6589_v46, %v6586_v45 }
 0x818   : > { %4699 = vst [vmem:[%s6507_s21 + $0x38] sm:$0xff] %v4651_v41   ;;  %3504 = vmax.xlane.f32.xlu0 %v6586_v45  ;;  %v6690_v41 = vpop.permute.xlu1 %3898 }
 0x819   : > { %4698 = vst [vmem:[%s6507_s21 + $0x30] sm:$0xff] %v4646_v51   ;;  %v6692_v51 = vpop.permute.xlu0 %3895  ;;  %vm3951_vm7 = vcmp.eq.s32.totalorder %v6490_v59, %v6690_v41 }
 0x81a   : > { %3506 = vmax.xlane.f32.xlu1 %v6589_v46  ;;  %vm3950_vm6 = vcmp.eq.s32.totalorder %v6490_v59, %v6692_v51 }
 0x821   : > { %v5196_v30 = vpop.f32.mrb[176].mxu0 }
 0x822   : > { %v6603_v31 = vadd.f32 %v5196_v30, %v6487_v58  ;;  %v3257_v52 = vpop.f32.mrb[177].mxu0 }
 0x823   : > { %v5197_v42 = vpop.f32.mrb[178].mxu0  ;;  %v6610_v57 = vadd.f32 %v6487_v58, %v3257_v52 }
 0x824   : > { %v6606_v55 = vadd.f32 %v5197_v42, %v6487_v58  ;;  %v3260_v56 = vpop.f32.mrb[179].mxu0  ;;  %3516 = vmax.xlane.f32.xlu0 %v6603_v31 }
 0x825   : > { %v6613_v60 = vadd.f32 %v6487_v58, %v3260_v56 }
 0x826   : > { %v4661_v0 = vpack.c.bf16 %v6606_v55, %v6603_v31  ;;  %3518 = vmax.xlane.f32.xlu1 %v6606_v55 }
 0x827   : > { %v4656_v47 = vpack.c.bf16 %v6613_v60, %v6610_v57 }
 0x828   : > { %4701 = vst [vmem:[%s6507_s21 + $0x48] sm:$0xff] %v4661_v0   ;;  %3512 = vmax.xlane.f32.xlu0 %v6610_v57 }
 0x829   : > { %4700 = vst [vmem:[%s6507_s21 + $0x40] sm:$0xff] %v4656_v47  }
 0x82a   : > { %3514 = vmax.xlane.f32.xlu1 %v6613_v60 }
 0x831   : > { %v5200_v3 = vpop.f32.mrb[180].mxu0 }
 0x832   : > { %v6633_v5 = vadd.f32 %v5200_v3, %v6487_v58  ;;  %v3273_v6 = vpop.f32.mrb[181].mxu0  ;;  %v6701_v3 = vpop.permute.xlu1 %3904 }
 0x833   : > { %v5201_v7 = vpop.f32.mrb[182].mxu0  ;;  %v6640_v44 = vadd.f32 %v6487_v58, %v3273_v6 }
 0x834   : > { %v6636_v53 = vadd.f32 %v5201_v7, %v6487_v58  ;;  %v3276_v49 = vpop.f32.mrb[183].mxu0  ;;  %3524 = vmax.xlane.f32.xlu0 %v6633_v5 }
 0x835   : > { %v6643_v50 = vadd.f32 %v6487_v58, %v3276_v49  ;;  %v6709_v49 = vpop.permute.xlu0 %3901 }
 0x836   : > { %v4671_v38 = vpack.c.bf16 %v6636_v53, %v6633_v5  ;;  %3526 = vmax.xlane.f32.xlu1 %v6636_v53  ;;  %vm3952_vm8 = vcmp.eq.s32.totalorder %v6490_v59, %v6709_v49 }
 0x837   : > { %v4666_v10 = vpack.c.bf16 %v6643_v50, %v6640_v44 }
 0x838   : > { %4703 = vst [vmem:[%s6507_s21 + $0x58] sm:$0xff] %v4671_v38   ;;  %3520 = vmax.xlane.f32.xlu0 %v6640_v44 }
 0x839   : > { %4702 = vst [vmem:[%s6507_s21 + $0x50] sm:$0xff] %v4666_v10  }
 0x83a   : > { %3522 = vmax.xlane.f32.xlu1 %v6643_v50 }
 0x841   : > { %v5204_v20 = vpop.f32.mrb[184].mxu0 }
 0x842   : > { %v6661_v21 = vadd.f32 %v5204_v20, %v6487_v58  ;;  %v3289_v22 = vpop.f32.mrb[185].mxu0  ;;  %v6720_v20 = vpop.permute.xlu1 %3910 }
 0x843   : > { %v5205_v25 = vpop.f32.mrb[186].mxu0  ;;  %v6672_v35 = vadd.f32 %v6487_v58, %v3289_v22  ;;  %v3969_v22 = vsel %vm3937_vm9, %v6533_v11, 0.0  ;;  %vm3953_vm9 = vcmp.eq.s32.totalorder %v6490_v59, %v6701_v3 }
 0x844   : > { %v6668_v18 = vadd.f32 %v5205_v25, %v6487_v58  ;;  %v3292_v1 = vpop.f32.mrb[187].mxu0  ;;  %3532 = vmax.xlane.f32.xlu0 %v6661_v21 }
 0x845   : > { %v6675_v27 = vadd.f32 %v6487_v58, %v3292_v1  ;;  %v3970_v1 = vsel %vm3938_vm10, %v6564_v17, 0.0 }
 0x846   : > { %v4681_v36 = vpack.c.bf16 %v6668_v18, %v6661_v21  ;;  %3534 = vmax.xlane.f32.xlu1 %v6668_v18  ;;  %v6729_v25 = vpop.permute.xlu1 %3919 }
 0x847   : > { %v4676_v16 = vpack.c.bf16 %v6675_v27, %v6672_v35  ;;  %vm3958_vm12 = vcmp.eq.s32.totalorder %v6490_v59, %v6729_v25 }
 0x848   : > { %4705 = vst [vmem:[%s6507_s21 + $0x68] sm:$0xff] %v4681_v36   ;;  %3528 = vmax.xlane.f32.xlu0 %v6672_v35 }
 0x849   : > { %4704 = vst [vmem:[%s6507_s21 + $0x60] sm:$0xff] %v4676_v16   ;;  %v3971_v16 = vsel %vm3939_vm11, %v6567_v26, 0.0 }
 0x84a   : > { %3530 = vmax.xlane.f32.xlu1 %v6675_v27 }
 0x851   : > { %v5208_v30 = vpop.f32.mrb[188].mxu0 }
 0x852   : > { %v6695_v52 = vadd.f32 %v5208_v30, %v6487_v58  ;;  %v3305_v42 = vpop.f32.mrb[189].mxu0  ;;  %v6736_v30 = vpop.permute.xlu1 %3922 }
 0x853   : > { %v5209_v56 = vpop.f32.mrb[190].mxu0  ;;  %v6704_v6 = vadd.f32 %v6487_v58, %v3305_v42 }
 0x854   : > { %v6698_v0 = vadd.f32 %v5209_v56, %v6487_v58  ;;  %v3308_v47 = vpop.f32.mrb[191].mxu0  ;;  %3540 = vmax.xlane.f32.xlu0 %v6695_v52 }
 0x855   : > { %v6707_v7 = vadd.f32 %v6487_v58, %v3308_v47  ;;  %v6722_v58 = vpop.permute.xlu0 %3907 }
 0x856   : > { %v4691_v38 = vpack.c.bf16 %v6698_v0, %v6695_v52  ;;  %3542 = vmax.xlane.f32.xlu1 %v6698_v0  ;;  %v6743_v42 = vpop.permute.xlu1 %3928  ;;  %vm3954_vm10 = vcmp.eq.s32.totalorder %v6490_v59, %v6722_v58 }
 0x857   : > { %v4686_v10 = vpack.c.bf16 %v6707_v7, %v6704_v6  ;;  %7227 = vst [vmem:[#allocation5_spill] sm:$0xff] %v6743_v42 }
 0x858   : > { %4707 = vst [vmem:[%s6507_s21 + $0x78] sm:$0xff] %v4691_v38   ;;  %3536 = vmax.xlane.f32.xlu0 %v6704_v6 }
 0x859   : > { %4706 = vst [vmem:[%s6507_s21 + $0x70] sm:$0xff] %v4686_v10   ;;  %v6732_v36 = vpop.permute.xlu0 %3913 }
 0x85a   : > { %3538 = vmax.xlane.f32.xlu1 %v6707_v7  ;;  %vm3956_vm11 = vcmp.eq.s32.totalorder %v6490_v59, %v6732_v36 }
 0x85d   : > { %v6738_v48 = vpop.permute.xlu0 %3916 }
 0x85e   : > { %4008 = vadd.xlane.f32.xlu1 %v3969_v22 }
 0x861   : > { %v6745_v56 = vpop.permute.xlu0 %3925 }
 0x862   : > { %4010 = vadd.xlane.f32.xlu1 %v3970_v1 }
 0x866   : > { %4012 = vadd.xlane.f32.xlu1 %v3971_v16 }
 0x86a   : > { %4014 = vadd.xlane.f32.xlu1 %v3972_v37 }
 0x871   : > { %v6747_v47 = vpop.xlane.xlu1 %3484 }
 0x872   : > { %7228 = vst [vmem:[#allocation6_spill] sm:$0xff] %v6747_v47  ;;  %v3546_v9 = vsub.f32 %v6493_v61, %v6747_v47  ;;  %v6751_v38 = vpop.xlane.xlu0 %3480 }
 0x873   : > { %v3544_v10 = vsub.f32 %v6497_v63, %v6751_v38 }
 0x874   : > { %v3580_v22 = vmul.f32 1.442695, %v3546_v9 }
 0x875   : > { %v6755_v1 = vpop.xlane.xlu1 %3998  ;;  %v3576_v62 = vmul.f32 1.442695, %v3544_v10 }
 0x876   : > { %7229 = vst [vmem:[#allocation7_spill] sm:$0xff] %v6755_v1  ;;  %5347 = vpow2.f32 %v3580_v22  ;;  %v6757_v16 = vpop.xlane.xlu0 %3994 }
 0x877   : > { %7230 = vst [vmem:[#allocation8_spill] sm:$0xff] %v6757_v16  ;;  %5349 = vpow2.f32 %v3576_v62 }
 0x879   : > { %v6759_v37 = vpop.xlane.xlu1 %3486 }
 0x87a   : > { %7231 = vst [vmem:[#allocation9_spill] sm:$0xff] %v6759_v37  ;;  %v3547_v29 = vsub.f32 %v6500_v2, %v6759_v37  ;;  %v6763_v42 = vpop.xlane.xlu0 %3482 }
 0x87b   : > { %v3545_v61 = vsub.f32 %v6510_v28, %v6763_v42 }
 0x87c   : > { %v3582_v47 = vmul.f32 1.442695, %v3547_v29 }
 0x87d   : > { %v6767_v63 = vpop.xlane.xlu1 %4000  ;;  %v3578_v9 = vmul.f32 1.442695, %v3545_v61 }
 0x87e   : > { %7232 = vst [vmem:[#allocation10_spill] sm:$0xff] %v6767_v63  ;;  %5351 = vpow2.f32 %v3582_v47  ;;  %v6769_v22 = vpop.xlane.xlu0 %3996 }
 0x87f   : > { %5353 = vpow2.f32 %v3578_v9 }
 0x880   : > { %v5348_v10 = vpop.eup %5347 }
 0x881   : > { %3644 = vadd.xlane.f32.xlu1 %v5348_v10  ;;  %v5350_v37 = vpop.eup %5349 }
 0x882   : > { %v6771_v1 = vpop.xlane.xlu1 %4006  ;;  %v6773_v62 = vpop.xlane.xlu0 %3492 }
 0x883   : > { %7233 = vst [vmem:[#allocation11_spill] sm:$0xff] %v6771_v1  ;;  %7234 = vst [vmem:[#allocation12_spill] sm:$0xff] %v6773_v62  ;;  %v3550_v2 = vsub.f32 %v6529_v8, %v6773_v62 }
 0x885   : > { %v3588_v16 = vmul.f32 1.442695, %v3550_v2  ;;  %3640 = vadd.xlane.f32.xlu1 %v5350_v37 }
 0x886   : > { %v6777_v29 = vpop.xlane.xlu1 %3494  ;;  %v6779_v28 = vpop.xlane.xlu0 %3488 }
 0x887   : > { %5355 = vpow2.f32 %v3588_v16  ;;  %v3548_v47 = vsub.f32 %v6537_v14, %v6779_v28  ;;  %v3551_v9 = vsub.f32 %v6533_v11, %v6777_v29 }
 0x888   : > { %v5352_v61 = vpop.eup %5351 }
 0x889   : > { %v3584_v10 = vmul.f32 1.442695, %v3548_v47  ;;  %3646 = vadd.xlane.f32.xlu0 %v5352_v61  ;;  %v5354_v8 = vpop.eup %5353  ;;  %v3590_v62 = vmul.f32 1.442695, %v3551_v9 }
 0x88a   : > { %v6785_v1 = vpop.xlane.xlu1 %4002 }
 0x88b   : > { %5357 = vpow2.f32 %v3584_v10 }
 0x88c   : > { %5359 = vpow2.f32 %v3590_v62 }
 0x88d   : > { %3642 = vadd.xlane.f32.xlu0 %v5354_v8 }
 0x88e   : > { %v6787_v37 = vpop.xlane.xlu1 %3490 }
 0x88f   : > { %v3549_v16 = vsub.f32 %v6540_v15, %v6787_v37 }
 0x891   : > { %v5356_v2 = vpop.eup %5355  ;;  %v3586_v14 = vmul.f32 1.442695, %v3549_v16  ;;  %v6791_v63 = vpop.xlane.xlu0 %3500 }
 0x892   : > { %7235 = vst [vmem:[#allocation13_spill] sm:$0xff] %v6791_v63  ;;  %v3554_v11 = vsub.f32 %v6555_v24, %v6791_v63  ;;  %v6795_v47 = vpop.xlane.xlu1 %4004  ;;  %3652 = vadd.xlane.f32.xlu0 %v5356_v2 }
 0x893   : > { %5361 = vpow2.f32 %v3586_v14 }
 0x894   : > { %v3596_v61 = vmul.f32 1.442695, %v3554_v11 }
 0x895   : > { %v6797_v9 = vpop.xlane.xlu0 %3496  ;;  %v5358_v10 = vpop.eup %5357 }
 0x896   : > { %7236 = vst [vmem:[#allocation14_spill] sm:$0xff] %v6797_v9  ;;  %5363 = vpow2.f32 %v3596_v61  ;;  %v3552_v15 = vsub.f32 %v6564_v17, %v6797_v9  ;;  %v6801_v62 = vpop.xlane.xlu1 %3502  ;;  %3648 = vadd.xlane.f32.xlu1 %v5358_v10  ;;  %v5360_v24 = vpop.eup %5359 }
 0x897   : > { %v3555_v8 = vsub.f32 %v6559_v34, %v6801_v62 }
 0x898   : > { %v3592_v16 = vmul.f32 1.442695, %v3552_v15  ;;  %v3973_v15 = vsel %vm3941_vm13, %v6559_v34, 0.0  ;;  %v3974_v34 = vsel %vm3942_vm14, %v6586_v45, 0.0  ;;  %vm3960_vm13 = vcmp.eq.s32.totalorder %v6490_v59, %v6745_v56 }
 0x899   : > { %v3598_v63 = vmul.f32 1.442695, %v3555_v8  ;;  %vm3955_vm14 = vcmp.eq.s32.totalorder %v6490_v59, %v6720_v20  ;;  %v7237_v20 = vld [vmem:[#allocation5_spill] sm:$0xff] }
 0x89a   : > { %5365 = vpow2.f32 %v3592_v16  ;;  %v6805_v2 = vpop.xlane.xlu1 %3498  ;;  %3654 = vadd.xlane.f32.xlu1 %v5360_v24 }
 0x89b   : > { %v3553_v14 = vsub.f32 %v6567_v26, %v6805_v2  ;;  %5367 = vpow2.f32 %v3598_v63 }
 0x89d   : > { %v5362_v11 = vpop.eup %5361  ;;  %v3594_v61 = vmul.f32 1.442695, %v3553_v14 }
 0x89e   : > { %3650 = vadd.xlane.f32.xlu1 %v5362_v11 }
 0x89f   : > { %5369 = vpow2.f32 %v3594_v61 }
 0x8a0   : > { %v5364_v17 = vpop.eup %5363 }
 0x8a1   : > { %3660 = vadd.xlane.f32.xlu0 %v5364_v17  ;;  %v6809_v9 = vpop.xlane.xlu0 %3508 }
 0x8a2   : > { %v3558_v10 = vsub.f32 %v6579_v54, %v6809_v9  ;;  %4016 = vadd.xlane.f32.xlu1 %v3973_v15 }
 0x8a3   : > { %v6816_v26 = vpop.xlane.xlu1 %3510 }
 0x8a4   : > { %v5366_v8 = vpop.eup %5365  ;;  %v3604_v63 = vmul.f32 1.442695, %v3558_v10  ;;  %v3559_v13 = vsub.f32 %v6582_v39, %v6816_v26  ;;  %v3975_v10 = vsel %vm3943_vm15, %v6589_v46, 0.0  ;;  %vm3957_vm15 = vcmp.eq.s32.totalorder %v6490_v59, %v6738_v48 }
 0x8a5   : > { %3656 = vadd.xlane.f32.xlu0 %v5366_v8  ;;  %v6818_v16 = vpop.xlane.xlu0 %3504  ;;  %v5368_v11 = vpop.eup %5367  ;;  %v3976_v8 = vsel %vm3944_vm0, %v6579_v54, 0.0  ;;  %vm3959_vm0 = vcmp.eq.s32.totalorder %v6490_v59, %v6736_v30 }
 0x8a6   : > { %5371 = vpow2.f32 %v3604_v63  ;;  %v3556_v24 = vsub.f32 %v6586_v45, %v6818_v16  ;;  %4018 = vadd.xlane.f32.xlu1 %v3974_v34  ;;  %v3606_v17 = vmul.f32 1.442695, %v3559_v13  ;;  %v3977_v13 = vsel %vm3945_vm1, %v6582_v39, 0.0 }
 0x8a7   : > { %v6827_v14 = vpop.xlane.xlu1 %3506  ;;  %v3978_v39 = vsel %vm3946_vm2, %v6610_v57, 0.0  ;;  %vm3961_vm1 = vcmp.eq.s32.totalorder %v6490_v59, %v7237_v20 }
 0x8a8   : > { %v3600_v61 = vmul.f32 1.442695, %v3556_v24  ;;  %v3557_v43 = vsub.f32 %v6589_v46, %v6827_v14 }
 0x8a9   : > { %3662 = vadd.xlane.f32.xlu0 %v5368_v11  ;;  %v5370_v15 = vpop.eup %5369 }
 0x8aa   : > { %5373 = vpow2.f32 %v3600_v61  ;;  %4020 = vadd.xlane.f32.xlu1 %v3975_v10  ;;  %v3602_v45 = vmul.f32 1.442695, %v3557_v43 }
 0x8ab   : > { %5375 = vpow2.f32 %v3606_v17 }
 0x8ac   : > { %5377 = vpow2.f32 %v3602_v45 }
 0x8ad   : > { %3658 = vadd.xlane.f32.xlu0 %v5370_v15  ;;  %v3979_v15 = vsel %vm3947_vm3, %v6613_v60, 0.0 }
 0x8ae   : > { %4022 = vadd.xlane.f32.xlu1 %v3976_v8  ;;  %v3980_v8 = vsel %vm3948_vm4, %v6603_v31, 0.0  ;;  %vm4223_vm4 = vcmask 7168  }
 0x8b0   : > { %v5372_v63 = vpop.eup %5371 }
 0x8b1   : > { %3668 = vadd.xlane.f32.xlu0 %v5372_v63  ;;  %v6837_v23 = vpop.xlane.xlu0 %3516 }
 0x8b2   : > { %v3562_v46 = vsub.f32 %v6603_v31, %v6837_v23  ;;  %4024 = vadd.xlane.f32.xlu1 %v3977_v13 }
 0x8b3   : > { %v6844_v4 = vpop.xlane.xlu1 %3518 }
 0x8b4   : > { %v5374_v24 = vpop.eup %5373  ;;  %v3612_v34 = vmul.f32 1.442695, %v3562_v46  ;;  %v3563_v12 = vsub.f32 %v6606_v55, %v6844_v4  ;;  %v3981_v46 = vsel %vm3949_vm5, %v6606_v55, 0.0  ;;  %v3982_v55 = vsel %vm3950_vm6, %v6640_v44, 0.0 }
 0x8b5   : > { %3664 = vadd.xlane.f32.xlu0 %v5374_v24  ;;  %v6848_v54 = vpop.xlane.xlu0 %3512  ;;  %v5376_v17 = vpop.eup %5375 }
 0x8b6   : > { %5379 = vpow2.f32 %v3612_v34  ;;  %v3560_v11 = vsub.f32 %v6610_v57, %v6848_v54  ;;  %4026 = vadd.xlane.f32.xlu1 %v3978_v39  ;;  %v3614_v33 = vmul.f32 1.442695, %v3563_v12  ;;  %v5378_v45 = vpop.eup %5377 }
 0x8b7   : > { %v6855_v61 = vpop.xlane.xlu1 %3514 }
 0x8b8   : > { %v3608_v43 = vmul.f32 1.442695, %v3560_v11  ;;  %v3561_v10 = vsub.f32 %v6613_v60, %v6855_v61 }
 0x8b9   : > { %3670 = vadd.xlane.f32.xlu0 %v5376_v17 }
 0x8ba   : > { %5381 = vpow2.f32 %v3608_v43  ;;  %4028 = vadd.xlane.f32.xlu1 %v3979_v15  ;;  %v3610_v57 = vmul.f32 1.442695, %v3561_v10  ;;  %v3983_v43 = vsel %vm3951_vm7, %v6643_v50, 0.0  ;;  %v3984_v10 = vsel %vm3952_vm8, %v6633_v5, 0.0 }
 0x8bb   : > { %5383 = vpow2.f32 %v3614_v33 }
 0x8bc   : > { %5385 = vpow2.f32 %v3610_v57 }
 0x8bd   : > { %3666 = vadd.xlane.f32.xlu0 %v5378_v45  ;;  %v3985_v45 = vsel %vm3953_vm9, %v6636_v53, 0.0 }
 0x8be   : > { %4030 = vadd.xlane.f32.xlu1 %v3980_v8 }
 0x8c0   : > { %v5380_v19 = vpop.eup %5379 }
 0x8c1   : > { %3676 = vadd.xlane.f32.xlu0 %v5380_v19  ;;  %v6867_v63 = vpop.xlane.xlu0 %3524 }
 0x8c2   : > { %v3566_v60 = vsub.f32 %v6633_v5, %v6867_v63  ;;  %4032 = vadd.xlane.f32.xlu1 %v3981_v46 }
 0x8c3   : > { %v6872_v32 = vpop.xlane.xlu1 %3526 }
 0x8c4   : > { %v5382_v13 = vpop.eup %5381  ;;  %v3620_v24 = vmul.f32 1.442695, %v3566_v60  ;;  %v3567_v40 = vsub.f32 %v6636_v53, %v6872_v32  ;;  %v3986_v53 = vsel %vm3954_vm10, %v6672_v35, 0.0 }
 0x8c5   : > { %3672 = vadd.xlane.f32.xlu0 %v5382_v13  ;;  %v6876_v31 = vpop.xlane.xlu0 %3520  ;;  %v5384_v11 = vpop.eup %5383 }
 0x8c6   : > { %5387 = vpow2.f32 %v3620_v24  ;;  %v3564_v34 = vsub.f32 %v6640_v44, %v6876_v31  ;;  %4034 = vadd.xlane.f32.xlu1 %v3982_v55  ;;  %v3622_v51 = vmul.f32 1.442695, %v3567_v40  ;;  %v5386_v33 = vpop.eup %5385  ;;  %v3988_v40 = vsel %vm3956_vm11, %v6661_v21, 0.0 }
 0x8c7   : > { %v6883_v12 = vpop.xlane.xlu1 %3522  ;;  %v3990_v55 = vsel %vm3958_vm12, %v6704_v6, 0.0 }
 0x8c8   : > { %v3616_v39 = vmul.f32 1.442695, %v3564_v34  ;;  %v3565_v17 = vsub.f32 %v6643_v50, %v6883_v12 }
 0x8c9   : > { %3678 = vadd.xlane.f32.xlu0 %v5384_v11 }
 0x8ca   : > { %5389 = vpow2.f32 %v3616_v39  ;;  %4036 = vadd.xlane.f32.xlu1 %v3983_v43  ;;  %v3618_v44 = vmul.f32 1.442695, %v3565_v17  ;;  %v3992_v39 = vsel %vm3960_vm13, %v6695_v52, 0.0 }
 0x8cb   : > { %5391 = vpow2.f32 %v3622_v51 }
 0x8cc   : > { %5393 = vpow2.f32 %v3618_v44 }
 0x8cd   : > { %3674 = vadd.xlane.f32.xlu0 %v5386_v33 }
 0x8ce   : > { %4038 = vadd.xlane.f32.xlu1 %v3984_v10 }
 0x8d0   : > { %v5388_v41 = vpop.eup %5387 }
 0x8d1   : > { %3684 = vadd.xlane.f32.xlu0 %v5388_v41  ;;  %v6895_v15 = vpop.xlane.xlu0 %3532 }
 0x8d2   : > { %v3570_v50 = vsub.f32 %v6661_v21, %v6895_v15  ;;  %4040 = vadd.xlane.f32.xlu1 %v3985_v45 }
 0x8d3   : > { %v6900_v49 = vpop.xlane.xlu1 %3534 }
 0x8d4   : > { %v5390_v57 = vpop.eup %5389  ;;  %v3628_v8 = vmul.f32 1.442695, %v3570_v50  ;;  %v3571_v3 = vsub.f32 %v6668_v18, %v6900_v49 }
 0x8d5   : > { %3680 = vadd.xlane.f32.xlu0 %v5390_v57  ;;  %v6904_v5 = vpop.xlane.xlu0 %3528  ;;  %v5392_v46 = vpop.eup %5391 }
 0x8d6   : > { %5395 = vpow2.f32 %v3628_v8  ;;  %v3568_v19 = vsub.f32 %v6672_v35, %v6904_v5  ;;  %4042 = vadd.xlane.f32.xlu1 %v3986_v53  ;;  %v3630_v58 = vmul.f32 1.442695, %v3571_v3  ;;  %v5394_v34 = vpop.eup %5393  ;;  %v3987_v53 = vsel %vm3955_vm14, %v6675_v27, 0.0 }
 0x8d7   : > { %v6911_v60 = vpop.xlane.xlu1 %3530 }
 0x8d8   : > { %v3624_v13 = vmul.f32 1.442695, %v3568_v19  ;;  %v3569_v24 = vsub.f32 %v6675_v27, %v6911_v60  ;;  %v3993_v27 = vsel %vm3961_vm1, %v6698_v0, 0.0 }
 0x8d9   : > { %3686 = vadd.xlane.f32.xlu0 %v5392_v46 }
 0x8da   : > { %5397 = vpow2.f32 %v3624_v13  ;;  %4046 = vadd.xlane.f32.xlu1 %v3988_v40  ;;  %v3626_v35 = vmul.f32 1.442695, %v3569_v24  ;;  %v3989_v13 = vsel %vm3957_vm15, %v6668_v18, 0.0 }
 0x8db   : > { %5399 = vpow2.f32 %v3630_v58  ;;  %v3991_v58 = vsel %vm3959_vm0, %v6707_v7, 0.0 }
 0x8dc   : > { %5401 = vpow2.f32 %v3626_v35 }
 0x8dd   : > { %3682 = vadd.xlane.f32.xlu0 %v5394_v34 }
 0x8de   : > { %4050 = vadd.xlane.f32.xlu1 %v3990_v55 }
 0x8e0   : > { %v5396_v36 = vpop.eup %5395 }
 0x8e1   : > { %3692 = vadd.xlane.f32.xlu0 %v5396_v36  ;;  %v6923_v11 = vpop.xlane.xlu0 %3540 }
 0x8e2   : > { %v3574_v21 = vsub.f32 %v6695_v52, %v6923_v11  ;;  %4054 = vadd.xlane.f32.xlu1 %v3992_v39 }
 0x8e3   : > { %v6928_v25 = vpop.xlane.xlu1 %3542 }
 0x8e4   : > { %v5398_v51 = vpop.eup %5397  ;;  %v3636_v17 = vmul.f32 1.442695, %v3574_v21  ;;  %v3575_v52 = vsub.f32 %v6698_v0, %v6928_v25 }
 0x8e5   : > { %3688 = vadd.xlane.f32.xlu0 %v5398_v51  ;;  %v6930_v43 = vpop.xlane.xlu0 %3536  ;;  %v5400_v44 = vpop.eup %5399 }
 0x8e6   : > { %5403 = vpow2.f32 %v3636_v17  ;;  %v3572_v56 = vsub.f32 %v6704_v6, %v6930_v43  ;;  %v5402_v45 = vpop.eup %5401  ;;  %v3638_v57 = vmul.f32 1.442695, %v3575_v52 }
 0x8e7   : > { %v6934_v33 = vpop.xlane.xlu1 %3538 }
 0x8e8   : > { %v3632_v10 = vmul.f32 1.442695, %v3572_v56  ;;  %v3573_v41 = vsub.f32 %v6707_v7, %v6934_v33 }
 0x8e9   : > { %3694 = vadd.xlane.f32.xlu0 %v5400_v44 }
 0x8ea   : > { %5405 = vpow2.f32 %v3632_v10  ;;  %v3634_v50 = vmul.f32 1.442695, %v3573_v41  ;;  %v7238_v10 = vld [vmem:[#allocation4_spill] sm:$0xff] }
 0x8eb   : > { %v6945_v46 = vpop.xlane.xlu1 %4008  ;;  %v4061_v41 = vadd.s32 8, %v7238_v10  ;;  %v4062_v20 = vadd.s32 16, %v7238_v10 }
 0x8ec   : > { %5407 = vpow2.f32 %v3634_v50 }
 0x8ed   : > { %3690 = vadd.xlane.f32.xlu0 %v5402_v45  ;;  %5409 = vpow2.f32 %v3638_v57  ;;  %v6968_v45 = vstv %s4578_s22 }
 0x8ef   : > { %v6951_v24 = vpop.xlane.xlu1 %4010 }
 0x8f0   : > { %v5404_v8 = vpop.eup %5403 }
 0x8f1   : > { %3700 = vadd.xlane.f32.xlu0 %v5404_v8 }
 0x8f3   : > { %v6956_v48 = vpop.xlane.xlu1 %4012 }
 0x8f4   : > { %v5406_v6 = vpop.eup %5405 }
 0x8f5   : > { %3696 = vadd.xlane.f32.xlu0 %v5406_v6 }
 0x8f6   : > { %v5408_v3 = vpop.eup %5407 }
 0x8f7   : > { %v5410_v19 = vpop.eup %5409  ;;  %v6958_v40 = vpop.xlane.xlu1 %4014 }
 0x8f9   : > { %3698 = vadd.xlane.f32.xlu0 %v5408_v3  ;;  %v4094_v3 = vadd.s32 %v6968_v45, %v4061_v41  ;;  %v4095_v41 = vadd.s32 %v6968_v45, %v4062_v20 }
 0x8fd   : > { %3702 = vadd.xlane.f32.xlu0 %v5410_v19 }
 0x901   : > { %4044 = vadd.xlane.f32.xlu0 %v3987_v53 }
 0x905   : > { %4048 = vadd.xlane.f32.xlu0 %v3989_v13 }
 0x909   : > { %4052 = vadd.xlane.f32.xlu0 %v3991_v58 }
 0x90d   : > { %4056 = vadd.xlane.f32.xlu0 %v3993_v27  ;;  %v4093_v27 = vadd.s32 %v6968_v45, %v7238_v10 }
 0x90e   : > { %v3645_v18 = vpop.xlane.xlu1 %3644 }
 0x912   : > { %v3641_v35 = vpop.xlane.xlu1 %3640 }
 0x916   : > { %v3647_v34 = vpop.xlane.xlu0 %3646 }
 0x91a   : > { %v3643_v55 = vpop.xlane.xlu0 %3642 }
 0x91b   : > { %5411 = vlog2.f32 %v3643_v55 }
 0x91c   : > { %5413 = vlog2.f32 %v3641_v35 }
 0x91d   : > { %5415 = vlog2.f32 %v3645_v18  ;;  %v6978_v18 = vstv %s4125_s0 }
 0x91e   : > { %5417 = vlog2.f32 %v3647_v34  ;;  %vm4128_vm2 = vcmp.lt.s32.totalorder %v4094_v3, %v6978_v18  ;;  %vm4127_vm3 = vcmp.lt.s32.totalorder %v4093_v27, %v6978_v18  ;;  %vm4129_vm5 = vcmp.lt.s32.totalorder %v4095_v41, %v6978_v18 }
 0x91f   : > { %v3653_v7 = vpop.xlane.xlu0 %3652 }
 0x923   : > { %v3649_v30 = vpop.xlane.xlu1 %3648 }
 0x924   : > { %5419 = vlog2.f32 %v3649_v30 }
 0x925   : > { %v5412_v0 = vpop.eup %5411 }
 0x926   : > { %v5414_v17 = vpop.eup %5413  ;;  %v3707_v56 = vmul.f32 0.6931472, %v5412_v0 }
 0x927   : > { %v3655_v36 = vpop.xlane.xlu1 %3654  ;;  %v3705_v52 = vmul.f32 0.6931472, %v5414_v17  ;;  %v5416_v50 = vpop.eup %5415 }
 0x928   : > { %v3769_v57 = vadd.f32 %v3707_v56, %v6763_v42  ;;  %v5418_v19 = vpop.eup %5417  ;;  %v3709_v53 = vmul.f32 0.6931472, %v5416_v50  ;;  %v4063_v42 = vadd.s32 24, %v7238_v10 }
 0x929   : > { %v3768_v13 = vadd.f32 %v3705_v52, %v6751_v38  ;;  %v3711_v30 = vmul.f32 0.6931472, %v5418_v19  ;;  %v7239_v38 = vld [vmem:[#allocation6_spill] sm:$0xff] }
 0x92a   : > { %v4160_v34 = vsub.f32 %v3769_v57, %v6769_v22  ;;  %v4064_v22 = vadd.s32 32, %v7238_v10  ;;  %v4096_v52 = vadd.s32 %v6968_v45, %v4063_v42 }
 0x92b   : > { %v3651_v21 = vpop.xlane.xlu1 %3650 }
 0x92c   : > { %5421 = vlog2.f32 %v3651_v21  ;;  %v7240_v21 = vld [vmem:[#allocation8_spill] sm:$0xff]  ;;  %v4192_v50 = vsel %vm4128_vm2, %v4160_v34, 0.0  ;;  %v4097_v42 = vadd.s32 %v6968_v45, %v4064_v22  ;;  %vm4130_vm6 = vcmp.lt.s32.totalorder %v4096_v52, %v6978_v18 }
 0x92d   : > { %5423 = vlog2.f32 %v3653_v7  ;;  %v3770_v7 = vadd.f32 %v3709_v53, %v7239_v38  ;;  %v4159_v0 = vsub.f32 %v3768_v13, %v7240_v21  ;;  %v4065_v53 = vadd.s32 40, %v7238_v10  ;;  %v7243_v21 = vld [vmem:[#allocation10_spill] sm:$0xff] }
 0x92e   : > { %v6960_v39 = vpop.xlane.xlu0 %3660  ;;  %v5420_v58 = vpop.eup %5419  ;;  %5425 = vlog2.f32 %v3655_v36  ;;  %v7241_v36 = vld [vmem:[#allocation9_spill] sm:$0xff]  ;;  %v4066_v34 = vadd.s32 48, %v7238_v10  ;;  %vm4131_vm7 = vcmp.lt.s32.totalorder %v4097_v42, %v6978_v18 }
 0x92f   : > { %v6962_v51 = vpop.xlane.xlu1 %4016  ;;  %v3713_v17 = vmul.f32 0.6931472, %v5420_v58  ;;  %v3771_v19 = vadd.f32 %v3711_v30, %v7241_v36  ;;  %v7242_v58 = vld [vmem:[#allocation7_spill] sm:$0xff]  ;;  %v4191_v20 = vsel %vm4127_vm3, %v4159_v0, 0.0 }
 0x930   : > { %v4161_v38 = vsub.f32 %v3770_v7, %v7242_v58  ;;  %v4224_v7 = vsel %vm4223_vm4, %v4191_v20, 0.0 }
 0x931   : > { %v3772_v27 = vadd.f32 %v3713_v17, %v6779_v28  ;;  %v4162_v28 = vsub.f32 %v3771_v19, %v7243_v21  ;;  %v4098_v17 = vadd.s32 %v6968_v45, %v4065_v53 }
 0x932   : > { %v3657_v59 = vpop.xlane.xlu0 %3656  ;;  %v4193_v41 = vsel %vm4129_vm5, %v4161_v38, 0.0 }
 0x933   : > { %v6971_v8 = vpop.xlane.xlu1 %4018  ;;  %5427 = vlog2.f32 %v3657_v59  ;;  %v4225_v59 = vsel %vm4223_vm4, %v4192_v50, 0.0  ;;  %v4163_v22 = vsub.f32 %v3772_v27, %v6785_v1  ;;  %v4227_v19 = vsel %vm4223_vm4, %v4193_v41, 0.0 }
 0x934   : > { %v4226_v50 = vadd.f32 %v4225_v59, %v4224_v7  ;;  %v4194_v53 = vsel %vm4130_vm6, %v4162_v28, 0.0  ;;  %vm4132_vm8 = vcmp.lt.s32.totalorder %v4098_v17, %v6978_v18  ;;  %v7245_v28 = vld [vmem:[#allocation11_spill] sm:$0xff] }
 0x935   : > { %v4229_v21 = vsel %vm4223_vm4, %v4194_v53, 0.0 }
 0x936   : > { %v6964_v44 = vpop.xlane.xlu0 %3662  ;;  %v5422_v55 = vpop.eup %5421  ;;  %v4228_v1 = vadd.f32 %v4227_v19, %v4226_v50  ;;  %v7246_v19 = vld [vmem:[#allocation14_spill] sm:$0xff] }
 0x937   : > { %v6987_v56 = vpop.xlane.xlu1 %4020  ;;  %v3715_v57 = vmul.f32 0.6931472, %v5422_v55  ;;  %v5424_v13 = vpop.eup %5423 }
 0x938   : > { %v3717_v0 = vmul.f32 0.6931472, %v5424_v13  ;;  %v5426_v36 = vpop.eup %5425  ;;  %v7244_v13 = vld [vmem:[#allocation12_spill] sm:$0xff] }
 0x939   : > { %v3773_v55 = vadd.f32 %v3715_v57, %v6787_v37  ;;  %v4099_v37 = vadd.s32 %v6968_v45, %v4066_v34  ;;  %v3719_v27 = vmul.f32 0.6931472, %v5426_v36  ;;  %v4069_v36 = vadd.s32 72, %v7238_v10 }
 0x93a   : > { %v3659_v6 = vpop.xlane.xlu0 %3658  ;;  %v3774_v38 = vadd.f32 %v3717_v0, %v7244_v13 }
 0x93b   : > { %5429 = vlog2.f32 %v3659_v6  ;;  %v7003_v6 = vpop.xlane.xlu1 %4022  ;;  %v4164_v57 = vsub.f32 %v3773_v55, %v6795_v47  ;;  %v4067_v47 = vadd.s32 56, %v7238_v10  ;;  %v4068_v55 = vadd.s32 64, %v7238_v10 }
 0x93c   : > { %5431 = vlog2.f32 %v6960_v39  ;;  %v4195_v39 = vsel %vm4131_vm7, %v4163_v22, 0.0  ;;  %v4165_v0 = vsub.f32 %v3774_v38, %v7245_v28  ;;  %vm4133_vm9 = vcmp.lt.s32.totalorder %v4099_v37, %v6978_v18 }
 0x93d   : > { %v5428_v20 = vpop.eup %5427  ;;  %5433 = vlog2.f32 %v6964_v44  ;;  %v4196_v34 = vsel %vm4132_vm8, %v4164_v57, 0.0  ;;  %v4231_v17 = vsel %vm4223_vm4, %v4195_v39, 0.0  ;;  %v4230_v44 = vadd.f32 %v4229_v21, %v4228_v1 }
 0x93e   : > { %v6982_v35 = vpop.xlane.xlu0 %3668  ;;  %v3721_v52 = vmul.f32 0.6931472, %v5428_v20  ;;  %v3775_v41 = vadd.f32 %v3719_v27, %v6777_v29  ;;  %v4233_v22 = vsel %vm4223_vm4, %v4196_v34, 0.0  ;;  %v4101_v37 = vadd.s32 %v6968_v45, %v4068_v55 }
 0x93f   : > { %v7021_v59 = vpop.xlane.xlu1 %4024  ;;  %v4232_v20 = vadd.f32 %v4231_v17, %v4230_v44  ;;  %v4070_v34 = vadd.s32 80, %v7238_v10  ;;  %v7247_v44 = vld [vmem:[#allocation13_spill] sm:$0xff] }
 0x940   : > { %v3776_v53 = vadd.f32 %v3721_v52, %v7246_v19  ;;  %v4166_v1 = vsub.f32 %v3775_v41, %v6945_v46  ;;  %vm4135_vm11 = vcmp.lt.s32.totalorder %v4101_v37, %v6978_v18 }
 0x941   : > { %v4234_v29 = vadd.f32 %v4233_v22, %v4232_v20  ;;  %v4071_v22 = vadd.s32 88, %v7238_v10 }
 0x942   : > { %v3665_v3 = vpop.xlane.xlu0 %3664  ;;  %v4167_v52 = vsub.f32 %v3776_v53, %v6951_v24  ;;  %v4103_v24 = vadd.s32 %v6968_v45, %v4070_v34  ;;  %v4073_v53 = vadd.s32 104, %v7238_v10 }
 0x943   : > { %5435 = vlog2.f32 %v3665_v3  ;;  %v4100_v3 = vadd.s32 %v6968_v45, %v4067_v47  ;;  %v7036_v13 = vpop.xlane.xlu1 %4026 }
 0x944   : > { %vm4137_vm13 = vcmp.lt.s32.totalorder %v4103_v24, %v6978_v18 }
 0x945   : > { %v5430_v42 = vpop.eup %5429  ;;  %vm4134_vm10 = vcmp.lt.s32.totalorder %v4100_v3, %v6978_v18  ;;  %v4199_v3 = vsel %vm4135_vm11, %v4167_v52, 0.0 }
 0x946   : > { %v7005_v30 = vpop.xlane.xlu0 %3670  ;;  %v3723_v50 = vmul.f32 0.6931472, %v5430_v42  ;;  %v5432_v57 = vpop.eup %5431  ;;  %v4102_v42 = vadd.s32 %v6968_v45, %v4069_v36  ;;  %v4198_v46 = vsel %vm4134_vm10, %v4166_v1, 0.0 }
 0x947   : > { %v3725_v27 = vmul.f32 0.6931472, %v5432_v57  ;;  %v5434_v47 = vpop.eup %5433 }
 0x948   : > { %v3777_v39 = vadd.f32 %v3723_v50, %v6805_v2  ;;  %v3727_v50 = vmul.f32 0.6931472, %v5434_v47  ;;  %vm4136_vm12 = vcmp.lt.s32.totalorder %v4102_v42, %v6978_v18 }
 0x949   : > { %v3778_v41 = vadd.f32 %v3725_v27, %v7247_v44 }
 0x94a   : > { %v3667_v58 = vpop.xlane.xlu0 %3666  ;;  %v3779_v1 = vadd.f32 %v3727_v50, %v6801_v62  ;;  %v4074_v50 = vadd.s32 112, %v7238_v10 }
 0x94b   : > { %5437 = vlog2.f32 %v3667_v58  ;;  %v4197_v58 = vsel %vm4133_vm9, %v4165_v0, 0.0  ;;  %v7050_v0 = vpop.xlane.xlu1 %4028  ;;  %v4169_v37 = vsub.f32 %v3778_v41, %v6958_v40  ;;  %v4106_v40 = vadd.s32 %v6968_v45, %v4073_v53 }
 0x94c   : > { %5439 = vlog2.f32 %v6982_v35  ;;  %v4235_v55 = vsel %vm4223_vm4, %v4197_v58, 0.0  ;;  %v4168_v35 = vsub.f32 %v3777_v39, %v6956_v48  ;;  %v4237_v48 = vsel %vm4223_vm4, %v4198_v46, 0.0 }
 0x94d   : > { %v5436_v28 = vpop.eup %5435  ;;  %v4236_v2 = vadd.f32 %v4235_v55, %v4234_v29  ;;  %5441 = vlog2.f32 %v7005_v30  ;;  %v4072_v30 = vadd.s32 96, %v7238_v10  ;;  %v4104_v39 = vadd.s32 %v6968_v45, %v4071_v22 }
 0x94e   : > { %v7025_v7 = vpop.xlane.xlu0 %3676  ;;  %v3729_v36 = vmul.f32 0.6931472, %v5436_v28  ;;  %v4200_v19 = vsel %vm4136_vm12, %v4168_v35, 0.0  ;;  %v4201_v62 = vsel %vm4137_vm13, %v4169_v37, 0.0  ;;  %v4170_v46 = vsub.f32 %v3779_v1, %v6962_v51 }
 0x94f   : > { %v4238_v20 = vadd.f32 %v4237_v48, %v4236_v2  ;;  %v7065_v42 = vpop.xlane.xlu1 %4030  ;;  %v4241_v34 = vsel %vm4223_vm4, %v4200_v19, 0.0  ;;  %v4105_v52 = vadd.s32 %v6968_v45, %v4072_v30  ;;  %vm4138_vm14 = vcmp.lt.s32.totalorder %v4104_v39, %v6978_v18 }
 0x950   : > { %v3780_v27 = vadd.f32 %v3729_v36, %v6818_v16  ;;  %vm4140_vm0 = vcmp.lt.s32.totalorder %v4106_v40, %v6978_v18  ;;  %v4202_v22 = vsel %vm4138_vm14, %v4170_v46, 0.0  ;;  %v4107_v19 = vadd.s32 %v6968_v45, %v4074_v50 }
 0x951   : > { %vm4139_vm15 = vcmp.lt.s32.totalorder %v4105_v52, %v6978_v18  ;;  %v4076_v53 = vadd.s32 128, %v7238_v10 }
 0x952   : > { %v3673_v38 = vpop.xlane.xlu0 %3672  ;;  %vm4141_vm1 = vcmp.lt.s32.totalorder %v4107_v19, %v6978_v18 }
 0x953   : > { %5443 = vlog2.f32 %v3673_v38  ;;  %v4239_v38 = vsel %vm4223_vm4, %v4199_v3, 0.0  ;;  %v7081_v24 = vpop.xlane.xlu1 %4032 }
 0x954   : > { %v4240_v28 = vadd.f32 %v4239_v38, %v4238_v20 }
 0x955   : > { %v5438_v17 = vpop.eup %5437 }
 0x956   : > { %v3679_v21 = vpop.xlane.xlu0 %3678  ;;  %v3731_v58 = vmul.f32 0.6931472, %v5438_v17  ;;  %v5440_v29 = vpop.eup %5439  ;;  %v4242_v16 = vadd.f32 %v4241_v34, %v4240_v28  ;;  %v4171_v17 = vsub.f32 %v3780_v27, %v6971_v8 }
 0x957   : > { %v3733_v2 = vmul.f32 0.6931472, %v5440_v29  ;;  %v5442_v35 = vpop.eup %5441  ;;  %v7093_v52 = vpop.xlane.xlu1 %4034 }
 0x958   : > { %v3781_v55 = vadd.f32 %v3731_v58, %v6827_v14  ;;  %v4243_v14 = vsel %vm4223_vm4, %v4201_v62, 0.0  ;;  %v3735_v36 = vmul.f32 0.6931472, %v5442_v35  ;;  %v4203_v48 = vsel %vm4139_vm15, %v4171_v17, 0.0 }
 0x959   : > { %v3782_v8 = vadd.f32 %v3733_v2, %v6809_v9  ;;  %v4247_v38 = vsel %vm4223_vm4, %v4203_v48, 0.0  ;;  %v4077_v9 = vadd.s32 136, %v7238_v10  ;;  %v4078_v62 = vadd.s32 144, %v7238_v10 }
 0x95a   : > { %v3675_v57 = vpop.xlane.xlu0 %3674  ;;  %v4172_v51 = vsub.f32 %v3781_v55, %v6987_v56  ;;  %v4245_v56 = vsel %vm4223_vm4, %v4202_v22, 0.0  ;;  %v3783_v1 = vadd.f32 %v3735_v36, %v6816_v26  ;;  %v4109_v55 = vadd.s32 %v6968_v45, %v4076_v53 }
 0x95b   : > { %5445 = vlog2.f32 %v3675_v57  ;;  %v4244_v57 = vadd.f32 %v4243_v14, %v4242_v16  ;;  %v4173_v29 = vsub.f32 %v3782_v8, %v7003_v6  ;;  %v4111_v14 = vadd.s32 %v6968_v45, %v4078_v62 }
 0x95c   : > { %5447 = vlog2.f32 %v7025_v7  ;;  %v4075_v7 = vadd.s32 120, %v7238_v10  ;;  %v4204_v58 = vsel %vm4140_vm0, %v4172_v51, 0.0  ;;  %v4174_v46 = vsub.f32 %v3783_v1, %v7021_v59 }
 0x95d   : > { %v5444_v41 = vpop.eup %5443  ;;  %5449 = vlog2.f32 %v3679_v21  ;;  %v4246_v39 = vadd.f32 %v4245_v56, %v4244_v57  ;;  %v4249_v40 = vsel %vm4223_vm4, %v4204_v58, 0.0  ;;  %v4205_v35 = vsel %vm4141_vm1, %v4173_v29, 0.0 }
 0x95e   : > { %v3685_v47 = vpop.xlane.xlu0 %3684  ;;  %v3737_v30 = vmul.f32 0.6931472, %v5444_v41  ;;  %v4108_v27 = vadd.s32 %v6968_v45, %v4075_v7  ;;  %vm4143_vm3 = vcmp.lt.s32.totalorder %v4109_v55, %v6978_v18  ;;  %v4251_v7 = vsel %vm4223_vm4, %v4205_v35, 0.0 }
 0x95f   : > { %v4248_v26 = vadd.f32 %v4247_v38, %v4246_v39  ;;  %v4079_v36 = vadd.s32 152, %v7238_v10  ;;  %vm4145_vm6 = vcmp.lt.s32.totalorder %v4111_v14, %v6978_v18  ;;  %v4081_v53 = vadd.s32 168, %v7238_v10 }
 0x960   : > { %v3784_v34 = vadd.f32 %v3737_v30, %v6848_v54  ;;  %v4110_v54 = vadd.s32 %v6968_v45, %v4077_v9  ;;  %vm4142_vm2 = vcmp.lt.s32.totalorder %v4108_v27, %v6978_v18  ;;  %v4080_v30 = vadd.s32 160, %v7238_v10 }
 0x961   : > { %v4250_v16 = vadd.f32 %v4249_v40, %v4248_v26 }
 0x962   : > { %v3681_v44 = vpop.xlane.xlu0 %3680  ;;  %v4175_v17 = vsub.f32 %v3784_v34, %v7036_v13  ;;  %vm4144_vm5 = vcmp.lt.s32.totalorder %v4110_v54, %v6978_v18  ;;  %v4113_v34 = vadd.s32 %v6968_v45, %v4080_v30 }
 0x963   : > { %5451 = vlog2.f32 %v3681_v44 }
 0x964   : > { %v4207_v13 = vsel %vm4143_vm3, %v4175_v17, 0.0  ;;  %vm4147_vm8 = vcmp.lt.s32.totalorder %v4113_v34, %v6978_v18 }
 0x965   : > { %v5446_v3 = vpop.eup %5445 }
 0x966   : > { %v3687_v20 = vpop.xlane.xlu0 %3686  ;;  %v3739_v37 = vmul.f32 0.6931472, %v5446_v3  ;;  %v5448_v21 = vpop.eup %5447  ;;  %v4252_v3 = vadd.f32 %v4251_v7, %v4250_v16  ;;  %v4084_v7 = vadd.s32 192, %v7238_v10 }
 0x967   : > { %v3741_v2 = vmul.f32 0.6931472, %v5448_v21  ;;  %v5450_v41 = vpop.eup %5449  ;;  %v4112_v21 = vadd.s32 %v6968_v45, %v4079_v36 }
 0x968   : > { %v3785_v6 = vadd.f32 %v3739_v37, %v6855_v61  ;;  %v7106_v61 = vpop.xlane.xlu1 %4036  ;;  %v3743_v22 = vmul.f32 0.6931472, %v5450_v41 }
 0x969   : > { %v3786_v51 = vadd.f32 %v3741_v2, %v6837_v23  ;;  %v4255_v23 = vsel %vm4223_vm4, %v4207_v13, 0.0  ;;  %vm4146_vm7 = vcmp.lt.s32.totalorder %v4112_v21, %v6978_v18 }
 0x96a   : > { %v3683_v28 = vpop.xlane.xlu0 %3682  ;;  %v4176_v59 = vsub.f32 %v3785_v6, %v7050_v0  ;;  %v3787_v37 = vadd.f32 %v3743_v22, %v6844_v4 }
 0x96b   : > { %5453 = vlog2.f32 %v3683_v28  ;;  %v4177_v58 = vsub.f32 %v3786_v51, %v7065_v42  ;;  %v4082_v28 = vadd.s32 176, %v7238_v10  ;;  %v4114_v42 = vadd.s32 %v6968_v45, %v4081_v53 }
 0x96c   : > { %5455 = vlog2.f32 %v3685_v47  ;;  %v4206_v47 = vsel %vm4142_vm2, %v4174_v46, 0.0  ;;  %v4208_v48 = vsel %vm4144_vm5, %v4176_v59, 0.0  ;;  %v4039_v56 = vpop.xlane.xlu1 %4038  ;;  %v4178_v55 = vsub.f32 %v3787_v37, %v7081_v24 }
 0x96d   : > { %v5452_v50 = vpop.eup %5451  ;;  %5457 = vlog2.f32 %v3687_v20  ;;  %v4253_v19 = vsel %vm4223_vm4, %v4206_v47, 0.0  ;;  %v4257_v29 = vsel %vm4223_vm4, %v4208_v48, 0.0  ;;  %v4209_v40 = vsel %vm4145_vm6, %v4177_v58, 0.0 }
 0x96e   : > { %v3693_v44 = vpop.xlane.xlu0 %3692  ;;  %v3745_v57 = vmul.f32 0.6931472, %v5452_v50  ;;  %v4254_v20 = vadd.f32 %v4253_v19, %v4252_v3  ;;  %v4115_v35 = vadd.s32 %v6968_v45, %v4082_v28  ;;  %v4210_v24 = vsel %vm4146_vm7, %v4178_v55, 0.0 }
 0x96f   : > { %vm4148_vm9 = vcmp.lt.s32.totalorder %v4114_v42, %v6978_v18  ;;  %v4083_v59 = vadd.s32 184, %v7238_v10  ;;  %v4117_v19 = vadd.s32 %v6968_v45, %v4084_v7  ;;  %v4086_v53 = vadd.s32 208, %v7238_v10 }
 0x970   : > { %v3788_v39 = vadd.f32 %v3745_v57, %v6876_v31  ;;  %v4256_v27 = vadd.f32 %v4255_v23, %v4254_v20  ;;  %v4041_v2 = vpop.xlane.xlu1 %4040  ;;  %vm4149_vm10 = vcmp.lt.s32.totalorder %v4115_v35, %v6978_v18 }
 0x971   : > { %v4116_v48 = vadd.s32 %v6968_v45, %v4083_v59  ;;  %vm4151_vm12 = vcmp.lt.s32.totalorder %v4117_v19, %v6978_v18  ;;  %v4119_v34 = vadd.s32 %v6968_v45, %v4086_v53 }
 0x972   : > { %v3689_v8 = vpop.xlane.xlu0 %3688  ;;  %v4258_v26 = vadd.f32 %v4257_v29, %v4256_v27  ;;  %v4179_v31 = vsub.f32 %v3788_v39, %v7093_v52  ;;  %v4087_v29 = vadd.s32 216, %v7238_v10 }
 0x973   : > { %5459 = vlog2.f32 %v3689_v8  ;;  %vm4150_vm11 = vcmp.lt.s32.totalorder %v4116_v48, %v6978_v18  ;;  %vm4153_vm13 = vcmp.lt.s32.totalorder %v4119_v34, %v6978_v18  ;;  %v4091_v48 = vadd.s32 248, %v7238_v10 }
 0x974   : > { %5461 = vlog2.f32 %v3693_v44  ;;  %v4211_v52 = vsel %vm4147_vm8, %v4179_v31, 0.0  ;;  %v4043_v13 = vpop.xlane.xlu1 %4042 }
 0x975   : > { %v5454_v0 = vpop.eup %5453 }
 0x976   : > { %v3747_v38 = vmul.f32 0.6931472, %v5454_v0  ;;  %v3695_v1 = vpop.xlane.xlu0 %3694  ;;  %v5456_v9 = vpop.eup %5455 }
 0x977   : > { %v3749_v62 = vmul.f32 0.6931472, %v5456_v9  ;;  %v5458_v46 = vpop.eup %5457 }
 0x978   : > { %v3789_v4 = vadd.f32 %v3747_v38, %v6883_v12  ;;  %v4259_v12 = vsel %vm4223_vm4, %v4209_v40, 0.0  ;;  %v3751_v50 = vmul.f32 0.6931472, %v5458_v46  ;;  %v4047_v9 = vpop.xlane.xlu1 %4046  ;;  %v4120_v46 = vadd.s32 %v6968_v45, %v4087_v29 }
 0x979   : > { %v4260_v17 = vadd.f32 %v4259_v12, %v4258_v26  ;;  %v3790_v44 = vadd.f32 %v3749_v62, %v6867_v63  ;;  %v4263_v63 = vsel %vm4223_vm4, %v4211_v52, 0.0  ;;  %v4090_v26 = vadd.s32 240, %v7238_v10 }
 0x97a   : > { %v3691_v6 = vpop.xlane.xlu0 %3690  ;;  %v4180_v16 = vsub.f32 %v3789_v4, %v7106_v61  ;;  %v4261_v61 = vsel %vm4223_vm4, %v4210_v24, 0.0  ;;  %v3791_v36 = vadd.f32 %v3751_v50, %v6872_v32  ;;  %v4085_v32 = vadd.s32 200, %v7238_v10 }
 0x97b   : > { %5463 = vlog2.f32 %v3691_v6  ;;  %v4181_v3 = vsub.f32 %v3790_v44, %v4039_v56  ;;  %v4262_v8 = vadd.f32 %v4261_v61, %v4260_v17  ;;  %v4123_v59 = vadd.s32 %v6968_v45, %v4090_v26 }
 0x97c   : > { %5465 = vlog2.f32 %v3695_v1  ;;  %v4212_v51 = vsel %vm4148_vm9, %v4180_v16, 0.0  ;;  %v4182_v56 = vsub.f32 %v3791_v36, %v4041_v2  ;;  %v4118_v40 = vadd.s32 %v6968_v45, %v4085_v32  ;;  %v4051_v24 = vpop.xlane.xlu1 %4050 }
 0x97d   : > { %v5460_v54 = vpop.eup %5459  ;;  %v4265_v30 = vsel %vm4223_vm4, %v4212_v51, 0.0  ;;  %v4264_v23 = vadd.f32 %v4263_v63, %v4262_v8  ;;  %v4213_v20 = vsel %vm4149_vm10, %v4181_v3, 0.0  ;;  %v4089_v2 = vadd.s32 232, %v7238_v10 }
 0x97e   : > { %v3701_v41 = vpop.xlane.xlu0 %3700  ;;  %v3753_v14 = vmul.f32 0.6931472, %v5460_v54  ;;  %v5462_v47 = vpop.eup %5461  ;;  %v4267_v42 = vsel %vm4223_vm4, %v4213_v20, 0.0  ;;  %v4214_v62 = vsel %vm4150_vm11, %v4182_v56, 0.0  ;;  %vm4152_vm14 = vcmp.lt.s32.totalorder %v4118_v40, %v6978_v18 }
 0x97f   : > { %5467 = vlog2.f32 %v3701_v41  ;;  %v3757_v0 = vmul.f32 0.6931472, %v5462_v47  ;;  %v4266_v38 = vadd.f32 %v4265_v30, %v4264_v23  ;;  %v4269_v44 = vsel %vm4223_vm4, %v4214_v62, 0.0 }
 0x980   : > { %v3792_v57 = vadd.f32 %v3753_v14, %v6904_v5  ;;  %v4088_v5 = vadd.s32 224, %v7238_v10  ;;  %vm4154_vm0 = vcmp.lt.s32.totalorder %v4120_v46, %v6978_v18  ;;  %v4122_v47 = vadd.s32 %v6968_v45, %v4089_v2 }
 0x981   : > { %v3794_v21 = vadd.f32 %v3757_v0, %v6895_v15  ;;  %v4268_v6 = vadd.f32 %v4267_v42, %v4266_v38  ;;  %v4055_v0 = vpop.xlane.xlu1 %4054  ;;  %vm4157_vm1 = vcmp.lt.s32.totalorder %v4123_v59, %v6978_v18 }
 0x982   : > { %v3697_v22 = vpop.xlane.xlu0 %3696  ;;  %v4183_v1 = vsub.f32 %v3792_v57, %v4043_v13  ;;  %v4121_v55 = vadd.s32 %v6968_v45, %v4088_v5  ;;  %vm4156_vm2 = vcmp.lt.s32.totalorder %v4122_v47, %v6978_v18  ;;  %v4124_v5 = vadd.s32 %v6968_v45, %v4091_v48 }
 0x983   : > { %5469 = vlog2.f32 %v3697_v22  ;;  %v4185_v31 = vsub.f32 %v3794_v21, %v4047_v9  ;;  %v4270_v50 = vadd.f32 %v4269_v44, %v4268_v6 }
 0x984   : > { %v4215_v15 = vsel %vm4151_vm12, %v4183_v1, 0.0  ;;  %vm4155_vm15 = vcmp.lt.s32.totalorder %v4121_v55, %v6978_v18  ;;  %vm4158_vm3 = vcmp.lt.s32.totalorder %v4124_v5, %v6978_v18 }
 0x985   : > { %v5464_v58 = vpop.eup %5463  ;;  %v4271_v41 = vsel %vm4223_vm4, %v4215_v15, 0.0 }
 0x986   : > { %v3699_v37 = vpop.xlane.xlu0 %3698  ;;  %v5466_v39 = vpop.eup %5465  ;;  %v3755_v27 = vmul.f32 0.6931472, %v5464_v58  ;;  %v4272_v3 = vadd.f32 %v4271_v41, %v4270_v50 }
 0x987   : > { %5471 = vlog2.f32 %v3699_v37  ;;  %v3759_v12 = vmul.f32 0.6931472, %v5466_v39 }
 0x988   : > { %v3793_v16 = vadd.f32 %v3755_v27, %v6911_v60  ;;  %v4217_v60 = vsel %vm4153_vm13, %v4185_v31, 0.0 }
 0x989   : > { %v5468_v28 = vpop.eup %5467  ;;  %v3795_v13 = vadd.f32 %v3759_v12, %v6900_v49  ;;  %v4275_v19 = vsel %vm4223_vm4, %v4217_v60, 0.0 }
 0x98a   : > { %v3703_v4 = vpop.xlane.xlu0 %3702  ;;  %v3765_v35 = vmul.f32 0.6931472, %v5468_v28 }
 0x98b   : > { %5473 = vlog2.f32 %v3703_v4 }
 0x98c   : > { %v3798_v61 = vadd.f32 %v3765_v35, %v6923_v11 }
 0x98d   : > { %v5470_v54 = vpop.eup %5469 }
 0x98e   : > { %v3761_v17 = vmul.f32 0.6931472, %v5470_v54  ;;  %v4045_v52 = vpop.xlane.xlu0 %4044  ;;  %v4189_v53 = vsub.f32 %v3798_v61, %v4055_v0 }
 0x98f   : > { %v4184_v14 = vsub.f32 %v3793_v16, %v4045_v52 }
 0x990   : > { %v3796_v7 = vadd.f32 %v3761_v17, %v6930_v43  ;;  %v4221_v29 = vsel %vm4157_vm1, %v4189_v53, 0.0 }
 0x991   : > { %v5472_v51 = vpop.eup %5471  ;;  %v4216_v63 = vsel %vm4152_vm14, %v4184_v14, 0.0  ;;  %v4283_v45 = vsel %vm4223_vm4, %v4221_v29, 0.0 }
 0x992   : > { %v4187_v22 = vsub.f32 %v3796_v7, %v4051_v24  ;;  %v3763_v8 = vmul.f32 0.6931472, %v5472_v51  ;;  %v4273_v36 = vsel %vm4223_vm4, %v4216_v63, 0.0  ;;  %v4049_v57 = vpop.xlane.xlu0 %4048 }
 0x993   : > { %v4274_v43 = vadd.f32 %v4273_v36, %v4272_v3  ;;  %v4186_v30 = vsub.f32 %v3795_v13, %v4049_v57 }
 0x994   : > { %v3797_v23 = vadd.f32 %v3763_v8, %v6934_v33  ;;  %v4219_v20 = vsel %vm4155_vm15, %v4187_v22, 0.0 }
 0x995   : > { %v5474_v11 = vpop.eup %5473  ;;  %v4276_v58 = vadd.f32 %v4275_v19, %v4274_v43  ;;  %v4218_v49 = vsel %vm4154_vm0, %v4186_v30, 0.0  ;;  %v4279_v38 = vsel %vm4223_vm4, %v4219_v20, 0.0 }
 0x996   : > { %v3767_v37 = vmul.f32 0.6931472, %v5474_v11  ;;  %v4277_v10 = vsel %vm4223_vm4, %v4218_v49, 0.0  ;;  %v4053_v32 = vpop.xlane.xlu0 %4052 }
 0x997   : > { %v4278_v33 = vadd.f32 %v4277_v10, %v4276_v58  ;;  %v4188_v56 = vsub.f32 %v3797_v23, %v4053_v32 }
 0x998   : > { %v3799_v1 = vadd.f32 %v3767_v37, %v6928_v25 }
 0x999   : > { %v4280_v9 = vadd.f32 %v4279_v38, %v4278_v33  ;;  %v4220_v21 = vsel %vm4156_vm2, %v4188_v56, 0.0 }
 0x99a   : > { %v4281_v39 = vsel %vm4223_vm4, %v4220_v21, 0.0  ;;  %v4057_v27 = vpop.xlane.xlu0 %4056 }
 0x99b   : > { %v4282_v34 = vadd.f32 %v4281_v39, %v4280_v9  ;;  %v4190_v28 = vsub.f32 %v3799_v1, %v4057_v27 }
 0x99d   : > { %v4222_v42 = vsel %vm4158_vm3, %v4190_v28, 0.0  ;;  %v4284_v4 = vadd.f32 %v4283_v45, %v4282_v34 }
 0x99e   : > { %v4285_v25 = vsel %vm4223_vm4, %v4222_v42, 0.0 }
 0x99f   : > { %v4286_v40 = vadd.f32 %v4285_v25, %v4284_v4 }
 0x9a1   : > { %4287 = vadd.xlane.f32.xlu1 %v4286_v40 }
 0xa2e   : > { %v4288_v55 = vpop.xlane.xlu1 %4287 }
 0xa2f   : > { %v4289_v26 = vrot.slane %v4288_v55, 4 }
 0xa31   : > { %v4290_v62 = vadd.f32 %v4289_v26, %v4288_v55 }
 0xa33   : > { %v4291_v15 = vrot.slane %v4290_v62, 2 }
 0xa35   : > { %v4292_v6 = vadd.f32 %v4291_v15, %v4290_v62 }
 0xa37   : > { %v4293_v31 = vrot.slane %v4292_v6, 1 }
 0xa39   : > { %v4294_v18 = vadd.f32 %v4293_v31, %v4292_v6 }
 0xa3b   : > { %5212 = vpush %v4294_v18 }
 0xa6c   : > { %s5213_s28 = spop %5212 }
 0xa6d   : > { %v4296_v46 = vstv %s5213_s28 }
 0xa6e   : > { %4297 = vst [vmem:[%s478_s27] sm:$0xff] %v4296_v46 }
 0xa6f PF: > { %s26_s15 = sadd.s32 1, %s5500_s15  }
 0xa70   : > { %p23_p5 = scmp.ge.s32.totalorder %s26_s15, 5  }
 0xa72   :  { %25 = sbr.rel (!%p23_p5) target bundleno = 2 (0x2), region = 113 }

</bundles_post_ra>
